<compile_context>
chip_gen: v7x
topology: tpu7x:2x2x1
jax: 0.10.0
libtpu: 0.0.40
codegen_flags: <defaults>
</compile_context>

<pallas_src>
from functools import partial

import jax
import jax.numpy as jnp
import numpy as np
from jax.experimental import pallas as pl
from jax.experimental.pallas import tpu as pltpu

NORM_EPS = 1e-5


# ----------------------------------------------------------------------------
# Pallas kernel: `block_n` batch elements per grid step, fully fused
# conv + BN + ReLU + projection, no scratch.
# ----------------------------------------------------------------------------
def _mhca_kernel(xp_ref, w3_ref, bias_ref, wpt_ref, o_ref):
    # xp_ref  : (Nb, H+2, W+2, C)  zero-padded NHWC input tile (bf16)
    # w3_ref  : (9*C, C)           im2col conv weight, BN scale folded in (bf16)
    # bias_ref: (1, C)             folded BN bias (f32)
    # wpt_ref : (C, C)             1x1 projection weight, (C_out, C_in) (bf16)
    # o_ref   : (Nb, C, H*W)       NCHW-ready, lane-dense output tile (f32)
    Nb, C, HW = o_ref.shape
    H = xp_ref.shape[1] - 2
    W = xp_ref.shape[2] - 2

    def patch(b, s):
        # One 3x3 tap for image b: (H, W, C) window -> (H*W, C) rows. Static
        # slice offsets; the (H, W) -> H*W collapse is tile-aligned (cheap).
        dy, dx = s // 3, s % 3
        return xp_ref[b, dy:dy + H, dx:dx + W, :].reshape(H * W, C)

    # Grouped 3x3 conv (+ folded BN scale) as 3 accumulating bf16 matmuls over
    # in-register slabs: taps (0..3) -> K=4C, (4..7) -> K=4C, (8) -> K=C.
    tap_groups = ((0, 1, 2, 3), (4, 5, 6, 7), (8,))
    acc = None
    row0 = 0
    for taps in tap_groups:
        per_b = []
        for b in range(Nb):
            parts = [patch(b, s) for s in taps]
            per_b.append(parts[0] if len(parts) == 1
                         else jnp.concatenate(parts, axis=1))
        slab = per_b[0] if Nb == 1 else jnp.concatenate(per_b, axis=0)
        kdim = len(taps) * C
        w_slab = w3_ref[row0:row0 + kdim, :]                 # (kdim, C) bf16
        contrib = jnp.dot(slab, w_slab,
                          preferred_element_type=jnp.float32)
        acc = contrib if acc is None else acc + contrib      # (Nb*HW, C) f32
        row0 += kdim

    # Folded BN bias + ReLU, kept in f32.
    y = jnp.maximum(acc + bias_ref[...], 0.0)                # (Nb*HW, C)

    # One in-kernel transpose (XLU) so the projection directly produces the
    # NCHW layout; projection on the MXU with N = Nb*HW full-width lanes.
    y_t = jnp.transpose(y).astype(jnp.bfloat16)              # (C, Nb*HW)
    out_t = jnp.dot(wpt_ref[...], y_t,
                    preferred_element_type=jnp.float32)      # (C, Nb*HW) f32

    # Unmasked 256-lane stores, one (C, H*W) slab per image.
    for b in range(Nb):
        o_ref[b] = out_t[:, b * HW:(b + 1) * HW].astype(o_ref.dtype)


# ----------------------------------------------------------------------------
# Wrapper: parameter folding (pure jnp, jit-safe) + layout plumbing + pallas_call
# ----------------------------------------------------------------------------
@partial(jax.jit, static_argnums=(2, 3))
def _mhca_impl(x_nchw, params, head_dim, block_n):
    N, C, H, W = x_nchw.shape
    groups = C // head_dim
    hd = head_dim

    if block_n is None:
        # Default: keep >= 2 grid steps (both v7x TensorCores get work).
        # On single-TC chips (v5e / v6e) prefer block_n = N (one grid step).
        block_n = N // 2 if (N >= 2 and N % 2 == 0) else 1
    assert N % block_n == 0, "batch must be divisible by block_n"

    # --- weight folding (traceable jnp; no host-side numpy) -----------------
    # (C, head_dim, 3, 3) -> per-tap dense (C_in, C_out), block-diagonal over
    # groups, stacked along K -> (9*C, C).
    w3 = params["group_conv3x3_w"].astype(jnp.float32)       # (C, hd, 3, 3)
    w3_r = w3.reshape(groups, hd, hd, 3, 3)                  # (g, co_l, ci_l, ky, kx)
    w3_r = jnp.transpose(w3_r, (3, 4, 0, 2, 1)).reshape(9, groups, hd, hd)
    eye_g = jnp.eye(groups, dtype=jnp.float32)
    w3_dense = jnp.einsum("sgij,gh->sgihj", w3_r, eye_g).reshape(9, C, C)

    # Fold BN (eval mode): scale into conv-weight columns, keep the bias.
    scale = params["bn_gamma"] / jnp.sqrt(params["bn_var"] + NORM_EPS)
    bias = params["bn_beta"] - params["bn_mean"] * scale
    w3_k = (w3_dense * scale[None, None, :]).reshape(9 * C, C).astype(jnp.bfloat16)
    bias2 = bias.reshape(1, C).astype(jnp.float32)

    # 1x1 projection weight kept in its natural (C_out, C_in) orientation for
    # the transposed (NCHW-emitting) projection.
    wp_t = params["projection_w"][:, :, 0, 0].astype(jnp.bfloat16)

    # NCHW -> NHWC, zero-pad spatially by 1 (3x3 halo), cast to bf16 for the
    # MXU.  All of this sits in the same jit as the pallas_call so XLA fuses it.
    x_nhwc = jnp.transpose(x_nchw, (0, 2, 3, 1))
    x_pad = jnp.pad(x_nhwc, ((0, 0), (1, 1), (1, 1), (0, 0))).astype(jnp.bfloat16)

    out = pl.pallas_call(
        _mhca_kernel,
        out_shape=jax.ShapeDtypeStruct((N, C, H * W), jnp.float32),
        grid_spec=pltpu.PrefetchScalarGridSpec(
            num_scalar_prefetch=0,
            grid=(N // block_n,),
            in_specs=[
                pl.BlockSpec((block_n, H + 2, W + 2, C), lambda n: (n, 0, 0, 0)),
                pl.BlockSpec((9 * C, C), lambda n: (0, 0)),
                pl.BlockSpec((1, C), lambda n: (0, 0)),
                pl.BlockSpec((C, C), lambda n: (0, 0)),
            ],
            out_specs=pl.BlockSpec((block_n, C, H * W), lambda n: (n, 0, 0)),
        ),
        compiler_params=pltpu.CompilerParams(
            dimension_semantics=("parallel",)),
    )(x_pad, w3_k, bias2, wp_t)

    # (N, C, H*W) -> (N, C, H, W): a free reshape, no transpose needed.
    return out.reshape(N, C, H, W)


def mhca_pallas(x_nchw, params, head_dim, block_n=None):
    """x_nchw: (N, C, H, W) float32. Returns (N, C, H, W) float32."""
    return _mhca_impl(x_nchw, params, head_dim, block_n)


# ----------------------------------------------------------------------------
# Pure-JAX reference (NCHW, mirrors the PyTorch forward in eval mode, fp32)
# ----------------------------------------------------------------------------
def mhca_ref(x_nchw, params, head_dim):
    C = x_nchw.shape[1]
    groups = C // head_dim
    y = jax.lax.conv_general_dilated(
        x_nchw, params["group_conv3x3_w"],
        window_strides=(1, 1), padding=((1, 1), (1, 1)),
        dimension_numbers=("NCHW", "OIHW", "NCHW"),
        feature_group_count=groups)
    scale = params["bn_gamma"] / jnp.sqrt(params["bn_var"] + NORM_EPS)
    bias = params["bn_beta"] - params["bn_mean"] * scale
    y = y * scale[None, :, None, None] + bias[None, :, None, None]
    y = jnp.maximum(y, 0.0)
    y = jax.lax.conv_general_dilated(
        y, params["projection_w"],
        window_strides=(1, 1), padding="VALID",
        dimension_numbers=("NCHW", "OIHW", "NCHW"))
    return y


# ----------------------------------------------------------------------------
# Deterministic parameter init + smoke test
# ----------------------------------------------------------------------------
def make_params(key, out_channels, head_dim):
    k = jax.random.split(key, 6)
    C = out_channels
    return {
        # nn.Conv2d(C, C, 3, groups=C//head_dim, bias=False) -> (C, head_dim, 3, 3)
        "group_conv3x3_w": 0.1 * jax.random.normal(k[0], (C, head_dim, 3, 3), jnp.float32),
        # BatchNorm2d(C)  (eval-mode running stats)
        "bn_gamma": 1.0 + 0.1 * jax.random.normal(k[1], (C,), jnp.float32),
        "bn_beta": 0.1 * jax.random.normal(k[2], (C,), jnp.float32),
        "bn_mean": 0.1 * jax.random.normal(k[3], (C,), jnp.float32),
        "bn_var": jax.random.uniform(k[4], (C,), jnp.float32, 0.5, 1.5),
        # nn.Conv2d(C, C, 1, bias=False) -> (C, C, 1, 1)
        "projection_w": 0.1 * jax.random.normal(k[5], (C, C, 1, 1), jnp.float32),
    }


if __name__ == "__main__":
    key = jax.random.PRNGKey(0)
    kx, kp = jax.random.split(key)

    N, C, H, W = 2, 32, 16, 16      # out_channels=32
    head_dim = 8                    # -> 4 groups
    x = jax.random.normal(kx, (N, C, H, W), jnp.float32)
    params = make_params(kp, C, head_dim)

    out = mhca_pallas(x, params, head_dim)
    out = jax.block_until_ready(out)

    ref = jax.block_until_ready(mhca_ref(x, params, head_dim))
    assert out.shape == (N, C, H, W)
    # bf16 MXU operands / bf16 activations into the projection, f32 accumulate:
    # accuracy is bounded by bf16 activation rounding -> loosened tolerance.
    np.testing.assert_allclose(np.asarray(out), np.asarray(ref),
                               rtol=3e-2, atol=3e-2)
    print("KERNEL_OK")
</pallas_src>

<mosaic_0001>
module attributes {stable_mosaic.version = 11 : i64} {
  func.func @_mhca_kernel(%arg0: i32, %arg1: memref<1x18x18x32xbf16, #tpu.memory_space<vmem>>, %arg2: memref<288x32xbf16, #tpu.memory_space<vmem>>, %arg3: memref<1x32xf32, #tpu.memory_space<vmem>>, %arg4: memref<32x32xbf16, #tpu.memory_space<vmem>>, %arg5: memref<1x32x256xf32, #tpu.memory_space<vmem>>) attributes {dimension_semantics = [#tpu.dimension_semantics<parallel>], iteration_bounds = array<i64: 2>, scalar_prefetch = 0 : i64, scratch_operands = 0 : i64, tpu.core_type = #tpu.core_type<tc>, window_params = [{transform_indices = @transform_0, window_bounds = array<i64: 1, 18, 18, 32>}, {pipeline_mode = #tpu.pipeline_mode<synchronous>, transform_indices = @transform_1, window_bounds = array<i64: 288, 32>}, {pipeline_mode = #tpu.pipeline_mode<synchronous>, transform_indices = @transform_2, window_bounds = array<i64: 1, 32>}, {pipeline_mode = #tpu.pipeline_mode<synchronous>, transform_indices = @transform_3, window_bounds = array<i64: 32, 32>}, {transform_indices = @transform_4, window_bounds = array<i64: 1, 32, 256>}]} {
    %c0 = arith.constant 0 : index
    %c0_0 = arith.constant 0 : index
    %c0_1 = arith.constant 0 : index
    %c0_2 = arith.constant 0 : index
    %0 = vector.load %arg1[%c0, %c0_0, %c0_1, %c0_2] : memref<1x18x18x32xbf16, #tpu.memory_space<vmem>>, vector<1x16x16x32xbf16>
    %1 = vector.shape_cast %0 : vector<1x16x16x32xbf16> to vector<16x16x32xbf16>
    %2 = vector.shape_cast %1 : vector<16x16x32xbf16> to vector<256x32xbf16>
    %c0_3 = arith.constant 0 : index
    %c0_4 = arith.constant 0 : index
    %c1 = arith.constant 1 : index
    %c0_5 = arith.constant 0 : index
    %3 = vector.load %arg1[%c0_3, %c0_4, %c1, %c0_5] : memref<1x18x18x32xbf16, #tpu.memory_space<vmem>>, vector<1x16x16x32xbf16>
    %4 = vector.shape_cast %3 : vector<1x16x16x32xbf16> to vector<16x16x32xbf16>
    %5 = vector.shape_cast %4 : vector<16x16x32xbf16> to vector<256x32xbf16>
    %c0_6 = arith.constant 0 : index
    %c0_7 = arith.constant 0 : index
    %c2 = arith.constant 2 : index
    %c0_8 = arith.constant 0 : index
    %6 = vector.load %arg1[%c0_6, %c0_7, %c2, %c0_8] : memref<1x18x18x32xbf16, #tpu.memory_space<vmem>>, vector<1x16x16x32xbf16>
    %7 = vector.shape_cast %6 : vector<1x16x16x32xbf16> to vector<16x16x32xbf16>
    %8 = vector.shape_cast %7 : vector<16x16x32xbf16> to vector<256x32xbf16>
    %c0_9 = arith.constant 0 : index
    %c1_10 = arith.constant 1 : index
    %c0_11 = arith.constant 0 : index
    %c0_12 = arith.constant 0 : index
    %9 = vector.load %arg1[%c0_9, %c1_10, %c0_11, %c0_12] : memref<1x18x18x32xbf16, #tpu.memory_space<vmem>>, vector<1x16x16x32xbf16>
    %10 = vector.shape_cast %9 : vector<1x16x16x32xbf16> to vector<16x16x32xbf16>
    %11 = vector.shape_cast %10 : vector<16x16x32xbf16> to vector<256x32xbf16>
    %12 = tpu.concatenate %2, %5, %8, %11 in 1 : vector<256x32xbf16>, vector<256x32xbf16>, vector<256x32xbf16>, vector<256x32xbf16> -> vector<256x128xbf16>
    %c0_13 = arith.constant 0 : index
    %c0_14 = arith.constant 0 : index
    %13 = vector.load %arg2[%c0_13, %c0_14] : memref<288x32xbf16, #tpu.memory_space<vmem>>, vector<128x32xbf16>
    %cst = arith.constant dense<0.000000e+00> : vector<256x32xf32>
    %14 = tpu.matmul %12, %13, %cst {dimension_numbers = #tpu.dot_dimension_numbers<[1], [0], [0], [1], [0, 0, 1, 1], [], []>} : vector<256x128xbf16>, vector<128x32xbf16>, vector<256x32xf32> -> vector<256x32xf32>
    %c0_15 = arith.constant 0 : index
    %c1_16 = arith.constant 1 : index
    %c1_17 = arith.constant 1 : index
    %c0_18 = arith.constant 0 : index
    %15 = vector.load %arg1[%c0_15, %c1_16, %c1_17, %c0_18] : memref<1x18x18x32xbf16, #tpu.memory_space<vmem>>, vector<1x16x16x32xbf16>
    %16 = vector.shape_cast %15 : vector<1x16x16x32xbf16> to vector<16x16x32xbf16>
    %17 = vector.shape_cast %16 : vector<16x16x32xbf16> to vector<256x32xbf16>
    %c0_19 = arith.constant 0 : index
    %c1_20 = arith.constant 1 : index
    %c2_21 = arith.constant 2 : index
    %c0_22 = arith.constant 0 : index
    %18 = vector.load %arg1[%c0_19, %c1_20, %c2_21, %c0_22] : memref<1x18x18x32xbf16, #tpu.memory_space<vmem>>, vector<1x16x16x32xbf16>
    %19 = vector.shape_cast %18 : vector<1x16x16x32xbf16> to vector<16x16x32xbf16>
    %20 = vector.shape_cast %19 : vector<16x16x32xbf16> to vector<256x32xbf16>
    %c0_23 = arith.constant 0 : index
    %c2_24 = arith.constant 2 : index
    %c0_25 = arith.constant 0 : index
    %c0_26 = arith.constant 0 : index
    %21 = vector.load %arg1[%c0_23, %c2_24, %c0_25, %c0_26] : memref<1x18x18x32xbf16, #tpu.memory_space<vmem>>, vector<1x16x16x32xbf16>
    %22 = vector.shape_cast %21 : vector<1x16x16x32xbf16> to vector<16x16x32xbf16>
    %23 = vector.shape_cast %22 : vector<16x16x32xbf16> to vector<256x32xbf16>
    %c0_27 = arith.constant 0 : index
    %c2_28 = arith.constant 2 : index
    %c1_29 = arith.constant 1 : index
    %c0_30 = arith.constant 0 : index
    %24 = vector.load %arg1[%c0_27, %c2_28, %c1_29, %c0_30] : memref<1x18x18x32xbf16, #tpu.memory_space<vmem>>, vector<1x16x16x32xbf16>
    %25 = vector.shape_cast %24 : vector<1x16x16x32xbf16> to vector<16x16x32xbf16>
    %26 = vector.shape_cast %25 : vector<16x16x32xbf16> to vector<256x32xbf16>
    %27 = tpu.concatenate %17, %20, %23, %26 in 1 : vector<256x32xbf16>, vector<256x32xbf16>, vector<256x32xbf16>, vector<256x32xbf16> -> vector<256x128xbf16>
    %c128 = arith.constant 128 : index
    %c0_31 = arith.constant 0 : index
    %28 = vector.load %arg2[%c128, %c0_31] : memref<288x32xbf16, #tpu.memory_space<vmem>>, vector<128x32xbf16>
    %cst_32 = arith.constant dense<0.000000e+00> : vector<256x32xf32>
    %29 = tpu.matmul %27, %28, %cst_32 {dimension_numbers = #tpu.dot_dimension_numbers<[1], [0], [0], [1], [0, 0, 1, 1], [], []>} : vector<256x128xbf16>, vector<128x32xbf16>, vector<256x32xf32> -> vector<256x32xf32>
    %30 = arith.addf %14, %29 : vector<256x32xf32>
    %c0_33 = arith.constant 0 : index
    %c2_34 = arith.constant 2 : index
    %c2_35 = arith.constant 2 : index
    %c0_36 = arith.constant 0 : index
    %31 = vector.load %arg1[%c0_33, %c2_34, %c2_35, %c0_36] : memref<1x18x18x32xbf16, #tpu.memory_space<vmem>>, vector<1x16x16x32xbf16>
    %32 = vector.shape_cast %31 : vector<1x16x16x32xbf16> to vector<16x16x32xbf16>
    %33 = vector.shape_cast %32 : vector<16x16x32xbf16> to vector<256x32xbf16>
    %c256 = arith.constant 256 : index
    %c0_37 = arith.constant 0 : index
    %34 = vector.load %arg2[%c256, %c0_37] : memref<288x32xbf16, #tpu.memory_space<vmem>>, vector<32x32xbf16>
    %cst_38 = arith.constant dense<0.000000e+00> : vector<256x32xf32>
    %35 = tpu.matmul %33, %34, %cst_38 {dimension_numbers = #tpu.dot_dimension_numbers<[1], [0], [0], [1], [0, 0, 1, 1], [], []>} : vector<256x32xbf16>, vector<32x32xbf16>, vector<256x32xf32> -> vector<256x32xf32>
    %36 = arith.addf %30, %35 : vector<256x32xf32>
    %c0_39 = arith.constant 0 : index
    %c0_40 = arith.constant 0 : index
    %37 = vector.load %arg3[%c0_39, %c0_40] : memref<1x32xf32, #tpu.memory_space<vmem>>, vector<1x32xf32>
    %38 = vector.broadcast %37 : vector<1x32xf32> to vector<256x32xf32>
    %39 = arith.addf %36, %38 : vector<256x32xf32>
    %cst_41 = arith.constant 0.000000e+00 : f32
    %40 = vector.broadcast %cst_41 : f32 to vector<256x32xf32>
    %41 = arith.maximumf %39, %40 : vector<256x32xf32>
    %42 = tpu.transpose %41, [1, 0] : vector<256x32xf32> -> vector<32x256xf32>
    %43 = arith.truncf %42 : vector<32x256xf32> to vector<32x256xbf16>
    %c0_42 = arith.constant 0 : index
    %c0_43 = arith.constant 0 : index
    %44 = vector.load %arg4[%c0_42, %c0_43] : memref<32x32xbf16, #tpu.memory_space<vmem>>, vector<32x32xbf16>
    %cst_44 = arith.constant dense<0.000000e+00> : vector<32x256xf32>
    %45 = tpu.matmul %44, %43, %cst_44 {dimension_numbers = #tpu.dot_dimension_numbers<[1], [0], [0], [1], [0, 0, 1, 1], [], []>} : vector<32x32xbf16>, vector<32x256xbf16>, vector<32x256xf32> -> vector<32x256xf32>
    %c0_45 = arith.constant 0 : index
    %c0_46 = arith.constant 0 : index
    %c0_47 = arith.constant 0 : index
    %46 = vector.load %arg5[%c0_45, %c0_46, %c0_47] : memref<1x32x256xf32, #tpu.memory_space<vmem>>, vector<1x32x256xf32>
    %47 = vector.shape_cast %46 : vector<1x32x256xf32> to vector<32x256xf32>
    %48 = vector.shape_cast %45 : vector<32x256xf32> to vector<1x32x256xf32>
    tpu.vector_store %arg5[%c0_45, %c0_46, %c0_47], %48 {strides = array<i32>} : memref<1x32x256xf32, #tpu.memory_space<vmem>>, vector<1x32x256xf32>,
    return
  }
  func.func @transform_0(%arg0: i32) -> (i32, i32, i32, i32) {
    %c0_i32 = arith.constant 0 : i32
    %c0_i32_0 = arith.constant 0 : i32
    %c0_i32_1 = arith.constant 0 : i32
    %c0_i32_2 = arith.constant 0 : i32
    return %arg0, %c0_i32, %c0_i32_0, %c0_i32_1 : i32, i32, i32, i32
  }
  func.func @transform_1(%arg0: i32) -> (i32, i32) {
    %c0_i32 = arith.constant 0 : i32
    %c0_i32_0 = arith.constant 0 : i32
    %c0_i32_1 = arith.constant 0 : i32
    return %c0_i32, %c0_i32_0 : i32, i32
  }
  func.func @transform_2(%arg0: i32) -> (i32, i32) {
    %c0_i32 = arith.constant 0 : i32
    %c0_i32_0 = arith.constant 0 : i32
    %c0_i32_1 = arith.constant 0 : i32
    return %c0_i32, %c0_i32_0 : i32, i32
  }
  func.func @transform_3(%arg0: i32) -> (i32, i32) {
    %c0_i32 = arith.constant 0 : i32
    %c0_i32_0 = arith.constant 0 : i32
    %c0_i32_1 = arith.constant 0 : i32
    return %c0_i32, %c0_i32_0 : i32, i32
  }
  func.func @transform_4(%arg0: i32) -> (i32, i32, i32) {
    %c0_i32 = arith.constant 0 : i32
    %c0_i32_0 = arith.constant 0 : i32
    %c0_i32_1 = arith.constant 0 : i32
    return %arg0, %c0_i32, %c0_i32_0 : i32, i32, i32
  }
}

</mosaic_0001>

<bundles_post_ra>
// kernel: _mhca_impl.1
= control target key start
LH: loop header
LB: loop body
LE: loop exit
PB: predicated region body
PF: predicated region fallthrough
CT: control target
= control target key end

     0   :  { %s4809_s15 = smov 0   ;;  %s6846_s0 = inlined_call_operand.vmem [shape: bf16[2,18,18,32], index: 0, kind: input, shape index: {}]   ;;  %s6847_s1 = inlined_call_operand.vmem [shape: bf16[288,32], index: 1, kind: input, shape index: {}]   ;;  %s6848_s2 = inlined_call_operand.vmem [shape: f32[1,32], index: 2, kind: input, shape index: {}]   ;;  %s6849_s3 = inlined_call_operand.vmem [shape: bf16[32,32], index: 3, kind: input, shape index: {}]   ;;  %s6850_s4 = inlined_call_operand.vmem [shape: f32[2,32,256], index: 4, kind: output, shape index: {}]  }
   0x1 LB: > { %s3944_s16 = sadd.s32 4294967295, %s4778_s15   ;;  %p3948_p0 = scmp.ge.s32.totalorder %s4778_s15, 1  ;;  %s4778_s15 = sphi %s4809_s15, %s14_s15  }
   0x2   : > { %p162_p1 = scmp.lt.s32.totalorder %s4778_s15, 3 }
   0x4   : > { %p163_p2 = pnand %p3948_p0, %p162_p1 }
   0x6   : > { %166 = sbr.rel (%p163_p2) target bundleno = 941 (0x3ad), region = 36 }
   0xd   : > { %p188_p3 = scmp.lt.s32.totalorder %s3944_s16, 1  ;;  %vm698_vm0 = vcmask 1042432   ;;  %vm699_vm1 = vcmask 1046532   ;;  %s4780_s21 = smov 96   ;;  %vm247_vm3 = vsmask.f32 3328 }
   0xe   : > { %vm4850_vm2 = vmor %vm698_vm0, %vm699_vm1  ;;  %vm248_vm4 = vsmask.f32 7440  ;;  %s4781_s22 = smov 64   ;;  %s4782_s27 = smov 32   ;;  %vm1182_vm6 = vcmask 261120   ;;  %vm1231_vm7 = vcmask 523264  }
   0xf   : > { %s7098_s16 = smov (!%p188_p3, %s3944_s16), 1  ;;  %vm4913_vm5 = vmor %vm247_vm3, %vm248_vm4  ;;  %vm1264_vm8 = vcmask 785408  }
  0x10   : > { %s4592_s17 = smul.u32 216, %s7098_s16  ;;  %s4313_s12 = sshll.u32 %s7098_s16, 6 }
  0x12   : > { %s4823_s20 = scalar_lea.vmem %s6846_s0, %s4592_s17  ;;  %s197_s17 = scalar_lea.vmem %s6850_s4, %s4313_s12 }
  0x13   : > { %v3970_v0 = vld [vmem:[%s4823_s20 + $0x18] sm:$0xf]  ;;  %v4827_v1 = vld [vmem:[%s4823_s20 + $0x1c] sm:$0xf]  ;;  %v3968_v2 = vld [vmem:[%s4823_s20 + $0xc] sm:$0xf] }
  0x14   : > { %v4049_v3 = vcombine.low %v3970_v0, %v4827_v1  ;;  %v1370_v4 = vshrl.u32 %v3970_v0, 16  ;;  %v1373_v5 = vshll.u32 %v3970_v0, 16  ;;  %v1379_v6 = vshll.u32 %v4827_v1, 16  ;;  %v4833_v7 = vld [vmem:[%s4823_s20 + $0x10] sm:$0xf] }
  0x15   : > { %v4048_v8 = vcombine.low %v3968_v2, %v4833_v7  ;;  %v4837_v9 = vld [vmem:[%s4823_s20 + $0x1c] sm:$0xf]  ;;  %v1346_v10 = vshrl.u32 %v3968_v2, 16  ;;  %v4841_v11 = vld [vmem:[%s4823_s20 + $0x20] sm:$0x1]  ;;  %v1383_v13 = vshrl.u32 %v4827_v1, 16 }
  0x16   : > { %1152 = vrot.lane.b32.xlu1 %v4049_v3, %s4780_s21  ;;  %v4843_v12 = vrot.slane %v1370_v4, 4  ;;  %v1349_v14 = vshll.u32 %v3968_v2, 16  ;;  %v636_v15 = vld [vmem:[%s4823_s20 + $0x18] sm:$0xe]  ;;  %v4854_v17 = vrot.slane %v1373_v5, 5  ;;  %v4856_v18 = vrot.slane %v1379_v6, 5 }
  0x17   : > { %1150 = vrot.lane.b32.xlu0 %v4048_v8, %s4780_s21  ;;  %v3954_v19 = vrot.slane %v636_v15, 9  ;;  %v717_v20 = vrot.slane %v4837_v9, 5  ;;  %v200_v21 = vld [vmem:[%s4823_s20 + $0x4] sm:$0xf]  ;;  %v1355_v22 = vshll.u32 %v4833_v7, 16  ;;  %v720_v23 = vrot.slane %v4841_v11, 5 }
  0x18   : > { %v231_v24 = vld [vmem:[%s4823_s20 + $0x8] sm:$0x1]  ;;  %v634_v25 = vld [vmem:[%s4823_s20] sm:$0xe]  ;;  %v4864_v26 = vrot.slane %v1346_v10, 4  ;;  %v4871_v31 = vrot.slane %v1349_v14, 5 }
  0x19   : > { %v718_v27 = vsel %vm4850_vm2, %v3954_v19, %v717_v20  ;;  %v719_v28 = vrot.slane %v717_v20, 4  ;;  %v3952_v29 = vrot.slane %v634_v25, 9  ;;  %v4869_v30 = vld [vmem:[%s4823_s20 + $0x10] sm:$0xf]  ;;  %v1359_v32 = vshrl.u32 %v4833_v7, 16  ;;  %v4903_v2 = vld [vmem:[%s6847_s1] sm:$0xff]  }
  0x1a   : > { %v703_v33 = vrot.slane %v200_v21, 5  ;;  %v706_v34 = vrot.slane %v231_v24, 5  ;;  %v4875_v35 = vld [vmem:[%s4823_s20 + $0x14] sm:$0x1]  ;;  %v635_v37 = vld [vmem:[%s4823_s20 + $0xc] sm:$0xe]  ;;  %4428 = vmatprep.subr.bf16.mxu0 %v4903_v2 }
  0x1b   : > { %v721_v36 = vsel %vm4850_vm2, %v719_v28, %v720_v23  ;;  %v710_v38 = vrot.slane %v4869_v30, 5  ;;  %v713_v39 = vrot.slane %v4875_v35, 5  ;;  %v199_v40 = vld [vmem:[%s4823_s20] sm:$0xf]  ;;  %v3953_v44 = vrot.slane %v635_v37, 9  ;;  %v4676_v8 = vld [vmem:[%s6847_s1 + $0x8] sm:$0xff]   ;;  %4429 = vmatpush3.bf16.msra.mxu0 %v4903_v2 }
  0x1c   : > { %v4034_v41 = vcombine.low %v718_v27, %v721_v36  ;;  %v704_v42 = vsel %vm4850_vm2, %v3952_v29, %v703_v33  ;;  %v705_v43 = vrot.slane %v703_v33, 4  ;;  %v251_v46 = vshrl.u32 %v199_v40, 16  ;;  %v4886_v49 = vld [vmem:[%s4823_s20 + $0x28] sm:$0xf]  ;;  %v4894_v54 = vld [vmem:[%s4823_s20 + $0x2c] sm:$0x1]  ;;  %4430 = vmatprep.subr.bf16.mxu0 %v4676_v8 }
  0x1d   : > { %v712_v45 = vrot.slane %v710_v38, 4  ;;  %v254_v47 = vshll.u32 %v199_v40, 16  ;;  %v260_v48 = vshll.u32 %v200_v21, 16  ;;  %v711_v51 = vsel %vm4850_vm2, %v3953_v44, %v710_v38  ;;  %v637_v55 = vld [vmem:[%s4823_s20 + $0x24] sm:$0xe] }
  0x1e   : > { %1042 = vrot.lane.b32.xlu0 %v4034_v41, %s4781_s22  ;;  %v707_v50 = vsel %vm4850_vm2, %v705_v43, %v706_v34  ;;  %v264_v52 = vshrl.u32 %v200_v21, 16  ;;  %v270_v53 = vshll.u32 %v231_v24, 16  ;;  %v253_v58 = vrot.slane %v251_v46, 4  ;;  %v201_v60 = vld [vmem:[%s4823_s20 + $0xc] sm:$0xf] }
  0x1f   : > { %v4032_v56 = vcombine.low %v704_v42, %v707_v50  ;;  %v714_v57 = vsel %vm4850_vm2, %v712_v45, %v713_v39  ;;  %v256_v59 = vrot.slane %v254_v47, 5  ;;  %v262_v62 = vrot.slane %v260_v48, 5  ;;  %v205_v27 = vld [vmem:[%s4823_s20 + $0x24] sm:$0xf]  ;;  %v203_v43 = vld [vmem:[%s4823_s20 + $0x18] sm:$0xf]  ;;  %4431 = vmatpush3.bf16.msra.mxu0 %v4676_v8 }
  0x20   : > { %v4033_v61 = vcombine.low %v711_v51, %v714_v57  ;;  %v266_v63 = vrot.slane %v264_v52, 4  ;;  %v272_v0 = vrot.slane %v270_v53, 5  ;;  %v3955_v4 = vrot.slane %v637_v55, 9 }
  0x21   : > { %1038 = vrot.lane.b32.xlu1 %v4032_v56, %s4781_s22  ;;  %v257_v3 = vor.u32 %v256_v59, %v253_v58  ;;  %v724_v5 = vrot.slane %v4886_v49, 5  ;;  %v727_v6 = vrot.slane %v4894_v54, 5  ;;  %v275_v15 = vshrl.u32 %v201_v60, 16 }
  0x22   : > { %v267_v14 = vor.u32 %v266_v63, %v262_v62  ;;  %v278_v19 = vshll.u32 %v201_v60, 16  ;;  %v284_v20 = vshll.u32 %v4869_v30, 16  ;;  %v288_v25 = vshrl.u32 %v4869_v30, 16 }
  0x23   : > { %v258_v21 = vrot.slane %v257_v3, 4  ;;  %v725_v23 = vsel %vm4850_vm2, %v3955_v4, %v724_v5  ;;  %v726_v24 = vrot.slane %v724_v5, 4  ;;  %v277_v29 = vrot.slane %v275_v15, 4 }
  0x24   : > { %v268_v28 = vrot.slane %v267_v14, 4  ;;  %v280_v33 = vrot.slane %v278_v19, 5  ;;  %v286_v34 = vrot.slane %v284_v20, 5  ;;  %v290_v38 = vrot.slane %v288_v25, 4  ;;  %v4678_v19 = vld [vmem:[%s6847_s1 + $0x18] sm:$0xff]  }
  0x25   : > { %1040 = vrot.lane.b32.xlu1 %v4033_v61, %s4781_s22  ;;  %v263_v36 = vsel %vm4913_vm5, %v258_v21, %v262_v62  ;;  %v728_v37 = vsel %vm4850_vm2, %v726_v24, %v727_v6  ;;  %v294_v30 = vshll.u32 %v4875_v35, 16  ;;  %v323_v42 = vshrl.u32 %v205_v27, 16 }
  0x26   : > { %v273_v39 = vsel %vm4913_vm5, %v268_v28, %v272_v0  ;;  %v4035_v40 = vcombine.low %v725_v23, %v728_v37  ;;  %v281_v41 = vor.u32 %v280_v33, %v277_v29  ;;  %v291_v45 = vor.u32 %v290_v38, %v286_v34 }
  0x27   : > { %v4016_v44 = vcombine.low %v263_v36, %v273_v39  ;;  %v296_v46 = vrot.slane %v294_v30, 5  ;;  %v326_v47 = vshll.u32 %v205_v27, 16  ;;  %v325_v50 = vrot.slane %v323_v42, 4  ;;  %v3974_v27 = vld [vmem:[%s4823_s20 + $0x30] sm:$0xf] }
  0x28   : > { %v282_v48 = vrot.slane %v281_v41, 4  ;;  %v332_v51 = vshll.u32 %v4886_v49, 16  ;;  %v336_v52 = vshrl.u32 %v4886_v49, 16  ;;  %v292_v35 = vrot.slane %v291_v45, 4  ;;  %v4677_v49 = vld [vmem:[%s6847_s1 + $0x10] sm:$0xff]  }
  0x29   : > { %958 = vrot.lane.b32.xlu0 %v4016_v44, %s4782_s27  ;;  %1044 = vrot.lane.b32.xlu1 %v4035_v40, %s4781_s22  ;;  %v328_v53 = vrot.slane %v326_v47, 5  ;;  %v342_v55 = vshll.u32 %v4894_v54, 16  ;;  %v299_v56 = vshrl.u32 %v203_v43, 16  ;;  %v302_v60 = vshll.u32 %v203_v43, 16  ;;  %v4080_v36 = vld [vmem:[%s4823_s20 + $0xc] sm:$0xe] }
  0x2a   : > { %v287_v57 = vsel %vm4913_vm5, %v282_v48, %v286_v34  ;;  %v334_v58 = vrot.slane %v332_v51, 5  ;;  %v338_v59 = vrot.slane %v336_v52, 4  ;;  %v297_v61 = vsel %vm4913_vm5, %v292_v35, %v296_v46  ;;  %4432 = vmatprep.subr.bf16.mxu0 %v4677_v49  ;;  %v4987_v40 = vld [vmem:[%s4823_s20 + $0x24] sm:$0xf]  ;;  %v4990_v41 = vld [vmem:[%s4823_s20 + $0x28] sm:$0xf] }
  0x2b   : > { %v329_v62 = vor.u32 %v328_v53, %v325_v50  ;;  %v344_v63 = vrot.slane %v342_v55, 5  ;;  %v301_v0 = vrot.slane %v299_v56, 4  ;;  %v4017_v3 = vcombine.low %v287_v57, %v297_v61  ;;  %4433 = vmatpush3.bf16.msra.mxu0 %v4677_v49  ;;  %v4993_v42 = vld [vmem:[%s4823_s20 + $0x14] sm:$0x1]  ;;  %v207_v47 = vld [vmem:[%s4823_s20 + $0x30] sm:$0xf] }
  0x2c   : > { %v339_v4 = vor.u32 %v338_v59, %v334_v58  ;;  %v304_v54 = vrot.slane %v302_v60, 5  ;;  %v308_v5 = vshll.u32 %v4837_v9, 16  ;;  %v4948_v6 = vrot.slane %v1383_v13, 4  ;;  %4434 = vmatprep.subr.bf16.mxu0 %v4678_v19  ;;  %v208_v48 = vld [vmem:[%s4823_s20 + $0x34] sm:$0xf] }
  0x2d   : > { %v330_v8 = vrot.slane %v329_v62, 4  ;;  %v312_v14 = vshrl.u32 %v4837_v9, 16  ;;  %v318_v15 = vshll.u32 %v4841_v11, 16  ;;  %v1376_v20 = vor.u32 %v4854_v17, %v4843_v12  ;;  %960 = vrot.lane.b32.xlu0 %v4017_v3, %s4782_s27  ;;  %v235_v53 = vld [vmem:[%s4823_s20 + $0x38] sm:$0x1]  ;;  %v4682_v62 = vld [vmem:[%s6847_s1 + $0x28] sm:$0xff]  }
  0x2e   : > { %v340_v21 = vrot.slane %v339_v4, 4  ;;  %v305_v23 = vor.u32 %v304_v54, %v301_v0  ;;  %v310_v13 = vrot.slane %v308_v5, 5  ;;  %v1352_v24 = vor.u32 %v4871_v31, %v4864_v26  ;;  %v4974_v26 = vld [vmem:[%s4823_s20 + $0x34] sm:$0xf]  ;;  %v4681_v31 = vld [vmem:[%s6847_s1 + $0x20] sm:$0xff]  }
  0x2f   : > { %v4962_v9 = vrot.slane %v1355_v22, 5  ;;  %v335_v11 = vsel %vm4913_vm5, %v330_v8, %v334_v58  ;;  %v314_v25 = vrot.slane %v312_v14, 4  ;;  %v4969_v12 = vrot.slane %v1359_v32, 4  ;;  %6912 = vst [vmem:[#allocation2_spill] sm:$0xff] %v4974_v26  ;;  %4435 = vmatpush3.bf16.msra.mxu0 %v4678_v19  ;;  %v638_v59 = vld [vmem:[%s4823_s20 + $0x30] sm:$0xe] }
  0x30   : > { %v345_v17 = vsel %vm4913_vm5, %v340_v21, %v344_v63  ;;  %v306_v28 = vrot.slane %v305_v23, 4  ;;  %v1418_v22 = vshrl.u32 %v3974_v27, 16  ;;  %v320_v34 = vrot.slane %v318_v15, 5  ;;  %4436 = vmatprep.subr.bf16.mxu0 %v4681_v31  ;;  %v209_v54 = vld [vmem:[%s4823_s20 + $0x3c] sm:$0xf] }
  0x31   : > { %v4019_v29 = vcombine.low %v335_v11, %v345_v17  ;;  %v315_v33 = vor.u32 %v314_v25, %v310_v13  ;;  %v1421_v32 = vshll.u32 %v3974_v27, 16  ;;  %v4980_v37 = vrot.slane %v1376_v20, 4  ;;  %v5028_v19 = vld [vmem:[%s4823_s20 + $0x40] sm:$0xf]  ;;  %v5034_v17 = vld [vmem:[%s4823_s20 + $0x44] sm:$0x1] }
  0x32   : > { %v311_v38 = vsel %vm4913_vm5, %v306_v28, %v310_v13  ;;  %v4051_v39 = vcombine.low %v3974_v27, %v4974_v26  ;;  %v4997_v44 = vrot.slane %v1352_v24, 4  ;;  %v5001_v46 = vrot.slane %v1418_v22, 4  ;;  %v4683_v24 = vld [vmem:[%s6847_s1 + $0x30] sm:$0xff]  }
  0x33   : > { %964 = vrot.lane.b32.xlu1 %v4019_v29, %s4782_s27  ;;  %v316_v30 = vrot.slane %v315_v33, 4  ;;  %v4096_v52 = vrot.slane %v4080_v36, 9  ;;  %v1779_v35 = vrot.slane %v4833_v7, 5  ;;  %4437 = vmatpush3.bf16.msra.mxu0 %v4681_v31  ;;  %v5010_v56 = vrot.slane %v1421_v32, 5 }
  0x34   : > { %v1431_v57 = vshrl.u32 %v4974_v26, 16  ;;  %v1782_v58 = vrot.slane %v4993_v42, 5  ;;  %v347_v61 = vshrl.u32 %v207_v47, 16  ;;  %v350_v7 = vshll.u32 %v207_v47, 16  ;;  %4438 = vmatprep.subr.bf16.mxu0 %v4682_v62 }
  0x35   : > { %v321_v50 = vsel %vm4913_vm5, %v316_v30, %v320_v34  ;;  %v1780_v60 = vsel %vm4850_vm2, %v4096_v52, %v1779_v35  ;;  %v1781_v49 = vrot.slane %v1779_v35, 4  ;;  %v4050_v63 = vcombine.low %v4987_v40, %v4990_v41  ;;  %v4112_v34 = vld [vmem:[%s4823_s20 + $0x18] sm:$0xf] }
  0x36   : > { %v4018_v55 = vcombine.low %v311_v38, %v321_v50  ;;  %v356_v0 = vshll.u32 %v208_v48, 16  ;;  %v360_v3 = vshrl.u32 %v208_v48, 16  ;;  %v366_v4 = vshll.u32 %v235_v53, 16 }
  0x37   : > { %1156 = vrot.lane.b32.xlu1 %v4051_v39, %s4780_s21  ;;  %v1783_v5 = vsel %vm4850_vm2, %v1781_v49, %v1782_v58  ;;  %v349_v8 = vrot.slane %v347_v61, 4  ;;  %v352_v14 = vrot.slane %v350_v7, 5  ;;  %v3956_v15 = vrot.slane %v638_v59, 9  ;;  %4439 = vmatpush3.bf16.msra.mxu0 %v4682_v62  ;;  %v4081_v7 = vld [vmem:[%s4823_s20 + $0x18] sm:$0xe] }
  0x38   : > { %962 = vrot.lane.b32.xlu0 %v4018_v55, %s4782_s27  ;;  %v4176_v20 = vcombine.low %v1780_v60, %v1783_v5  ;;  %v358_v21 = vrot.slane %v356_v0, 5  ;;  %v362_v23 = vrot.slane %v360_v3, 4  ;;  %v368_v13 = vrot.slane %v366_v4, 5  ;;  %4440 = vmatprep.subr.bf16.mxu0 %v4683_v24  ;;  %v5049_v55 = vld [vmem:[%s4823_s20 + $0x1c] sm:$0xf] }
  0x39   : > { %v353_v11 = vor.u32 %v352_v14, %v349_v8  ;;  %v731_v25 = vrot.slane %v208_v48, 5  ;;  %v734_v27 = vrot.slane %v235_v53, 5  ;;  %v371_v28 = vshrl.u32 %v209_v54, 16  ;;  %6913 = vst [vmem:[#allocation3_spill] sm:$0xff] %v5049_v55  ;;  %v5056_v4 = vld [vmem:[%s4823_s20 + $0x20] sm:$0x1] }
  0x3a   : > { %v363_v22 = vor.u32 %v362_v23, %v358_v21  ;;  %v374_v31 = vshll.u32 %v209_v54, 16  ;;  %v380_v29 = vshll.u32 %v5028_v19, 16  ;;  %v384_v33 = vshrl.u32 %v5028_v19, 16  ;;  %v4687_v54 = vld [vmem:[%s6847_s1 + $0x38] sm:$0xff]  }
  0x3b   : > { %2418 = vrot.lane.b32.xlu1 %v4176_v20, %s4782_s27  ;;  %v354_v32 = vrot.slane %v353_v11, 4  ;;  %v732_v36 = vsel %vm4850_vm2, %v3956_v15, %v731_v25  ;;  %v733_v38 = vrot.slane %v731_v25, 4  ;;  %v373_v30 = vrot.slane %v371_v28, 4  ;;  %4441 = vmatpush3.bf16.msra.mxu0 %v4683_v24  ;;  %v3976_v20 = vld [vmem:[%s4823_s20 + $0x3c] sm:$0xf] }
  0x3c   : > { %1154 = vrot.lane.b32.xlu0 %v4050_v63, %s4780_s21  ;;  %v364_v39 = vrot.slane %v363_v22, 4  ;;  %v376_v47 = vrot.slane %v374_v31, 5  ;;  %v382_v48 = vrot.slane %v380_v29, 5  ;;  %v386_v50 = vrot.slane %v384_v33, 4  ;;  %v5072_v11 = vld [vmem:[%s4823_s20 + $0x40] sm:$0xf]  ;;  %4442 = vmatprep.subr.bf16.mxu0 %v4687_v54 }
  0x3d   : > { %v359_v52 = vsel %vm4913_vm5, %v354_v32, %v358_v21  ;;  %v735_v35 = vsel %vm4850_vm2, %v733_v38, %v734_v27  ;;  %v390_v53 = vshll.u32 %v5034_v17, 16  ;;  %v1939_v58 = vshrl.u32 %v4112_v34, 16  ;;  %v4689_v21 = vld [vmem:[%s6847_s1 + $0x40] sm:$0xff]   ;;  %6914 = vst [vmem:[#allocation4_spill] sm:$0xff] %v5072_v11  ;;  %v639_v31 = vld [vmem:[%s4823_s20 + $0x3c] sm:$0xe] }
  0x3e   : > { %v369_v59 = vsel %vm4913_vm5, %v364_v39, %v368_v13  ;;  %v4036_v60 = vcombine.low %v732_v36, %v735_v35  ;;  %v377_v49 = vor.u32 %v376_v47, %v373_v30  ;;  %v387_v61 = vor.u32 %v386_v50, %v382_v48  ;;  %4380 = vmatprep.subr.bf16.mxu1 %v4689_v21  ;;  %v5096_v50 = vld [vmem:[%s4823_s20 + $0x20] sm:$0x1] }
  0x3f   : > { %v1394_v62 = vshrl.u32 %v4987_v40, 16  ;;  %v4020_v63 = vcombine.low %v359_v52, %v369_v59  ;;  %v392_v0 = vrot.slane %v390_v53, 5  ;;  %v1942_v3 = vshll.u32 %v4112_v34, 16  ;;  %4443 = vmatpush3.bf16.msra.mxu0 %v4687_v54  ;;  %4381 = vmatpush3.bf16.msra.mxu1 %v4689_v21  ;;  %6916 = vst [vmem:[#allocation6_spill] sm:$0xff] %v5096_v50  ;;  %v4114_v59 = vld [vmem:[%s4823_s20 + $0x24] sm:$0xf] }
  0x40   : > { %v1397_v5 = vshll.u32 %v4987_v40, 16  ;;  %1046 = vrot.lane.b32.xlu1 %v4036_v60, %s4781_s22  ;;  %v378_v8 = vrot.slane %v377_v49, 4  ;;  %v388_v14 = vrot.slane %v387_v61, 4  ;;  %v4192_v15 = vcombine.low %v4112_v34, %v5049_v55 }
  0x41   : > { %v1424_v23 = vor.u32 %v5010_v56, %v5001_v46  ;;  %966 = vrot.lane.b32.xlu0 %v4020_v63, %s4782_s27  ;;  %v1941_v13 = vrot.slane %v1939_v58, 4  ;;  %v1944_v24 = vrot.slane %v1942_v3, 5  ;;  %v4097_v40 = vrot.slane %v4081_v7, 9  ;;  %v5113_v3 = vld [vmem:[%s4823_s20 + $0x28] sm:$0xf] }
  0x42   : > { %v383_v25 = vsel %vm4913_vm5, %v378_v8, %v382_v48  ;;  %v393_v27 = vsel %vm4913_vm5, %v388_v14, %v392_v0  ;;  %v1786_v28 = vrot.slane %v4827_v1, 5  ;;  %v1789_v22 = vrot.slane %v5056_v4, 5  ;;  %v5160_v56 = vld [vmem:[%s4823_s20 + $0x2c] sm:$0x1] }
  0x43   : > { %v5083_v29 = vrot.slane %v1431_v57, 4  ;;  %v5085_v33 = vrot.slane %v1394_v62, 4  ;;  %v4021_v32 = vcombine.low %v383_v25, %v393_v27  ;;  %v1952_v36 = vshrl.u32 %v5049_v55, 16  ;;  %6920 = vst [vmem:[#allocation10_spill] sm:$0xff] %v5160_v56  ;;  %v217_v62 = vld [vmem:[%s4823_s20 + $0x6c] sm:$0xf] }
  0x44   : > { %2530 = vrot.lane.b32.xlu1 %v4192_v15, %s4781_s22  ;;  %v1787_v1 = vsel %vm4850_vm2, %v4097_v40, %v1786_v28  ;;  %v1788_v38 = vrot.slane %v1786_v28, 4  ;;  %v4052_v30 = vcombine.low %v3976_v20, %v5072_v11  ;;  %v1399_v39 = vrot.slane %v1397_v5, 5  ;;  %v4693_v15 = vld [vmem:[%s6847_s1 + $0x50] sm:$0xff]   ;;  %v4145_v40 = vld [vmem:[%s4823_s20 + $0x2c] sm:$0x1] }
  0x45   : > { %6915 = vst [vmem:[#allocation5_spill] sm:$0xff] %v5083_v29  ;;  %968 = vrot.lane.b32.xlu0 %v4021_v32, %s4782_s27  ;;  %v1442_v57 = vshrl.u32 %v3976_v20, 16  ;;  %v3957_v47 = vrot.slane %v639_v31, 9  ;;  %v738_v48 = vrot.slane %v5028_v19, 5  ;;  %v1407_v52 = vshrl.u32 %v4990_v41, 16  ;;  %v4692_v19 = vld [vmem:[%s6847_s1 + $0x48] sm:$0xff]  }
  0x46   : > { %v1790_v35 = vsel %vm4850_vm2, %v1788_v38, %v1789_v22  ;;  %v741_v53 = vrot.slane %v5034_v17, 5  ;;  %v1945_v58 = vor.u32 %v1944_v24, %v1941_v13  ;;  %v1445_v49 = vshll.u32 %v3976_v20, 16  ;;  %4382 = vmatprep.subr.bf16.mxu1 %v4692_v19 }
  0x47   : > { %v4177_v60 = vcombine.low %v1787_v1, %v1790_v35  ;;  %v739_v61 = vsel %vm4850_vm2, %v3957_v47, %v738_v48  ;;  %v740_v7 = vrot.slane %v738_v48, 4  ;;  %v1948_v63 = vshll.u32 %v5049_v55, 16  ;;  %4383 = vmatpush3.bf16.msra.mxu1 %v4692_v19  ;;  %v4089_v55 = vld [vmem:[%s4823_s20 + $0x78] sm:$0xe] }
  0x48   : > { %1158 = vrot.lane.b32.xlu1 %v4052_v30, %s4780_s21  ;;  %v1954_v17 = vrot.slane %v1952_v36, 4  ;;  %v1958_v0 = vshll.u32 %v5096_v50, 16  ;;  %v1400_v54 = vor.u32 %v1399_v39, %v5085_v33  ;;  %v5117_v5 = vrot.slane %v1442_v57, 4  ;;  %4384 = vmatprep.subr.bf16.mxu1 %v4693_v15 }
  0x49   : > { %2420 = vrot.lane.b32.xlu0 %v4177_v60, %s4782_s27  ;;  %v742_v8 = vsel %vm4850_vm2, %v740_v7, %v741_v53  ;;  %v1963_v14 = vshrl.u32 %v4114_v59, 16  ;;  %v1946_v21 = vrot.slane %v1945_v58, 4  ;;  %v1950_v13 = vrot.slane %v1948_v63, 5  ;;  %v5135_v53 = vld [vmem:[%s4823_s20 + $0x48] sm:$0xf]  ;;  %v4697_v7 = vld [vmem:[%s6847_s1 + $0x58] sm:$0xff]  }
  0x4a   : > { %v4037_v20 = vcombine.low %v739_v61, %v742_v8  ;;  %v1966_v24 = vshll.u32 %v4114_v59, 16  ;;  %v1447_v25 = vrot.slane %v1445_v49, 5  ;;  %v1960_v27 = vrot.slane %v1958_v0, 5  ;;  %v5138_v58 = vld [vmem:[%s4823_s20 + $0x4c] sm:$0xf] }
  0x4b   : > { %v1965_v28 = vrot.slane %v1963_v14, 4  ;;  %v1976_v22 = vshrl.u32 %v5113_v3, 16  ;;  %v1955_v31 = vor.u32 %v1954_v17, %v1950_v13  ;;  %v4193_v32 = vcombine.low %v4114_v59, %v5113_v3  ;;  %6917 = vst [vmem:[#allocation7_spill] sm:$0xff] %v5138_v58  ;;  %4385 = vmatpush3.bf16.msra.mxu1 %v4693_v15  ;;  %v211_v14 = vld [vmem:[%s4823_s20 + $0x48] sm:$0xf] }
  0x4c   : > { %v1968_v33 = vrot.slane %v1966_v24, 5  ;;  %v6851_v36 = vrot.slane %v5113_v3, 5  ;;  %v1972_v1 = vshll.u32 %v5113_v3, 16  ;;  %v1982_v30 = vshll.u32 %v4145_v40, 16  ;;  %4386 = vmatprep.subr.bf16.mxu1 %v4697_v7  ;;  %v212_v24 = vld [vmem:[%s4823_s20 + $0x4c] sm:$0xf] }
  0x4d   : > { %1048 = vrot.lane.b32.xlu0 %v4037_v20, %s4781_s22  ;;  %v1978_v38 = vrot.slane %v1976_v22, 4  ;;  %v3264_v39 = vrot.slane %v4145_v40, 5  ;;  %v1951_v57 = vsel %vm4913_vm5, %v1946_v21, %v1950_v13  ;;  %v1956_v47 = vrot.slane %v1955_v31, 4 }
  0x4e   : > { %v3263_v48 = vrot.slane %v6851_v36, 4  ;;  %v1969_v35 = vor.u32 %v1968_v33, %v1965_v28  ;;  %v5143_v59 = vrot.slane %v1424_v23, 4  ;;  %v5145_v60 = vrot.slane %v1400_v54, 4  ;;  %v4082_v23 = vld [vmem:[%s4823_s20 + $0x24] sm:$0xe] }
  0x4f   : > { %v5147_v49 = vrot.slane %v1407_v52, 4  ;;  %v1974_v61 = vrot.slane %v1972_v1, 5  ;;  %v1455_v19 = vshrl.u32 %v5072_v11, 16  ;;  %v1961_v63 = vsel %vm4913_vm5, %v1956_v47, %v1960_v27  ;;  %4387 = vmatpush3.bf16.msra.mxu1 %v4697_v7  ;;  %v213_v7 = vld [vmem:[%s4823_s20 + $0x54] sm:$0xf] }
  0x50   : > { %6918 = vst [vmem:[#allocation8_spill] sm:$0xff] %v5143_v59  ;;  %v1970_v17 = vrot.slane %v1969_v35, 4  ;;  %v5157_v46 = vsel %vm4850_vm2, %v3263_v48, %v3264_v39  ;;  %v4208_v52 = vcombine.low %v1951_v57, %v1961_v63  ;;  %v1984_v54 = vrot.slane %v1982_v30, 5  ;;  %v640_v57 = vld [vmem:[%s4823_s20 + $0x48] sm:$0xe] }
  0x51   : > { %6919 = vst [vmem:[#allocation9_spill] sm:$0xff] %v5157_v46  ;;  %2532 = vrot.lane.b32.xlu0 %v4193_v32, %s4781_s22  ;;  %v1979_v0 = vor.u32 %v1978_v38, %v1974_v61  ;;  %v4053_v8 = vcombine.low %v5135_v53, %v5138_v58  ;;  %v1448_v21 = vor.u32 %v1447_v25, %v5117_v5  ;;  %v4098_v27 = vrot.slane %v4082_v23, 9  ;;  %v237_v5 = vld [vmem:[%s4823_s20 + $0x50] sm:$0x1] }
  0x52   : > { %v1975_v13 = vsel %vm4913_vm5, %v1970_v17, %v1974_v61  ;;  %2610 = vrot.lane.b32.xlu1 %v4208_v52, %s4780_s21  ;;  %v1793_v28 = vrot.slane %v4990_v41, 5  ;;  %v1796_v22 = vrot.slane %v5160_v56, 5  ;;  %v5177_v33 = vrot.slane %v1455_v19, 4  ;;  %v4699_v52 = vld [vmem:[%s6847_s1 + $0x60] sm:$0xff]  }
  0x53   : > { %v1980_v40 = vrot.slane %v1979_v0, 4  ;;  %v395_v25 = vshrl.u32 %v211_v14, 16  ;;  %v398_v32 = vshll.u32 %v211_v14, 16  ;;  %v404_v39 = vshll.u32 %v212_v24, 16  ;;  %4388 = vmatprep.subr.bf16.mxu1 %v4699_v52 }
  0x54   : > { %6921 = vst [vmem:[#allocation11_spill] sm:$0xff] %v5177_v33  ;;  %v1794_v38 = vsel %vm4850_vm2, %v4098_v27, %v1793_v28  ;;  %v1795_v30 = vrot.slane %v1793_v28, 4  ;;  %v5186_v47 = vrot.slane %v1448_v21, 4  ;;  %v408_v17 = vshrl.u32 %v212_v24, 16  ;;  %v5196_v21 = vld [vmem:[%s4823_s20 + $0x58] sm:$0xf]  ;;  %4389 = vmatpush3.bf16.msra.mxu1 %v4699_v52 }
  0x55   : > { %v1985_v1 = vsel %vm4913_vm5, %v1980_v40, %v1984_v54  ;;  %1160 = vrot.lane.b32.xlu0 %v4053_v8, %s4780_s21  ;;  %v397_v35 = vrot.slane %v395_v25, 4  ;;  %v400_v61 = vrot.slane %v398_v32, 5  ;;  %v406_v63 = vrot.slane %v404_v39, 5  ;;  %v5199_v28 = vld [vmem:[%s4823_s20 + $0x5c] sm:$0x1] }
  0x56   : > { %6922 = vst [vmem:[#allocation12_spill] sm:$0xff] %v5186_v47  ;;  %v4209_v48 = vcombine.low %v1975_v13, %v1985_v1  ;;  %v1797_v19 = vsel %vm4850_vm2, %v1795_v30, %v1796_v22  ;;  %v414_v23 = vshll.u32 %v237_v5, 16  ;;  %v3958_v8 = vrot.slane %v640_v57, 9 }
  0x57   : > { %v4178_v0 = vcombine.low %v1794_v38, %v1797_v19  ;;  %v401_v54 = vor.u32 %v400_v61, %v397_v35  ;;  %v745_v14 = vrot.slane %v212_v24, 5  ;;  %v410_v13 = vrot.slane %v408_v17, 4  ;;  %v5210_v35 = vld [vmem:[%s4823_s20 + $0x24] sm:$0xe] }
  0x58   : > { %2612 = vrot.lane.b32.xlu1 %v4209_v48, %s4780_s21  ;;  %v416_v40 = vrot.slane %v414_v23, 5  ;;  %v748_v27 = vrot.slane %v237_v5, 5  ;;  %v419_v22 = vshrl.u32 %v213_v7, 16  ;;  %v422_v38 = vshll.u32 %v213_v7, 16  ;;  %v4116_v48 = vld [vmem:[%s4823_s20 + $0x30] sm:$0xf] }
  0x59   : > { %v402_v25 = vrot.slane %v401_v54, 4  ;;  %v746_v32 = vsel %vm4850_vm2, %v3958_v8, %v745_v14  ;;  %v747_v1 = vrot.slane %v745_v14, 4  ;;  %v411_v30 = vor.u32 %v410_v13, %v406_v63  ;;  %v4700_v5 = vld [vmem:[%s6847_s1 + $0x68] sm:$0xff]   ;;  %v5219_v14 = vld [vmem:[%s4823_s20 + $0x34] sm:$0xf] }
  0x5a   : > { %v421_v24 = vrot.slane %v419_v22, 4  ;;  %v428_v39 = vshll.u32 %v5196_v21, 16  ;;  %v432_v57 = vshrl.u32 %v5196_v21, 16  ;;  %v424_v19 = vrot.slane %v422_v38, 5  ;;  %6923 = vst [vmem:[#allocation13_spill] sm:$0xff] %v5219_v14  ;;  %4390 = vmatprep.subr.bf16.mxu1 %v4700_v5 }
  0x5b   : > { %v407_v61 = vsel %vm4913_vm5, %v402_v25, %v406_v63  ;;  %v749_v7 = vsel %vm4850_vm2, %v747_v1, %v748_v27  ;;  %v438_v17 = vshll.u32 %v5199_v28, 16  ;;  %v412_v23 = vrot.slane %v411_v30, 4  ;;  %v4083_v25 = vld [vmem:[%s4823_s20 + $0x30] sm:$0xe]  ;;  %4391 = vmatpush3.bf16.msra.mxu1 %v4700_v5  ;;  %v5227_v30 = vld [vmem:[%s4823_s20 + $0x38] sm:$0x1] }
  0x5c   : > { %2422 = vrot.lane.b32.xlu1 %v4178_v0, %s4782_s27  ;;  %v4038_v52 = vcombine.low %v746_v32, %v749_v7  ;;  %v430_v54 = vrot.slane %v428_v39, 5  ;;  %v434_v8 = vrot.slane %v432_v57, 4  ;;  %v425_v0 = vor.u32 %v424_v19, %v421_v24  ;;  %6924 = vst [vmem:[#allocation14_spill] sm:$0xff] %v5227_v30  ;;  %v4703_v39 = vld [vmem:[%s6847_s1 + $0x70] sm:$0xff]   ;;  %v5238_v13 = vld [vmem:[%s4823_s20 + $0x58] sm:$0xf] }
  0x5d   : > { %v1987_v22 = vshrl.u32 %v4116_v48, 16  ;;  %v1990_v63 = vshll.u32 %v4116_v48, 16  ;;  %v1466_v27 = vshrl.u32 %v5135_v53, 16  ;;  %v417_v1 = vsel %vm4913_vm5, %v412_v23, %v416_v40  ;;  %v3980_v19 = vld [vmem:[%s4823_s20 + $0x54] sm:$0xf]  ;;  %6925 = vst [vmem:[#allocation15_spill] sm:$0xff] %v5238_v13  ;;  %4392 = vmatprep.subr.bf16.mxu1 %v4703_v39 }
  0x5e   : > { %v435_v32 = vor.u32 %v434_v8, %v430_v54  ;;  %v440_v38 = vrot.slane %v438_v17, 5  ;;  %v4022_v57 = vcombine.low %v407_v61, %v417_v1  ;;  %v426_v5 = vrot.slane %v425_v0, 4  ;;  %v5339_v24 = vld [vmem:[%s4823_s20 + $0x70] sm:$0xf] }
  0x5f   : > { %v4194_v7 = vcombine.low %v4116_v48, %v5219_v14  ;;  %v1469_v40 = vshll.u32 %v5135_v53, 16  ;;  %v1989_v17 = vrot.slane %v1987_v22, 4  ;;  %v4099_v8 = vrot.slane %v4083_v25, 9  ;;  %v641_v48 = vld [vmem:[%s4823_s20 + $0x54] sm:$0xe]  ;;  %4393 = vmatpush3.bf16.msra.mxu1 %v4703_v39 }
  0x60   : > { %1050 = vrot.lane.b32.xlu1 %v4038_v52, %s4781_s22  ;;  %v436_v23 = vrot.slane %v435_v32, 4  ;;  %970 = vrot.lane.b32.xlu0 %v4022_v57, %s4782_s27  ;;  %v431_v61 = vsel %vm4913_vm5, %v426_v5, %v430_v54  ;;  %v1992_v1 = vrot.slane %v1990_v63, 5  ;;  %v1800_v52 = vrot.slane %v4974_v26, 5 }
  0x61   : > { %v1803_v0 = vrot.slane %v5227_v30, 5  ;;  %v5246_v53 = vrot.slane %v1466_v27, 4  ;;  %v2000_v32 = vshrl.u32 %v5219_v14, 16  ;;  %v4054_v39 = vcombine.low %v3980_v19, %v5238_v13  ;;  %v4090_v30 = vld [vmem:[%s4823_s20 + $0x84] sm:$0xe] }
  0x62   : > { %v441_v25 = vsel %vm4913_vm5, %v436_v23, %v440_v38  ;;  %v1801_v54 = vsel %vm4850_vm2, %v4099_v8, %v1800_v52  ;;  %v1802_v63 = vrot.slane %v1800_v52, 4  ;;  %v1471_v27 = vrot.slane %v1469_v40, 5  ;;  %v5259_v38 = vld [vmem:[%s4823_s20 + $0x38] sm:$0x1]  ;;  %v4118_v52 = vld [vmem:[%s4823_s20 + $0x3c] sm:$0xf] }
  0x63   : > { %v4023_v57 = vcombine.low %v431_v61, %v441_v25  ;;  %v1479_v5 = vshrl.u32 %v5138_v58, 16  ;;  %v3959_v15 = vrot.slane %v641_v48, 9  ;;  %v752_v22 = vrot.slane %v5196_v21, 5  ;;  %6926 = vst [vmem:[#allocation16_spill] sm:$0xff] %v5259_v38  ;;  %v5267_v25 = vld [vmem:[%s4823_s20 + $0x40] sm:$0xf] }
  0x64   : > { %2534 = vrot.lane.b32.xlu1 %v4194_v7, %s4781_s22  ;;  %v1804_v23 = vsel %vm4850_vm2, %v1802_v63, %v1803_v0  ;;  %v1490_v7 = vshrl.u32 %v3980_v19, 16  ;;  %v755_v61 = vrot.slane %v5199_v28, 5  ;;  %v1993_v8 = vor.u32 %v1992_v1, %v1989_v17  ;;  %6927 = vst [vmem:[#allocation17_spill] sm:$0xff] %v5267_v25  ;;  %v5284_v63 = vld [vmem:[%s4823_s20 + $0x44] sm:$0x1] }
  0x65   : > { %972 = vrot.lane.b32.xlu0 %v4023_v57, %s4782_s27  ;;  %v4179_v40 = vcombine.low %v1801_v54, %v1804_v23  ;;  %v1493_v31 = vshll.u32 %v3980_v19, 16  ;;  %v753_v21 = vsel %vm4850_vm2, %v3959_v15, %v752_v22  ;;  %v754_v48 = vrot.slane %v752_v22, 4  ;;  %v4704_v57 = vld [vmem:[%s6847_s1 + $0x78] sm:$0xff]   ;;  %6929 = vst [vmem:[#allocation19_spill] sm:$0xff] %v5284_v63 }
  0x66   : > { %v1996_v28 = vshll.u32 %v5219_v14, 16  ;;  %v2002_v17 = vrot.slane %v2000_v32, 4  ;;  %v2006_v1 = vshll.u32 %v5259_v38, 16  ;;  %v1472_v54 = vor.u32 %v1471_v27, %v5246_v53  ;;  %4394 = vmatprep.subr.bf16.mxu1 %v4704_v57 }
  0x67   : > { %v5279_v19 = vrot.slane %v1479_v5, 4  ;;  %v756_v15 = vsel %vm4850_vm2, %v754_v48, %v755_v61  ;;  %v2011_v22 = vshrl.u32 %v4118_v52, 16  ;;  %v2014_v0 = vshll.u32 %v4118_v52, 16  ;;  %4395 = vmatpush3.bf16.msra.mxu1 %v4704_v57 }
  0x68   : > { %1162 = vrot.lane.b32.xlu1 %v4054_v39, %s4780_s21  ;;  %v4039_v23 = vcombine.low %v753_v21, %v756_v15  ;;  %v1994_v39 = vrot.slane %v1993_v8, 4  ;;  %v1998_v51 = vrot.slane %v1996_v28, 5  ;;  %v1492_v32 = vrot.slane %v1490_v7, 4  ;;  %4512 = vmatprep.subr.bf16.mxu1 %v4903_v2  ;;  %v5297_v28 = vld [vmem:[%s4823_s20 + $0x60] sm:$0xf] }
  0x69   : > { %6928 = vst [vmem:[#allocation18_spill] sm:$0xff] %v5279_v19  ;;  %2424 = vrot.lane.b32.xlu0 %v4179_v40, %s4782_s27  ;;  %v1495_v34 = vrot.slane %v1493_v31, 5  ;;  %v2013_v20 = vrot.slane %v2011_v22, 4  ;;  %v2024_v53 = vshrl.u32 %v5267_v25, 16  ;;  %v2008_v5 = vrot.slane %v2006_v1, 5 }
  0x6a   : > { %v2003_v27 = vor.u32 %v2002_v17, %v1998_v51  ;;  %v2016_v61 = vrot.slane %v2014_v0, 5  ;;  %v2020_v48 = vshll.u32 %v5267_v25, 16  ;;  %v1503_v8 = vshrl.u32 %v5238_v13, 16  ;;  %v5300_v17 = vld [vmem:[%s4823_s20 + $0x64] sm:$0xf] }
  0x6b   : > { %v4195_v40 = vcombine.low %v4118_v52, %v5267_v25  ;;  %v2026_v21 = vrot.slane %v2024_v53, 4  ;;  %v2030_v31 = vshll.u32 %v5284_v63, 16  ;;  %v1999_v7 = vsel %vm4913_vm5, %v1994_v39, %v1998_v51  ;;  %6930 = vst [vmem:[#allocation20_spill] sm:$0xff] %v5300_v17 }
  0x6c   : > { %v2004_v2 = vrot.slane %v2003_v27, 4  ;;  %v2017_v57 = vor.u32 %v2016_v61, %v2013_v20  ;;  %v2022_v0 = vrot.slane %v2020_v48, 5  ;;  %v5302_v1 = vrot.slane %v1472_v54, 4  ;;  %v5310_v27 = vld [vmem:[%s4823_s20 + $0x44] sm:$0x1] }
  0x6d   : > { %1052 = vrot.lane.b32.xlu0 %v4039_v23, %s4781_s22  ;;  %v1496_v22 = vor.u32 %v1495_v34, %v1492_v32  ;;  %v4084_v23 = vld [vmem:[%s4823_s20 + $0x3c] sm:$0xe]  ;;  %v2032_v53 = vrot.slane %v2030_v31, 5  ;;  %6932 = vst [vmem:[#allocation22_spill] sm:$0xff] %v5310_v27  ;;  %v215_v61 = vld [vmem:[%s4823_s20 + $0x60] sm:$0xf]  ;;  %v4055_v52 = vcombine.low %v5297_v28, %v5300_v17 }
  0x6e   : > { %6931 = vst [vmem:[#allocation21_spill] sm:$0xff] %v5302_v1  ;;  %v2009_v51 = vsel %vm4913_vm5, %v2004_v2, %v2008_v5  ;;  %v2018_v39 = vrot.slane %v2017_v57, 4  ;;  %v2027_v20 = vor.u32 %v2026_v21, %v2022_v0  ;;  %v5314_v54 = vrot.slane %v1503_v8, 4  ;;  %v216_v34 = vld [vmem:[%s4823_s20 + $0x64] sm:$0xf] }
  0x6f   : > { %v4210_v43 = vcombine.low %v1999_v7, %v2009_v51  ;;  %v4100_v21 = vrot.slane %v4084_v23, 9  ;;  %v1807_v31 = vrot.slane %v5072_v11, 5  ;;  %v239_v2 = vld [vmem:[%s4823_s20 + $0x68] sm:$0x1]  ;;  %v5324_v57 = vrot.slane %v1496_v22, 4 }
  0x70   : > { %6933 = vst [vmem:[#allocation23_spill] sm:$0xff] %v5314_v54  ;;  %v2023_v32 = vsel %vm4913_vm5, %v2018_v39, %v2022_v0  ;;  %v2028_v5 = vrot.slane %v2027_v20, 4  ;;  %v1810_v8 = vrot.slane %v5310_v27, 5  ;;  %v443_v7 = vshrl.u32 %v215_v61, 16  ;;  %v642_v20 = vld [vmem:[%s4823_s20 + $0x60] sm:$0xe] }
  0x71   : > { %2536 = vrot.lane.b32.xlu0 %v4195_v40, %s4781_s22  ;;  %6934 = vst [vmem:[#allocation24_spill] sm:$0xff] %v5324_v57  ;;  %2614 = vrot.lane.b32.xlu1 %v4210_v43, %s4780_s21  ;;  %v446_v51 = vshll.u32 %v215_v61, 16  ;;  %v1808_v0 = vsel %vm4850_vm2, %v4100_v21, %v1807_v31  ;;  %v1809_v23 = vrot.slane %v1807_v31, 4  ;;  %v452_v39 = vshll.u32 %v216_v34, 16  ;;  %v5509_v54 = vld [vmem:[%s4823_s20 + $0x74] sm:$0x1] }
  0x72   : > { %v2033_v40 = vsel %vm4913_vm5, %v2028_v5, %v2032_v53  ;;  %v445_v15 = vrot.slane %v443_v7, 4  ;;  %v456_v53 = vshrl.u32 %v216_v34, 16  ;;  %v462_v5 = vshll.u32 %v239_v2, 16  ;;  %v5343_v7 = vld [vmem:[%s4823_s20 + $0x74] sm:$0x1]  ;;  %6953 = vst [vmem:[#allocation41_spill] sm:$0xff] %v5509_v54 }
  0x73   : > { %v4211_v22 = vcombine.low %v2023_v32, %v2033_v40  ;;  %v448_v43 = vrot.slane %v446_v51, 5  ;;  %v1811_v61 = vsel %vm4850_vm2, %v1809_v23, %v1810_v8  ;;  %v454_v45 = vrot.slane %v452_v39, 5  ;;  %v5630_v11 = vld [vmem:[%s4823_s20 + $0x98] sm:$0x1] }
  0x74   : > { %v4180_v21 = vcombine.low %v1808_v0, %v1811_v61  ;;  %v3960_v48 = vrot.slane %v642_v20, 9  ;;  %v759_v32 = vrot.slane %v216_v34, 5  ;;  %v458_v51 = vrot.slane %v456_v53, 4  ;;  %v4120_v34 = vld [vmem:[%s4823_s20 + $0x48] sm:$0xf] }
  0x75   : > { %1164 = vrot.lane.b32.xlu0 %v4055_v52, %s4780_s21  ;;  %2616 = vrot.lane.b32.xlu1 %v4211_v22, %s4780_s21  ;;  %v449_v31 = vor.u32 %v448_v43, %v445_v15  ;;  %v464_v40 = vrot.slane %v462_v5, 5  ;;  %v762_v52 = vrot.slane %v239_v2, 5  ;;  %v467_v36 = vshrl.u32 %v217_v62, 16  ;;  %v5357_v5 = vld [vmem:[%s4823_s20 + $0x4c] sm:$0xf] }
  0x76   : > { %v760_v8 = vsel %vm4850_vm2, %v3960_v48, %v759_v32  ;;  %v761_v23 = vrot.slane %v759_v32, 4  ;;  %v470_v39 = vshll.u32 %v217_v62, 16  ;;  %v459_v14 = vor.u32 %v458_v51, %v454_v45  ;;  %6935 = vst [vmem:[#allocation25_spill] sm:$0xff] %v5357_v5 }
  0x77   : > { %v450_v38 = vrot.slane %v449_v31, 4  ;;  %v469_v22 = vrot.slane %v467_v36, 4  ;;  %v476_v15 = vshll.u32 %v5339_v24, 16  ;;  %v480_v0 = vshrl.u32 %v5339_v24, 16 }
  0x78   : > { %v763_v20 = vsel %vm4850_vm2, %v761_v23, %v762_v52  ;;  %v472_v48 = vrot.slane %v470_v39, 5  ;;  %v486_v62 = vshll.u32 %v5343_v7, 16  ;;  %v460_v43 = vrot.slane %v459_v14, 4  ;;  %v5365_v23 = vld [vmem:[%s4823_s20 + $0x50] sm:$0x1] }
  0x79   : > { %2426 = vrot.lane.b32.xlu1 %v4180_v21, %s4782_s27  ;;  %v455_v2 = vsel %vm4913_vm5, %v450_v38, %v454_v45  ;;  %v4040_v36 = vcombine.low %v760_v8, %v763_v20  ;;  %v478_v61 = vrot.slane %v476_v15, 5  ;;  %v482_v53 = vrot.slane %v480_v0, 4  ;;  %v4085_v38 = vld [vmem:[%s4823_s20 + $0x48] sm:$0xe]  ;;  %6936 = vst [vmem:[#allocation26_spill] sm:$0xff] %v5365_v23 }
  0x7a   : > { %v473_v21 = vor.u32 %v472_v48, %v469_v22  ;;  %v2035_v32 = vshrl.u32 %v4120_v34, 16  ;;  %v2038_v45 = vshll.u32 %v4120_v34, 16  ;;  %v1514_v51 = vshrl.u32 %v5297_v28, 16  ;;  %v3984_v20 = vld [vmem:[%s4823_s20 + $0x6c] sm:$0xf] }
  0x7b   : > { %v465_v52 = vsel %vm4913_vm5, %v460_v43, %v464_v40  ;;  %v483_v14 = vor.u32 %v482_v53, %v478_v61  ;;  %v488_v8 = vrot.slane %v486_v62, 5  ;;  %v1517_v39 = vshll.u32 %v5297_v28, 16  ;;  %v5372_v48 = vld [vmem:[%s4823_s20 + $0x70] sm:$0xf]  ;;  %v643_v40 = vld [vmem:[%s4823_s20 + $0x6c] sm:$0xe] }
  0x7c   : > { %v4024_v15 = vcombine.low %v455_v2, %v465_v52  ;;  %v474_v0 = vrot.slane %v473_v21, 4  ;;  %v4196_v22 = vcombine.low %v4120_v34, %v5357_v5  ;;  %6937 = vst [vmem:[#allocation27_spill] sm:$0xff] %v5372_v48  ;;  %v2037_v25 = vrot.slane %v2035_v32, 4  ;;  %v5398_v52 = vld [vmem:[%s4823_s20 + $0x50] sm:$0x1] }
  0x7d   : > { %1054 = vrot.lane.b32.xlu1 %v4040_v36, %s4781_s22  ;;  %v484_v31 = vrot.slane %v483_v14, 4  ;;  %v2040_v50 = vrot.slane %v2038_v45, 5  ;;  %v4101_v46 = vrot.slane %v4085_v38, 9  ;;  %v6938_v62 = vrot.slane %v5113_v3, 5  ;;  %6941 = vst [vmem:[#allocation29_spill] sm:$0xff] %v5398_v52 }
  0x7e   : > { %v6939_v43 = vrot.slane %v5210_v35, 9  ;;  %974 = vrot.lane.b32.xlu0 %v4024_v15, %s4782_s27  ;;  %v479_v34 = vsel %vm4913_vm5, %v474_v0, %v478_v61  ;;  %v1814_v2 = vrot.slane %v5138_v58, 5  ;;  %v1817_v36 = vrot.slane %v5365_v23, 5  ;;  %v5552_v58 = vld [vmem:[%s4823_s20 + $0x88] sm:$0xf] }
  0x7f   : > { %v1527_v3 = vshrl.u32 %v5300_v17, 16  ;;  %v489_v35 = vsel %vm4913_vm5, %v484_v31, %v488_v8  ;;  %v2048_v21 = vshrl.u32 %v5357_v5, 16  ;;  %v4056_v38 = vcombine.low %v3984_v20, %v5372_v48  ;;  %v5402_v31 = vld [vmem:[%s4823_s20 + $0x54] sm:$0xf]  ;;  %6957 = vst [vmem:[#allocation45_spill] sm:$0xff] %v5552_v58 }
  0x80   : > { %v5381_v28 = vsel %vm4850_vm2, %v6939_v43, %v6938_v62  ;;  %v4025_v32 = vcombine.low %v479_v34, %v489_v35  ;;  %v1815_v61 = vsel %vm4850_vm2, %v4101_v46, %v1814_v2  ;;  %v1816_v45 = vrot.slane %v1814_v2, 4 }
  0x81   : > { %6940 = vst [vmem:[#allocation28_spill] sm:$0xff] %v5381_v28  ;;  %2538 = vrot.lane.b32.xlu1 %v4196_v22, %s4781_s22  ;;  %v1516_v14 = vrot.slane %v1514_v51, 4  ;;  %v1519_v15 = vrot.slane %v1517_v39, 5  ;;  %v3961_v0 = vrot.slane %v643_v40, 9  ;;  %v766_v62 = vrot.slane %v5339_v24, 5 }
  0x82   : > { %976 = vrot.lane.b32.xlu0 %v4025_v32, %s4782_s27  ;;  %v1818_v8 = vsel %vm4850_vm2, %v1816_v45, %v1817_v36  ;;  %v1538_v22 = vshrl.u32 %v3984_v20, 16  ;;  %v769_v46 = vrot.slane %v5343_v7, 5  ;;  %v2041_v43 = vor.u32 %v2040_v50, %v2037_v25  ;;  %v5411_v40 = vld [vmem:[%s4823_s20 + $0x58] sm:$0xf] }
  0x83   : > { %v4181_v34 = vcombine.low %v1815_v61, %v1818_v8  ;;  %v1541_v2 = vshll.u32 %v3984_v20, 16  ;;  %v767_v51 = vsel %vm4850_vm2, %v3961_v0, %v766_v62  ;;  %v768_v39 = vrot.slane %v766_v62, 4  ;;  %6942 = vst [vmem:[#allocation30_spill] sm:$0xff] %v5411_v40  ;;  %v5425_v62 = vld [vmem:[%s4823_s20 + $0x5c] sm:$0x1] }
  0x84   : > { %v2044_v35 = vshll.u32 %v5357_v5, 16  ;;  %v2050_v36 = vrot.slane %v2048_v21, 4  ;;  %v2054_v32 = vshll.u32 %v5398_v52, 16  ;;  %v1520_v7 = vor.u32 %v1519_v15, %v1516_v14  ;;  %6944 = vst [vmem:[#allocation32_spill] sm:$0xff] %v5425_v62  ;;  %v5485_v5 = vld [vmem:[%s4823_s20 + $0x70] sm:$0xf] }
  0x85   : > { %1166 = vrot.lane.b32.xlu1 %v4056_v38, %s4780_s21  ;;  %v5417_v50 = vrot.slane %v1527_v3, 4  ;;  %v770_v25 = vsel %vm4850_vm2, %v768_v39, %v769_v46  ;;  %v2059_v20 = vshrl.u32 %v5402_v31, 16  ;;  %v2042_v45 = vrot.slane %v2041_v43, 4  ;;  %v4087_v43 = vld [vmem:[%s4823_s20 + $0x60] sm:$0xe]  ;;  %6951 = vst [vmem:[#allocation39_spill] sm:$0xff] %v5485_v5 }
  0x86   : > { %2428 = vrot.lane.b32.xlu0 %v4181_v34, %s4782_s27  ;;  %v4041_v61 = vcombine.low %v767_v51, %v770_v25  ;;  %v2046_v0 = vrot.slane %v2044_v35, 5  ;;  %v2062_v38 = vshll.u32 %v5402_v31, 16  ;;  %v1540_v21 = vrot.slane %v1538_v22, 4 }
  0x87   : > { %6943 = vst [vmem:[#allocation31_spill] sm:$0xff] %v5417_v50  ;;  %v1543_v8 = vrot.slane %v1541_v2, 5  ;;  %v2061_v53 = vrot.slane %v2059_v20, 4  ;;  %v2072_v3 = vshrl.u32 %v5411_v40, 16  ;;  %v2056_v15 = vrot.slane %v2054_v32, 5 }
  0x88   : > { %v2051_v14 = vor.u32 %v2050_v36, %v2046_v0  ;;  %v2064_v46 = vrot.slane %v2062_v38, 5  ;;  %v2068_v39 = vshll.u32 %v5411_v40, 16  ;;  %v5429_v34 = vpop.permute.xlu1 %1152  ;;  %v4197_v51 = vcombine.low %v5402_v31, %v5411_v40  ;;  %v5439_v20 = vld [vmem:[%s4823_s20 + $0x78] sm:$0xf]  ;;  %v5442_v38 = vld [vmem:[%s4823_s20 + $0x7c] sm:$0xf] }
  0x89   : > { %v2074_v22 = vrot.slane %v2072_v3, 4  ;;  %v2078_v2 = vshll.u32 %v5425_v62, 16  ;;  %v2047_v35 = vsel %vm4913_vm5, %v2042_v45, %v2046_v0  ;;  %6945 = vst [vmem:[#allocation33_spill] sm:$0xff] %v5442_v38  ;;  %v5444_v24 = vrot.slane %v1520_v7, 4  ;;  %v5462_v31 = vpop.permute.xlu0 %1150  ;;  %v5526_v40 = vld [vmem:[%s4823_s20 + $0x80] sm:$0x1] }
  0x8a   : > { %1056 = vrot.lane.b32.xlu0 %v4041_v61, %s4781_s22  ;;  %v2052_v36 = vrot.slane %v2051_v14, 4  ;;  %v2065_v32 = vor.u32 %v2064_v46, %v2061_v53  ;;  %v2070_v25 = vrot.slane %v2068_v39, 5  ;;  %v1544_v3 = vor.u32 %v1543_v8, %v1540_v21  ;;  %v5452_v46 = vld [vmem:[%s4823_s20 + $0x68] sm:$0x1]  ;;  %v4086_v39 = vld [vmem:[%s4823_s20 + $0x54] sm:$0xe] }
  0x8b   : > { %6946 = vst [vmem:[#allocation34_spill] sm:$0xff] %v5444_v24  ;;  %v1551_v61 = vshrl.u32 %v5372_v48, 16  ;;  %v2080_v14 = vrot.slane %v2078_v2, 5  ;;  %6947 = vst [vmem:[#allocation35_spill] sm:$0xff] %v5452_v46  ;;  %v4057_v21 = vcombine.low %v5439_v20, %v5442_v38  ;;  %v5460_v8 = vld [vmem:[%s4823_s20 + $0x5c] sm:$0x1] }
  0x8c   : > { %v2057_v45 = vsel %vm4913_vm5, %v2052_v36, %v2056_v15  ;;  %v2066_v0 = vrot.slane %v2065_v32, 4  ;;  %v2075_v53 = vor.u32 %v2074_v22, %v2070_v25  ;;  %6948 = vst [vmem:[#allocation36_spill] sm:$0xff] %v5460_v8  ;;  %v4103_v2 = vrot.slane %v4087_v43, 9  ;;  %v5469_v32 = vld [vmem:[%s4823_s20 + $0x6c] sm:$0xf]  ;;  %6955 = vst [vmem:[#allocation43_spill] sm:$0xff] %v5526_v40 }
  0x8d   : > { %v4212_v28 = vcombine.low %v2047_v35, %v2057_v45  ;;  %v1828_v36 = vrot.slane %v5300_v17, 5  ;;  %v5473_v45 = vrot.slane %v1544_v3, 4  ;;  %v5475_v7 = vrot.slane %v1551_v61, 4 }
  0x8e   : > { %2540 = vrot.lane.b32.xlu0 %v4197_v51, %s4781_s22  ;;  %v2071_v15 = vsel %vm4913_vm5, %v2066_v0, %v2070_v25  ;;  %v2076_v22 = vrot.slane %v2075_v53, 4  ;;  %v1831_v51 = vrot.slane %v5452_v46, 5  ;;  %v4102_v63 = vrot.slane %v4086_v39, 9  ;;  %v4124_v39 = vld [vmem:[%s4823_s20 + $0x60] sm:$0xf] }
  0x8f   : > { %6949 = vst [vmem:[#allocation37_spill] sm:$0xff] %v5473_v45  ;;  %6950 = vst [vmem:[#allocation38_spill] sm:$0xff] %v5475_v7  ;;  %2618 = vrot.lane.b32.xlu1 %v4212_v28, %s4780_s21  ;;  %v1829_v25 = vsel %vm4850_vm2, %v4103_v2, %v1828_v36  ;;  %v1830_v0 = vrot.slane %v1828_v36, 4  ;;  %v1821_v53 = vrot.slane %v5238_v13, 5  ;;  %v1824_v28 = vrot.slane %v5460_v8, 5 }
  0x90   : > { %v2081_v43 = vsel %vm4913_vm5, %v2076_v22, %v2080_v14  ;;  %v2107_v7 = vshrl.u32 %v5469_v32, 16  ;;  %v2110_v36 = vshll.u32 %v5469_v32, 16  ;;  %v5498_v45 = vld [vmem:[%s4823_s20 + $0x64] sm:$0xf]  ;;  %v5503_v52 = vpop.permute.xlu0 %1042  ;;  %v1575_v50 = vshrl.u32 %v5442_v38, 16 }
  0x91   : > { %v4213_v61 = vcombine.low %v2071_v15, %v2081_v43  ;;  %v1832_v14 = vsel %vm4850_vm2, %v1830_v0, %v1831_v51  ;;  %v1822_v22 = vsel %vm4850_vm2, %v4102_v63, %v1821_v53  ;;  %v1823_v2 = vrot.slane %v1821_v53, 4  ;;  %6952 = vst [vmem:[#allocation40_spill] sm:$0xff] %v5498_v45 }
  0x92   : > { %1168 = vrot.lane.b32.xlu0 %v4057_v21, %s4780_s21  ;;  %v4183_v43 = vcombine.low %v1829_v25, %v1832_v14  ;;  %v2109_v3 = vrot.slane %v2107_v7, 4  ;;  %v2120_v21 = vshrl.u32 %v5485_v5, 16  ;;  %v2112_v0 = vrot.slane %v2110_v36, 5 }
  0x93   : > { %v5471_v35 = vpop.permute.xlu1 %1038  ;;  %2620 = vrot.lane.b32.xlu1 %v4213_v61, %s4780_s21  ;;  %v1825_v63 = vsel %vm4850_vm2, %v1823_v2, %v1824_v28  ;;  %v2083_v53 = vshrl.u32 %v4124_v39, 16  ;;  %v2086_v61 = vshll.u32 %v4124_v39, 16  ;;  %v2096_v14 = vshrl.u32 %v5498_v45, 16  ;;  %v5519_v2 = vld [vmem:[%s4823_s20 + $0x68] sm:$0x1] }
  0x94   : > { %v4182_v7 = vcombine.low %v1822_v22, %v1825_v63  ;;  %v4199_v15 = vcombine.low %v5469_v32, %v5485_v5  ;;  %v2113_v62 = vor.u32 %v2112_v0, %v2109_v3  ;;  %v2116_v28 = vshll.u32 %v5485_v5, 16  ;;  %6954 = vst [vmem:[#allocation42_spill] sm:$0xff] %v5519_v2  ;;  %v5701_v5 = vld [vmem:[%s4823_s20 + $0x98] sm:$0x1] }
  0x95   : > { %v2085_v51 = vrot.slane %v2083_v53, 4  ;;  %v2088_v36 = vrot.slane %v2086_v61, 5  ;;  %v4198_v22 = vcombine.low %v4124_v39, %v5498_v45  ;;  %v2122_v63 = vrot.slane %v2120_v21, 4  ;;  %v5534_v21 = vld [vmem:[%s4823_s20 + $0x74] sm:$0x1]  ;;  %6968 = vst [vmem:[#allocation55_spill] sm:$0xff] %v5701_v5 }
  0x96   : > { %2430 = vrot.lane.b32.xlu0 %v4182_v7, %s4782_s27  ;;  %v2126_v25 = vshll.u32 %v5509_v54, 16  ;;  %v2114_v32 = vrot.slane %v2113_v62, 4  ;;  %v2118_v3 = vrot.slane %v2116_v28, 5  ;;  %v2092_v0 = vshll.u32 %v5498_v45, 16  ;;  %6956 = vst [vmem:[#allocation44_spill] sm:$0xff] %v5534_v21 }
  0x97   : > { %v5511_v57 = vpop.permute.xlu1 %1040  ;;  %2432 = vrot.lane.b32.xlu1 %v4183_v43, %s4782_s27  ;;  %v2098_v53 = vrot.slane %v2096_v14, 4  ;;  %v1565_v43 = vshll.u32 %v5439_v20, 16  ;;  %v2089_v7 = vor.u32 %v2088_v36, %v2085_v51  ;;  %v2102_v39 = vshll.u32 %v5519_v2, 16  ;;  %v4088_v14 = vld [vmem:[%s4823_s20 + $0x6c] sm:$0xe] }
  0x98   : > { %v2123_v62 = vor.u32 %v2122_v63, %v2118_v3  ;;  %v2128_v28 = vrot.slane %v2126_v25, 5  ;;  %v2094_v24 = vrot.slane %v2092_v0, 5  ;;  %v2119_v51 = vsel %vm4913_vm5, %v2114_v32, %v2118_v3  ;;  %v5548_v63 = vld [vmem:[%s4823_s20 + $0x84] sm:$0xf]  ;;  %v5559_v3 = vld [vmem:[%s4823_s20 + $0x78] sm:$0xf] }
  0x99   : > { %v2090_v36 = vrot.slane %v2089_v7, 4  ;;  %v4105_v13 = vrot.slane %v4089_v55, 9  ;;  %v1842_v19 = vrot.slane %v5442_v38, 5  ;;  %v2104_v1 = vrot.slane %v2102_v39, 5  ;;  %v5566_v38 = vld [vmem:[%s4823_s20 + $0x7c] sm:$0xf] }
  0x9a   : > { %2542 = vrot.lane.b32.xlu0 %v4198_v22, %s4781_s22  ;;  %v2124_v25 = vrot.slane %v2123_v62, 4  ;;  %v2099_v0 = vor.u32 %v2098_v53, %v2094_v24  ;;  %v1845_v23 = vrot.slane %v5526_v40, 5  ;;  %v4104_v55 = vrot.slane %v4088_v14, 9  ;;  %6958 = vst [vmem:[#allocation46_spill] sm:$0xff] %v5566_v38  ;;  %v4730_v54 = vld [vmem:[%s4823_s20 + $0x24] sm:$0xf] }
  0x9b   : > { %v5536_v61 = vpop.permute.xlu0 %958  ;;  %v5540_v17 = vpop.permute.xlu1 %1044  ;;  %2544 = vrot.lane.b32.xlu1 %v4199_v15, %s4781_s22  ;;  %v2095_v15 = vsel %vm4913_vm5, %v2090_v36, %v2094_v24  ;;  %v1843_v22 = vsel %vm4850_vm2, %v4105_v13, %v1842_v19  ;;  %v1844_v32 = vrot.slane %v1842_v19, 4  ;;  %v1835_v53 = vrot.slane %v5372_v48, 5  ;;  %v5745_v40 = vld [vmem:[%s4823_s20 + $0xa0] sm:$0xf] }
  0x9c   : > { %v2129_v7 = vsel %vm4913_vm5, %v2124_v25, %v2128_v28  ;;  %v2100_v62 = vrot.slane %v2099_v0, 4  ;;  %v1838_v39 = vrot.slane %v5534_v21, 5  ;;  %v2155_v13 = vshrl.u32 %v5548_v63, 16  ;;  %6969 = vst [vmem:[#allocation56_spill] sm:$0xff] %v5745_v40 }
  0x9d   : > { %v4215_v27 = vcombine.low %v2119_v51, %v2129_v7  ;;  %v1846_v24 = vsel %vm4850_vm2, %v1844_v32, %v1845_v23  ;;  %v2158_v19 = vshll.u32 %v5548_v63, 16  ;;  %v1836_v25 = vsel %vm4850_vm2, %v4104_v55, %v1835_v53  ;;  %v5583_v23 = vld [vmem:[%s6847_s1 + $0x80] sm:$0xff]  }
  0x9e   : > { %v2105_v28 = vsel %vm4913_vm5, %v2100_v62, %v2104_v1  ;;  %v4185_v36 = vcombine.low %v1843_v22, %v1846_v24  ;;  %v1837_v0 = vrot.slane %v1835_v53, 4  ;;  %v2157_v32 = vrot.slane %v2155_v13, 4  ;;  %v5597_v24 = vld [vmem:[%s4823_s20 + $0x8c] sm:$0x1]  ;;  %4476 = vmatprep.subr.bf16.mxu0 %v5583_v23 }
  0x9f   : > { %v5572_v14 = vpop.permute.xlu0 %960  ;;  %2624 = vrot.lane.b32.xlu1 %v4215_v27, %s4780_s21  ;;  %v4214_v51 = vcombine.low %v2095_v15, %v2105_v28  ;;  %v2160_v7 = vrot.slane %v2158_v19, 5  ;;  %v2168_v33 = vshrl.u32 %v5552_v58, 16  ;;  %v6959_v1 = vshrl.u32 %v5439_v20, 16  ;;  %6960 = vst [vmem:[#allocation47_spill] sm:$0xff] %v5597_v24 }
  0xa0   : > { %v5591_v55 = vrot.slane %v1565_v43, 5  ;;  %v1839_v62 = vsel %vm4850_vm2, %v1837_v0, %v1838_v39  ;;  %v2131_v53 = vshrl.u32 %v5559_v3, 16  ;;  %v5600_v27 = vrot.slane %v1575_v50, 4  ;;  %v5608_v0 = vld [vmem:[%s4823_s20 + $0x80] sm:$0x1] }
  0xa1   : > { %v5589_v22 = vrot.slane %v6959_v1, 4  ;;  %2622 = vrot.lane.b32.xlu0 %v4214_v51, %s4780_s21  ;;  %v4184_v20 = vcombine.low %v1836_v25, %v1839_v62  ;;  %v2134_v15 = vshll.u32 %v5559_v3, 16  ;;  %v2144_v43 = vshrl.u32 %v5566_v38, 16  ;;  %6962 = vst [vmem:[#allocation49_spill] sm:$0xff] %v5608_v0 }
  0xa2   : > { %6961 = vst [vmem:[#allocation48_spill] sm:$0xff] %v5600_v27  ;;  %v2133_v19 = vrot.slane %v2131_v53, 4  ;;  %v2161_v39 = vor.u32 %v2160_v7, %v2157_v32  ;;  %v2164_v28 = vshll.u32 %v5552_v58, 16  ;;  %v4201_v50 = vcombine.low %v5548_v63, %v5552_v58  ;;  %v5617_v53 = vld [vmem:[%s4823_s20 + $0x94] sm:$0xf] }
  0xa3   : > { %2436 = vrot.lane.b32.xlu1 %v4185_v36, %s4782_s27  ;;  %v2136_v25 = vrot.slane %v2134_v15, 5  ;;  %v2170_v51 = vrot.slane %v2168_v33, 4  ;;  %v2174_v62 = vshll.u32 %v5597_v24, 16  ;;  %v2140_v27 = vshll.u32 %v5566_v38, 16  ;;  %v4091_v36 = vld [vmem:[%s4823_s20 + $0x90] sm:$0xe] }
  0xa4   : > { %v2162_v7 = vrot.slane %v2161_v39, 4  ;;  %v2166_v13 = vrot.slane %v2164_v28, 5  ;;  %v2146_v46 = vrot.slane %v2144_v43, 4  ;;  %v1568_v63 = vor.u32 %v5591_v55, %v5589_v22  ;;  %v5633_v39 = vld [vmem:[%s4823_s20 + $0x88] sm:$0xf] }
  0xa5   : > { %v5578_v48 = vpop.permute.xlu1 %964  ;;  %2434 = vrot.lane.b32.xlu0 %v4184_v20, %s4782_s27  ;;  %v4200_v33 = vcombine.low %v5559_v3, %v5566_v38  ;;  %v2137_v15 = vor.u32 %v2136_v25, %v2133_v19  ;;  %v2150_v47 = vshll.u32 %v5608_v0, 16  ;;  %6963 = vst [vmem:[#allocation50_spill] sm:$0xff] %v5633_v39  ;;  %v2176_v29 = vrot.slane %v2174_v62, 5  ;;  %v5642_v19 = vld [vmem:[%s4823_s20 + $0x8c] sm:$0x1] }
  0xa6   : > { %v2171_v43 = vor.u32 %v2170_v51, %v2166_v13  ;;  %v2142_v59 = vrot.slane %v2140_v27, 5  ;;  %v2167_v22 = vsel %vm4913_vm5, %v2162_v7, %v2166_v13  ;;  %v4107_v3 = vrot.slane %v4091_v36, 9  ;;  %v4134_v28 = vld [vmem:[%s4823_s20 + $0x9c] sm:$0xf]  ;;  %v4159_v24 = vld [vmem:[%s4823_s20 + $0xd4] sm:$0x1] }
  0xa7   : > { %2548 = vrot.lane.b32.xlu1 %v4201_v50, %s4781_s22  ;;  %v2138_v55 = vrot.slane %v2137_v15, 4  ;;  %v1856_v20 = vrot.slane %v5617_v53, 5  ;;  %v2152_v56 = vrot.slane %v2150_v47, 5  ;;  %v1859_v51 = vrot.slane %v5630_v11, 5 }
  0xa8   : > { %v2172_v25 = vrot.slane %v2171_v43, 4  ;;  %v2147_v26 = vor.u32 %v2146_v46, %v2142_v59  ;;  %v4106_v46 = vrot.slane %v4090_v30, 9  ;;  %v1849_v15 = vrot.slane %v5633_v39, 5  ;;  %v5664_v30 = vld [vmem:[%s4823_s20 + $0xa0] sm:$0xf] }
  0xa9   : > { %v5610_v1 = vpop.permute.xlu1 %1156  ;;  %2546 = vrot.lane.b32.xlu0 %v4200_v33, %s4781_s22  ;;  %v2143_v13 = vsel %vm4913_vm5, %v2138_v55, %v2142_v59  ;;  %v1857_v62 = vsel %vm4850_vm2, %v4107_v3, %v1856_v20  ;;  %v1858_v7 = vrot.slane %v1856_v20, 4  ;;  %v1852_v43 = vrot.slane %v5642_v19, 5  ;;  %v4725_v59 = vld [vmem:[%s4823_s20 + $0x4] sm:$0xf]  ;;  %v4726_v55 = vld [vmem:[%s4823_s20] sm:$0xf] }
  0xaa   : > { %v5619_v32 = vpop.permute.xlu0 %962  ;;  %v2177_v47 = vsel %vm4913_vm5, %v2172_v25, %v2176_v29  ;;  %v2148_v36 = vrot.slane %v2147_v26, 4  ;;  %v4000_v3 = vcombine.low %v4726_v55, %v4725_v59  ;;  %6964 = vst [vmem:[#allocation51_spill] sm:$0xff] %v5664_v30  ;;  %v5666_v20 = vrot.slane %v1568_v63, 4  ;;  %v5675_v59 = vld [vmem:[%s4823_s20 + $0x94] sm:$0xf] }
  0xab   : > { %v4217_v33 = vcombine.low %v2167_v22, %v2177_v47  ;;  %v1860_v8 = vsel %vm4850_vm2, %v1858_v7, %v1859_v51  ;;  %v1850_v29 = vsel %vm4850_vm2, %v4106_v46, %v1849_v15  ;;  %v1851_v25 = vrot.slane %v1849_v15, 4  ;;  %v4132_v22 = vld [vmem:[%s4823_s20 + $0x90] sm:$0xf]  ;;  %6966 = vst [vmem:[#allocation53_spill] sm:$0xff] %v5675_v59 }
  0xac   : > { %6965 = vst [vmem:[#allocation52_spill] sm:$0xff] %v5666_v20  ;;  %v2153_v26 = vsel %vm4913_vm5, %v2148_v36, %v2152_v56  ;;  %v4187_v7 = vcombine.low %v1857_v62, %v1860_v8  ;;  %v2203_v47 = vshrl.u32 %v4134_v28, 16  ;;  %v2206_v39 = vshll.u32 %v4134_v28, 16  ;;  %v5781_v20 = vld [vmem:[%s4823_s20 + $0xac] sm:$0xf] }
  0xad   : > { %v5647_v50 = vpop.permute.xlu1 %2418  ;;  %2628 = vrot.lane.b32.xlu1 %v4217_v33, %s4780_s21  ;;  %v4216_v51 = vcombine.low %v2143_v13, %v2153_v26  ;;  %v1853_v55 = vsel %vm4850_vm2, %v1851_v25, %v1852_v43  ;;  %v1185_v56 = vsel %vm1182_vm6, %v4000_v3, %v5536_v61  ;;  %v2216_v46 = vshrl.u32 %v5664_v30, 16  ;;  %v5692_v25 = vld [vmem:[%s4823_s20 + $0xa4] sm:$0x1]  ;;  %6971 = vst [vmem:[#allocation58_spill] sm:$0xff] %v5781_v20 }
  0xae   : > { %v5645_v27 = vpop.permute.xlu0 %1154  ;;  %v4186_v8 = vcombine.low %v1850_v29, %v1853_v55  ;;  %v2205_v62 = vrot.slane %v2203_v47, 4  ;;  %v2208_v15 = vrot.slane %v2206_v39, 5  ;;  %v2179_v33 = vshrl.u32 %v4132_v22, 16  ;;  %6967 = vst [vmem:[#allocation54_spill] sm:$0xff] %v5692_v25  ;;  %v4728_v29 = vld [vmem:[%s4823_s20 + $0xc] sm:$0xf] }
  0xaf   : > { %2626 = vrot.lane.b32.xlu0 %v4216_v51, %s4780_s21  ;;  %v4203_v43 = vcombine.low %v4134_v28, %v5664_v30  ;;  %v2182_v61 = vshll.u32 %v4132_v22, 16  ;;  %v2192_v3 = vshrl.u32 %v5675_v59, 16  ;;  %v4727_v51 = vld [vmem:[%s4823_s20 + $0x10] sm:$0xf]  ;;  %v1233_v55 = vsel %vm1231_vm7, %v1185_v56, %v5471_v35 }
  0xb0   : > { %v2181_v63 = vrot.slane %v2179_v33, 4  ;;  %v4001_v47 = vcombine.low %v4728_v29, %v4727_v51  ;;  %v2209_v26 = vor.u32 %v2208_v15, %v2205_v62  ;;  %v2212_v28 = vshll.u32 %v5664_v30, 16 }
  0xb1   : > { %2440 = vrot.lane.b32.xlu1 %v4187_v7, %s4782_s27  ;;  %v2184_v39 = vrot.slane %v2182_v61, 5  ;;  %v4202_v7 = vcombine.low %v4132_v22, %v5675_v59  ;;  %v1266_v33 = vsel %vm1264_vm8, %v1233_v55, %v5462_v31  ;;  %v2218_v51 = vrot.slane %v2216_v46, 4  ;;  %v5719_v55 = vld [vmem:[%s4823_s20 + $0xac] sm:$0xf] }
  0xb2   : > { %v5685_v13 = vpop.permute.xlu1 %1046  ;;  %v2222_v61 = vshll.u32 %v5692_v25, 16  ;;  %4444 = vmatprep.mubr.bf16.mxu0 %v1266_v33  ;;  %v1188_v35 = vsel %vm1182_vm6, %v4001_v47, %v5572_v14  ;;  %v2210_v56 = vrot.slane %v2209_v26, 4  ;;  %v2214_v62 = vrot.slane %v2212_v28, 5  ;;  %v4093_v47 = vld [vmem:[%s4823_s20 + $0xa8] sm:$0xe] }
  0xb3   : > { %v5683_v36 = vpop.permute.xlu0 %966  ;;  %2438 = vrot.lane.b32.xlu0 %v4186_v8, %s4782_s27  ;;  %v2185_v15 = vor.u32 %v2184_v39, %v2181_v63  ;;  %v2188_v31 = vshll.u32 %v5675_v59, 16  ;;  %v2194_v22 = vrot.slane %v2192_v3, 4  ;;  %v2198_v46 = vshll.u32 %v5701_v5, 16  ;;  %v5729_v8 = vld [vmem:[%s4823_s20 + $0xb0] sm:$0x1] }
  0xb4   : > { %v2219_v63 = vor.u32 %v2218_v51, %v2214_v62  ;;  %v2224_v26 = vrot.slane %v2222_v61, 5  ;;  %v1235_v28 = vsel %vm1231_vm7, %v1188_v35, %v5511_v57  ;;  %v4716_v51 = vld [vmem:[%s6847_s1 + $0x88] sm:$0xff]   ;;  %v4092_v35 = vld [vmem:[%s4823_s20 + $0x9c] sm:$0xe]  ;;  %v4109_v21 = vrot.slane %v4093_v47, 9 }
  0xb5   : > { %2552 = vrot.lane.b32.xlu1 %v4203_v43, %s4781_s22  ;;  %v2186_v43 = vrot.slane %v2185_v15, 4  ;;  %v2190_v3 = vrot.slane %v2188_v31, 5  ;;  %v1269_v57 = vsel %vm1264_vm8, %v1235_v28, %v5429_v34  ;;  %v2200_v39 = vrot.slane %v2198_v46, 5  ;;  %v4729_v14 = vld [vmem:[%s4823_s20 + $0x28] sm:$0xf] }
  0xb6   : > { %v5712_v29 = vpop.permute.xlu1 %2530  ;;  %v2220_v15 = vrot.slane %v2219_v63, 4  ;;  %v4003_v2 = vcombine.low %v4730_v54, %v4729_v14  ;;  %4445 = vmatmul.mubr.bf16.vlgmr.msra.gmra.mrb[0].mxu0 %v1269_v57  ;;  %v5748_v61 = vld [vmem:[%s4823_s20 + $0xa4] sm:$0x1]  ;;  %v4732_v63 = vld [vmem:[%s4823_s20 + $0x18] sm:$0xf]  ;;  %v1870_v34 = vrot.slane %v5719_v55, 5 }
  0xb7   : > { %v5703_v45 = vpop.permute.xlu0 %968  ;;  %2550 = vrot.lane.b32.xlu0 %v4202_v7, %s4781_s22  ;;  %v2215_v7 = vsel %vm4913_vm5, %v2210_v56, %v2214_v62  ;;  %v2195_v31 = vor.u32 %v2194_v22, %v2190_v3  ;;  %v4731_v62 = vld [vmem:[%s4823_s20 + $0x1c] sm:$0xf]  ;;  %v1873_v22 = vrot.slane %v5729_v8, 5  ;;  %v4138_v46 = vld [vmem:[%s4823_s20 + $0xb4] sm:$0xf]  ;;  %4477 = vmatpush3.bf16.msra.mxu0 %v5583_v23  ;;  %v2191_v14 = vsel %vm4913_vm5, %v2186_v43, %v2190_v3 }
  0xb8   : > { %v2225_v56 = vsel %vm4913_vm5, %v2220_v15, %v2224_v26  ;;  %v4002_v58 = vcombine.low %v4732_v63, %v4731_v62  ;;  %v4108_v57 = vrot.slane %v4092_v35, 9  ;;  %4478 = vmatprep.subr.bf16.mxu0 %v4716_v51  ;;  %v1871_v26 = vsel %vm4850_vm2, %v4109_v21, %v1870_v34  ;;  %v646_v5 = vld [vmem:[%s4823_s20 + $0x90] sm:$0xe] }
  0xb9   : > { %v4219_v54 = vcombine.low %v2215_v7, %v2225_v56  ;;  %v2196_v47 = vrot.slane %v2195_v31, 4  ;;  %v1872_v15 = vrot.slane %v1870_v34, 4  ;;  %v1863_v62 = vrot.slane %v5745_v40, 5  ;;  %v4136_v7 = vld [vmem:[%s4823_s20 + $0xa8] sm:$0xf] }
  0xba   : > { %v5757_v28 = vpop.permute.xlu1 %1158  ;;  %v1866_v63 = vrot.slane %v5748_v61, 5  ;;  %v2251_v43 = vshrl.u32 %v4138_v46, 16  ;;  %v2254_v3 = vshll.u32 %v4138_v46, 16  ;;  %v5778_v40 = vld [vmem:[%s4823_s20 + $0xb8] sm:$0xf]  ;;  %v6975_v25 = vshll.u32 %v5056_v4, 16 }
  0xbb   : > { %v5731_v33 = vpop.permute.xlu0 %2420  ;;  %2632 = vrot.lane.b32.xlu1 %v4219_v54, %s4780_s21  ;;  %v2201_v23 = vsel %vm4913_vm5, %v2196_v47, %v2200_v39  ;;  %v1874_v21 = vsel %vm4850_vm2, %v1872_v15, %v1873_v22  ;;  %v1864_v56 = vsel %vm4850_vm2, %v4108_v57, %v1863_v62  ;;  %v1865_v34 = vrot.slane %v1863_v62, 4  ;;  %6970 = vst [vmem:[#allocation57_spill] sm:$0xff] %v5778_v40 }
  0xbc   : > { %v4218_v31 = vcombine.low %v2191_v14, %v2201_v23  ;;  %4479 = vmatpush3.bf16.msra.mxu0 %v4716_v51  ;;  %v1194_v39 = vsel %vm1182_vm6, %v4003_v2, %v5578_v48  ;;  %v1191_v54 = vsel %vm1182_vm6, %v4002_v58, %v5619_v32  ;;  %v4189_v47 = vcombine.low %v1871_v26, %v1874_v21 }
  0xbd   : > { %v2253_v14 = vrot.slane %v2251_v43, 4  ;;  %v1867_v22 = vsel %vm4850_vm2, %v1865_v34, %v1866_v63  ;;  %v2256_v57 = vrot.slane %v2254_v3, 5  ;;  %v2227_v15 = vshrl.u32 %v4136_v7, 16  ;;  %v5803_v3 = vld [vmem:[%s4823_s20 + $0xbc] sm:$0x1] }
  0xbe   : > { %2630 = vrot.lane.b32.xlu0 %v4218_v31, %s4780_s21  ;;  %v2230_v62 = vshll.u32 %v4136_v7, 16  ;;  %v4188_v51 = vcombine.low %v1864_v56, %v1867_v22  ;;  %v2264_v48 = vshrl.u32 %v5778_v40, 16  ;;  %v4205_v58 = vcombine.low %v4138_v46, %v5778_v40 }
  0xbf   : > { %v5771_v35 = vpop.permute.xlu0 %1048  ;;  %2444 = vrot.lane.b32.xlu1 %v4189_v47, %s4782_s27  ;;  %v2240_v2 = vshrl.u32 %v5781_v20, 16  ;;  %v2229_v32 = vrot.slane %v2227_v15, 4  ;;  %v1237_v43 = vsel %vm1231_vm7, %v1191_v54, %v5503_v52  ;;  %v1358_v63 = vsel %vm4913_vm5, %v4997_v44, %v4962_v9 }
  0xc0   : > { %v2232_v26 = vrot.slane %v2230_v62, 5  ;;  %v1272_v31 = vsel %vm1264_vm8, %v1237_v43, %v5645_v27  ;;  %v6972_v46 = vor.u32 %v4969_v12, %v4962_v9  ;;  %v6973_v56 = vshll.u32 %v4993_v42, 16  ;;  %v5835_v43 = vld [vmem:[%s4823_s20 + $0xc4] sm:$0xf]  ;;  %v4078_v12 = vld [vmem:[%s4823_s20 + $0xbc] sm:$0x1] }
  0xc1   : > { %v1239_v52 = vsel %vm1231_vm7, %v1194_v39, %v5540_v17  ;;  %v4204_v44 = vcombine.low %v4136_v7, %v5781_v20  ;;  %4448 = vmatprep.mubr.bf16.mxu0 %v1272_v31  ;;  %v2257_v47 = vor.u32 %v2256_v57, %v2253_v14  ;;  %v2260_v9 = vshll.u32 %v5778_v40, 16  ;;  %v5827_v39 = vld [vmem:[%s4823_s20 + $0xb0] sm:$0x1] }
  0xc2   : > { %v1363_v21 = vrot.slane %v6972_v46, 4  ;;  %v1367_v34 = vrot.slane %v6973_v56, 5  ;;  %2442 = vrot.lane.b32.xlu0 %v4188_v51, %s4782_s27  ;;  %v1275_v27 = vsel %vm1264_vm8, %v1239_v52, %v5610_v1  ;;  %v2266_v17 = vrot.slane %v2264_v48, 4  ;;  %v4733_v31 = vld [vmem:[%s4823_s20 + $0x30] sm:$0xf] }
  0xc3   : > { %v5814_v54 = vpop.permute.xlu0 %2532  ;;  %2556 = vrot.lane.b32.xlu1 %v4205_v58, %s4781_s22  ;;  %4449 = vmatmul.mubr.bf16.gmra.mrb[4].mxu0 %v1275_v27  ;;  %v2270_v7 = vshll.u32 %v5803_v3, 16  ;;  %v2258_v57 = vrot.slane %v2257_v47, 4  ;;  %v2262_v15 = vrot.slane %v2260_v9, 5  ;;  %v2233_v51 = vor.u32 %v2232_v26, %v2229_v32  ;;  %v4734_v46 = vld [vmem:[%s4823_s20 + $0x34] sm:$0xf] }
  0xc4   : > { %v5790_v23 = vpop.permute.xlu1 %2610  ;;  %v1368_v42 = vsel %vm4913_vm5, %v1363_v21, %v1367_v34  ;;  %v2236_v58 = vshll.u32 %v5781_v20, 16  ;;  %v2242_v48 = vrot.slane %v2240_v2, 4  ;;  %v4004_v21 = vcombine.low %v4733_v31, %v4734_v46  ;;  %v5842_v52 = vld [vmem:[%s4823_s20 + $0xc8] sm:$0x1]  ;;  %v4095_v27 = vld [vmem:[%s4823_s20 + $0xc0] sm:$0xe] }
  0xc5   : > { %v4160_v22 = vcombine.low %v1358_v63, %v1368_v42  ;;  %v2267_v56 = vor.u32 %v2266_v17, %v2262_v15  ;;  %v2272_v63 = vrot.slane %v2270_v7, 5  ;;  %v2246_v34 = vshll.u32 %v5827_v39, 16  ;;  %v5848_v9 = vld [vmem:[%s4823_s20 + $0xb8] sm:$0xf]  ;;  %v4094_v2 = vld [vmem:[%s4823_s20 + $0xb4] sm:$0xe] }
  0xc6   : > { %2554 = vrot.lane.b32.xlu0 %v4204_v44, %s4781_s22  ;;  %v2234_v26 = vrot.slane %v2233_v51, 4  ;;  %v2238_v47 = vrot.slane %v2236_v58, 5  ;;  %v2263_v31 = vsel %vm4913_vm5, %v2258_v57, %v2262_v15  ;;  %v4111_v51 = vrot.slane %v4095_v27, 9  ;;  %v6980_v20 = vld [vmem:[#allocation2_spill] sm:$0xff] }
  0xc7   : > { %v5850_v44 = vpop.permute.xlu0 %1160  ;;  %v2268_v46 = vrot.slane %v2267_v56, 4  ;;  %v2248_v32 = vrot.slane %v2246_v34, 5  ;;  %v1884_v58 = vrot.slane %v5835_v43, 5  ;;  %v1197_v62 = vsel %vm1182_vm6, %v4004_v21, %v5683_v36 }
  0xc8   : > { %v2243_v14 = vor.u32 %v2242_v48, %v2238_v47  ;;  %v2239_v7 = vsel %vm4913_vm5, %v2234_v26, %v2238_v47  ;;  %v1887_v57 = vrot.slane %v5842_v52, 5  ;;  %v2644_v27 = vsel %vm1182_vm6, %v4160_v22, %v5647_v50  ;;  %v4142_v26 = vld [vmem:[%s4823_s20 + $0xcc] sm:$0xf] }
  0xc9   : > { %v2273_v17 = vsel %vm4913_vm5, %v2268_v46, %v2272_v63  ;;  %v1885_v56 = vsel %vm4850_vm2, %v4111_v51, %v1884_v58  ;;  %v1886_v34 = vrot.slane %v1884_v58, 4  ;;  %v4110_v36 = vrot.slane %v4094_v2, 9  ;;  %v4143_v2 = vld [vmem:[%s4823_s20 + $0xd0] sm:$0xf] }
  0xca   : > { %v5829_v1 = vpop.permute.xlu1 %2612  ;;  %v4221_v15 = vcombine.low %v2263_v31, %v2273_v17  ;;  %v2244_v48 = vrot.slane %v2243_v14, 4  ;;  %v1877_v21 = vrot.slane %v5848_v9, 5  ;;  %v1880_v63 = vrot.slane %v4078_v12, 5  ;;  %v4140_v31 = vld [vmem:[%s4823_s20 + $0xc0] sm:$0xf] }
  0xcb   : > { %v1888_v17 = vsel %vm4850_vm2, %v1886_v34, %v1887_v57  ;;  %v1382_v50 = vsel %vm4913_vm5, %v4980_v37, %v4856_v18  ;;  %v6974_v12 = vor.u32 %v4948_v6, %v4856_v18  ;;  %v1391_v37 = vrot.slane %v6975_v25, 5  ;;  %v4141_v18 = vld [vmem:[%s4823_s20 + $0xc4] sm:$0xf] }
  0xcc   : > { %2636 = vrot.lane.b32.xlu1 %v4221_v15, %s4780_s21  ;;  %v2249_v14 = vsel %vm4913_vm5, %v2244_v48, %v2248_v32  ;;  %v4191_v58 = vcombine.low %v1885_v56, %v1888_v17  ;;  %v1878_v32 = vsel %vm4850_vm2, %v4110_v36, %v1877_v21  ;;  %v1879_v57 = vrot.slane %v1877_v21, 4  ;;  %v4735_v15 = vld [vmem:[%s4823_s20 + $0x3c] sm:$0xf]  ;;  %v4736_v48 = vld [vmem:[%s4823_s20 + $0x40] sm:$0xf] }
  0xcd   : > { %v1387_v22 = vrot.slane %v6974_v12, 4  ;;  %v4220_v51 = vcombine.low %v2239_v7, %v2249_v14  ;;  %v4005_v34 = vcombine.low %v4735_v15, %v4736_v48  ;;  %v2299_v30 = vshrl.u32 %v4142_v26, 16 }
  0xce   : > { %v5852_v42 = vpop.permute.xlu1 %2422  ;;  %v2302_v59 = vshll.u32 %v4142_v26, 16  ;;  %v1881_v6 = vsel %vm4850_vm2, %v1879_v57, %v1880_v63  ;;  %v2312_v7 = vshrl.u32 %v4143_v2, 16  ;;  %v4207_v56 = vcombine.low %v4142_v26, %v4143_v2 }
  0xcf   : > { %2634 = vrot.lane.b32.xlu0 %v4220_v51, %s4780_s21  ;;  %v2275_v14 = vshrl.u32 %v4140_v31, 16  ;;  %v4190_v36 = vcombine.low %v1878_v32, %v1881_v6  ;;  %v1392_v4 = vsel %vm4913_vm5, %v1387_v22, %v1391_v37  ;;  %v2301_v25 = vrot.slane %v2299_v30, 4 }
  0xd0   : > { %2448 = vrot.lane.b32.xlu1 %v4191_v58, %s4782_s27  ;;  %v2304_v21 = vrot.slane %v2302_v59, 5  ;;  %v4161_v12 = vcombine.low %v1382_v50, %v1392_v4  ;;  %v2278_v51 = vshll.u32 %v4140_v31, 16  ;;  %v2288_v48 = vshrl.u32 %v4141_v18, 16  ;;  %v4158_v59 = vld [vmem:[%s4823_s20 + $0xc8] sm:$0x1] }
  0xd1   : > { %v2277_v15 = vrot.slane %v2275_v14, 4  ;;  %v1241_v26 = vsel %vm1231_vm7, %v1197_v62, %v5685_v13  ;;  %v1200_v58 = vsel %vm1182_vm6, %v4005_v34, %v5703_v45  ;;  %v2691_v22 = vsel %vm1231_vm7, %v2644_v27, %v5712_v29  ;;  %v5931_v4 = vld [vmem:[%s4823_s20 + $0x88] sm:$0xf] }
  0xd2   : > { %v5874_v47 = vpop.permute.xlu1 %1050  ;;  %v5890_v46 = vpop.permute.xlu0 %970  ;;  %v2305_v30 = vor.u32 %v2304_v21, %v2301_v25  ;;  %v2280_v50 = vrot.slane %v2278_v51, 5  ;;  %v4206_v32 = vcombine.low %v4140_v31, %v4141_v18  ;;  %v2308_v57 = vshll.u32 %v4143_v2, 16  ;;  %v221_v31 = vld [vmem:[%s4823_s20 + $0x84] sm:$0xf] }
  0xd3   : > { %2446 = vrot.lane.b32.xlu0 %v4190_v36, %s4782_s27  ;;  %v2314_v37 = vrot.slane %v2312_v7, 4  ;;  %v5921_v13 = vsel %vm1231_vm7, %v1200_v58, %v5771_v35  ;;  %v2318_v62 = vshll.u32 %v4159_v24, 16  ;;  %v2284_v34 = vshll.u32 %v4141_v18, 16 }
  0xd4   : > { %2560 = vrot.lane.b32.xlu1 %v4207_v56, %s4781_s22  ;;  %v2306_v45 = vrot.slane %v2305_v30, 4  ;;  %v2310_v27 = vrot.slane %v2308_v57, 5  ;;  %v2281_v6 = vor.u32 %v2280_v50, %v2277_v15  ;;  %v2290_v14 = vrot.slane %v2288_v48, 4  ;;  %v5937_v15 = vld [vmem:[%s4823_s20 + $0x8c] sm:$0x1] }
  0xd5   : > { %v2294_v36 = vshll.u32 %v4158_v59, 16  ;;  %v2647_v2 = vsel %vm1182_vm6, %v4161_v12, %v5731_v33  ;;  %v2320_v7 = vrot.slane %v2318_v62, 5  ;;  %v2286_v56 = vrot.slane %v2284_v34, 5 }
  0xd6   : > { %v5908_v63 = vpop.permute.xlu1 %2534  ;;  %v1278_v35 = vsel %vm1264_vm8, %v1241_v26, %v5757_v28  ;;  %v2311_v24 = vsel %vm4913_vm5, %v2306_v45, %v2310_v27  ;;  %v2315_v18 = vor.u32 %v2314_v37, %v2310_v27  ;;  %v2282_v25 = vrot.slane %v2281_v6, 4  ;;  %v219_v45 = vld [vmem:[%s4823_s20 + $0x78] sm:$0xf] }
  0xd7   : > { %v5905_v17 = vpop.permute.xlu0 %972  ;;  %2558 = vrot.lane.b32.xlu0 %v4206_v32, %s4781_s22  ;;  %v2296_v21 = vrot.slane %v2294_v36, 5  ;;  %4452 = vmatprep.mubr.bf16.mxu0 %v1278_v35  ;;  %v2291_v12 = vor.u32 %v2290_v14, %v2286_v56  ;;  %v5943_v28 = vsel %vm1231_vm7, %v2647_v2, %v5814_v54  ;;  %v515_v51 = vshrl.u32 %v221_v31, 16  ;;  %v220_v14 = vld [vmem:[%s4823_s20 + $0x7c] sm:$0xf]  ;;  %v241_v36 = vld [vmem:[%s4823_s20 + $0x80] sm:$0x1] }
  0xd8   : > { %v518_v48 = vshll.u32 %v221_v31, 16  ;;  %v2316_v26 = vrot.slane %v2315_v18, 4  ;;  %v2287_v58 = vsel %vm4913_vm5, %v2282_v25, %v2286_v56  ;;  %v524_v30 = vshll.u32 %v5931_v4, 16  ;;  %v645_v18 = vld [vmem:[%s4823_s20 + $0x84] sm:$0xe] }
  0xd9   : > { %v528_v59 = vshrl.u32 %v5931_v4, 16  ;;  %v2292_v32 = vrot.slane %v2291_v12, 4  ;;  %v517_v57 = vrot.slane %v515_v51, 4  ;;  %v534_v54 = vshll.u32 %v5937_v15, 16 }
  0xda   : > { %v5939_v33 = vpop.permute.xlu1 %1162  ;;  %v520_v37 = vrot.slane %v518_v48, 5  ;;  %v2321_v62 = vsel %vm4913_vm5, %v2316_v26, %v2320_v7  ;;  %v526_v34 = vrot.slane %v524_v30, 5  ;;  %v2723_v6 = vsel %vm1264_vm8, %v2691_v22, %v5790_v23 }
  0xdb   : > { %v5923_v29 = vpop.permute.xlu0 %2424  ;;  %v530_v27 = vrot.slane %v528_v59, 4  ;;  %v4223_v31 = vcombine.low %v2311_v24, %v2321_v62  ;;  %v2297_v2 = vsel %vm4913_vm5, %v2292_v32, %v2296_v21  ;;  %v536_v35 = vrot.slane %v534_v54, 5  ;;  %4396 = vmatprep.mubr.bf16.mxu1 %v2723_v6 }
  0xdc   : > { %v521_v56 = vor.u32 %v520_v37, %v517_v57  ;;  %v4222_v25 = vcombine.low %v2287_v58, %v2297_v2  ;;  %v491_v51 = vshrl.u32 %v219_v45, 16  ;;  %v494_v7 = vshll.u32 %v219_v45, 16  ;;  %v644_v57 = vld [vmem:[%s4823_s20 + $0x78] sm:$0xe] }
  0xdd   : > { %v531_v12 = vor.u32 %v530_v27, %v526_v34  ;;  %2640 = vrot.lane.b32.xlu1 %v4223_v31, %s4780_s21  ;;  %v500_v22 = vshll.u32 %v220_v14, 16  ;;  %v504_v26 = vshrl.u32 %v220_v14, 16  ;;  %v510_v24 = vshll.u32 %v241_v36, 16 }
  0xde   : > { %v522_v23 = vrot.slane %v521_v56, 4  ;;  %2638 = vrot.lane.b32.xlu0 %v4222_v25, %s4780_s21  ;;  %v493_v30 = vrot.slane %v491_v51, 4  ;;  %v496_v59 = vrot.slane %v494_v7, 5  ;;  %v3963_v32 = vrot.slane %v645_v18, 9 }
  0xdf   : > { %v5949_v50 = vpop.permute.xlu0 %1052  ;;  %v532_v21 = vrot.slane %v531_v12, 4  ;;  %v502_v54 = vrot.slane %v500_v22, 5  ;;  %v506_v45 = vrot.slane %v504_v26, 4  ;;  %v512_v62 = vrot.slane %v510_v24, 5 }
  0xe0   : > { %v527_v58 = vsel %vm4913_vm5, %v522_v23, %v526_v34  ;;  %v497_v6 = vor.u32 %v496_v59, %v493_v30  ;;  %v780_v31 = vrot.slane %v5931_v4, 5  ;;  %v783_v2 = vrot.slane %v5937_v15, 5  ;;  %v3990_v59 = vld [vmem:[%s4823_s20 + $0x90] sm:$0xf] }
  0xe1   : > { %v537_v27 = vsel %vm4913_vm5, %v532_v21, %v536_v35  ;;  %v507_v25 = vor.u32 %v506_v45, %v502_v54  ;;  %v3962_v12 = vrot.slane %v644_v57, 9  ;;  %v773_v51 = vrot.slane %v220_v14, 5 }
  0xe2   : > { %v4027_v18 = vcombine.low %v527_v58, %v537_v27  ;;  %v498_v7 = vrot.slane %v497_v6, 4  ;;  %v781_v34 = vsel %vm4850_vm2, %v3963_v32, %v780_v31  ;;  %v782_v23 = vrot.slane %v780_v31, 4  ;;  %v6977_v27 = vld [vmem:[#allocation10_spill] sm:$0xff]  ;;  %v4738_v31 = vld [vmem:[%s6847_s1 + $0x8] sm:$0xff]  }
  0xe3   : > { %v5962_v48 = vpop.permute.xlu1 %2614  ;;  %v5967_v37 = vpop.permute.xlu0 %2536  ;;  %v776_v22 = vrot.slane %v241_v36, 5  ;;  %v508_v35 = vrot.slane %v507_v25, 4  ;;  %v774_v4 = vsel %vm4850_vm2, %v3962_v12, %v773_v51  ;;  %v775_v15 = vrot.slane %v773_v51, 4 }
  0xe4   : > { %980 = vrot.lane.b32.xlu1 %v4027_v18, %s4782_s27  ;;  %v2726_v26 = vsel %vm1264_vm8, %v5943_v28, %v5829_v1  ;;  %v503_v14 = vsel %vm4913_vm5, %v498_v7, %v502_v54  ;;  %v784_v24 = vsel %vm4850_vm2, %v782_v23, %v783_v2  ;;  %v1281_v36 = vsel %vm1264_vm8, %v5921_v13, %v5850_v44  ;;  %v4739_v2 = vld [vmem:[%s4823_s20 + $0x48] sm:$0xf]  ;;  %v4740_v18 = vld [vmem:[%s4823_s20 + $0x4c] sm:$0xf] }
  0xe5   : > { %4397 = vmatmul.mubr.bf16.vlgmr.msra.gmra.mrb[0].mxu1 %v2726_v26  ;;  %v6976_v21 = vshll.u32 %v4990_v41, 16  ;;  %v513_v28 = vsel %vm4913_vm5, %v508_v35, %v512_v62  ;;  %v4043_v58 = vcombine.low %v781_v34, %v784_v24  ;;  %v777_v54 = vsel %vm4850_vm2, %v775_v15, %v776_v22  ;;  %4453 = vmatmul.mubr.bf16.gmra.mrb[8].mxu0 %v1281_v36  ;;  %v4737_v41 = vld [vmem:[%s6847_s1] sm:$0xff]   ;;  %v225_v35 = vld [vmem:[%s4823_s20 + $0x9c] sm:$0xf] }
  0xe6   : > { %4520 = vmatpush3.bf16.msra.mxu1 %v4737_v41  ;;  %v4026_v44 = vcombine.low %v503_v14, %v513_v28  ;;  %v6978_v62 = vshll.u32 %v6977_v27, 16  ;;  %v4006_v25 = vcombine.low %v4739_v2, %v4740_v18  ;;  %v4059_v12 = vcombine.low %v3990_v59, %v5617_v53  ;;  %v6028_v24 = vld [vmem:[%s4823_s20 + $0xa0] sm:$0xf]  ;;  %v4741_v41 = vld [vmem:[%s6847_s1 + $0x10] sm:$0xff]   ;;  %v647_v14 = vld [vmem:[%s4823_s20 + $0x9c] sm:$0xe] }
  0xe7   : > { %v5975_v56 = vpop.permute.xlu1 %2616  ;;  %v1405_v30 = vrot.slane %v6976_v21, 5  ;;  %v5995_v32 = vpop.permute.xlu0 %1164  ;;  %4513 = vmatprep.subr.bf16.mxu1 %v4738_v31  ;;  %v1613_v51 = vshll.u32 %v3990_v59, 16  ;;  %v4042_v34 = vcombine.low %v774_v4, %v777_v54  ;;  %v4742_v27 = vld [vmem:[%s4823_s20 + $0x54] sm:$0xf]  ;;  %v223_v2 = vld [vmem:[%s4823_s20 + $0x90] sm:$0xf] }
  0xe8   : > { %v1415_v6 = vrot.slane %v6978_v62, 5  ;;  %1060 = vrot.lane.b32.xlu1 %v4043_v58, %s4781_s22  ;;  %978 = vrot.lane.b32.xlu0 %v4026_v44, %s4782_s27  ;;  %v6040_v58 = vld [vmem:[%s4823_s20 + $0xa4] sm:$0x1]  ;;  %v4743_v62 = vld [vmem:[%s4823_s20 + $0x58] sm:$0xf] }
  0xe9   : > { %v1406_v13 = vsel %vm4913_vm5, %v5145_v60, %v1405_v30  ;;  %v1410_v45 = vor.u32 %v5147_v49, %v1405_v30  ;;  %v1610_v60 = vshrl.u32 %v3990_v59, 16  ;;  %v3988_v49 = vld [vmem:[%s4823_s20 + $0x84] sm:$0xf]  ;;  %v6036_v30 = vrot.slane %v1613_v51, 5 }
  0xea   : > { %v1586_v22 = vshrl.u32 %v3988_v49, 16  ;;  %v1589_v53 = vshll.u32 %v3988_v49, 16  ;;  %4521 = vmatpush3.bf16.msra.mxu1 %v4738_v31  ;;  %v6979_v59 = vld [vmem:[#allocation50_spill] sm:$0xff]  ;;  %v563_v31 = vshrl.u32 %v225_v35, 16  ;;  %v572_v51 = vshll.u32 %v6028_v24, 16 }
  0xeb   : > { %v5997_v57 = vpop.permute.xlu1 %2426  ;;  %v1411_v23 = vrot.slane %v1410_v45, 4  ;;  %v6034_v21 = vrot.slane %v1610_v60, 4  ;;  %v4058_v28 = vcombine.low %v3988_v49, %v6979_v59  ;;  %4514 = vmatprep.subr.bf16.mxu1 %v4741_v41  ;;  %v1203_v45 = vsel %vm1182_vm6, %v4006_v25, %v5890_v46  ;;  %v6061_v49 = vld [vmem:[%s4823_s20 + $0x94] sm:$0xf] }
  0xec   : > { %1172 = vrot.lane.b32.xlu1 %v4059_v12, %s4780_s21  ;;  %1058 = vrot.lane.b32.xlu0 %v4042_v34, %s4781_s22  ;;  %v6056_v18 = vrot.slane %v1586_v22, 4  ;;  %v566_v60 = vshll.u32 %v225_v35, 16  ;;  %v6063_v46 = vrot.slane %v1589_v53, 5  ;;  %v6067_v25 = vsel %vm1231_vm7, %v1203_v45, %v5874_v47  ;;  %v4744_v47 = vld [vmem:[%s6847_s1 + $0x18] sm:$0xff]  }
  0xed   : > { %v1416_v4 = vsel %vm4913_vm5, %v1411_v23, %v1415_v6  ;;  %v4007_v6 = vcombine.low %v4742_v27, %v4743_v62  ;;  %v565_v12 = vrot.slane %v563_v31, 4  ;;  %v582_v23 = vshll.u32 %v6040_v58, 16 }
  0xee   : > { %v6047_v44 = vcombine.low %v1406_v13, %v1416_v4  ;;  %v576_v13 = vshrl.u32 %v6028_v24, 16  ;;  %v6071_v4 = vld [vmem:[%s4823_s20 + $0x98] sm:$0x1]  ;;  %4522 = vmatpush3.bf16.msra.mxu1 %v4741_v41  ;;  %v568_v22 = vrot.slane %v566_v60, 5  ;;  %v574_v35 = vrot.slane %v572_v51, 5 }
  0xef   : > { %v6030_v36 = vpop.permute.xlu1 %1054  ;;  %4515 = vmatprep.subr.bf16.mxu1 %v4744_v47  ;;  %v584_v53 = vrot.slane %v582_v23, 5  ;;  %v539_v45 = vshrl.u32 %v223_v2, 16  ;;  %v542_v62 = vshll.u32 %v223_v2, 16  ;;  %v548_v31 = vshll.u32 %v6061_v49, 16 }
  0xf0   : > { %v6042_v54 = vpop.permute.xlu0 %974  ;;  %v578_v59 = vrot.slane %v576_v13, 4  ;;  %1170 = vrot.lane.b32.xlu0 %v4058_v28, %s4780_s21  ;;  %v569_v60 = vor.u32 %v568_v22, %v565_v12  ;;  %v552_v51 = vshrl.u32 %v6061_v49, 16  ;;  %v558_v13 = vshll.u32 %v6071_v4, 16  ;;  %v4745_v22 = vld [vmem:[%s6847_s1 + $0x20] sm:$0xff]  }
  0xf1   : > { %v6089_v1 = vsel %vm1182_vm6, %v4007_v6, %v5905_v17  ;;  %v541_v23 = vrot.slane %v539_v45, 4  ;;  %v544_v15 = vrot.slane %v542_v62, 5  ;;  %v550_v2 = vrot.slane %v548_v31, 5  ;;  %v6982_v45 = vld [vmem:[#allocation14_spill] sm:$0xff] }
  0xf2   : > { %v579_v26 = vor.u32 %v578_v59, %v574_v35  ;;  %4523 = vmatpush3.bf16.msra.mxu1 %v4744_v47  ;;  %v570_v7 = vrot.slane %v569_v60, 4  ;;  %v554_v40 = vrot.slane %v552_v51, 4  ;;  %v560_v28 = vrot.slane %v558_v13, 5 }
  0xf3   : > { %v6081_v41 = vpop.permute.xlu1 %2538  ;;  %4516 = vmatprep.subr.bf16.mxu1 %v4745_v22  ;;  %v545_v59 = vor.u32 %v544_v15, %v541_v23  ;;  %v6981_v17 = vshll.u32 %v6980_v20, 16  ;;  %v6983_v62 = vshll.u32 %v6982_v45, 16  ;;  %v3965_v47 = vrot.slane %v647_v14, 9  ;;  %v6984_v15 = vld [vmem:[#allocation8_spill] sm:$0xff]  ;;  %v6985_v23 = vld [vmem:[#allocation5_spill] sm:$0xff] }
  0xf4   : > { %v6075_v27 = vpop.permute.xlu0 %976  ;;  %v580_v34 = vrot.slane %v579_v26, 4  ;;  %v575_v26 = vsel %vm4913_vm5, %v570_v7, %v574_v35  ;;  %v555_v51 = vor.u32 %v554_v40, %v550_v2  ;;  %v794_v13 = vrot.slane %v6028_v24, 5  ;;  %v4746_v35 = vld [vmem:[%s6847_s1 + $0x28] sm:$0xff]  }
  0xf5   : > { %v1429_v6 = vrot.slane %v6981_v17, 5  ;;  %v1439_v31 = vrot.slane %v6983_v62, 5  ;;  %v546_v38 = vrot.slane %v545_v59, 4  ;;  %v797_v24 = vrot.slane %v6040_v58, 5 }
  0xf6   : > { %v585_v60 = vsel %vm4913_vm5, %v580_v34, %v584_v53  ;;  %4524 = vmatpush3.bf16.msra.mxu1 %v4745_v22  ;;  %v556_v14 = vrot.slane %v555_v51, 4  ;;  %v795_v7 = vsel %vm4850_vm2, %v3965_v47, %v794_v13  ;;  %v796_v40 = vrot.slane %v794_v13, 4 }
  0xf7   : > { %v4029_v0 = vcombine.low %v575_v26, %v585_v60  ;;  %v1430_v20 = vsel %vm4913_vm5, %v6984_v15, %v1429_v6  ;;  %v1434_v17 = vor.u32 %v6985_v23, %v1429_v6  ;;  %v6110_v45 = vpop.permute.xlu1 %1166  ;;  %4517 = vmatprep.subr.bf16.mxu1 %v4746_v35  ;;  %v551_v53 = vsel %vm4913_vm5, %v546_v38, %v550_v2  ;;  %v3994_v26 = vld [vmem:[%s4823_s20 + $0xa8] sm:$0xf]  ;;  %v3992_v15 = vld [vmem:[%s4823_s20 + $0x9c] sm:$0xf] }
  0xf8   : > { %v6091_v12 = vpop.permute.xlu0 %2428  ;;  %v3964_v59 = vrot.slane %v646_v5, 9  ;;  %v787_v6 = vrot.slane %v6061_v49, 5  ;;  %v561_v62 = vsel %vm4913_vm5, %v556_v14, %v560_v28  ;;  %v798_v47 = vsel %vm4850_vm2, %v796_v40, %v797_v24  ;;  %v6152_v14 = vld [vmem:[%s4823_s20 + $0xac] sm:$0xf] }
  0xf9   : > { %984 = vrot.lane.b32.xlu1 %v4029_v0, %s4782_s27  ;;  %v1435_v22 = vrot.slane %v1434_v17, 4  ;;  %v790_v0 = vrot.slane %v6071_v4, 5  ;;  %v2650_v5 = vsel %vm1182_vm6, %v6047_v44, %v5852_v42  ;;  %v4028_v38 = vcombine.low %v551_v53, %v561_v62  ;;  %v6141_v4 = vld [vmem:[%s4823_s20 + $0xa8] sm:$0xf]  ;;  %v4747_v42 = vld [vmem:[%s6847_s1 + $0x30] sm:$0xff]  }
  0xfa   : > { %v4045_v2 = vcombine.low %v795_v7, %v798_v47  ;;  %4525 = vmatpush3.bf16.msra.mxu1 %v4746_v35  ;;  %v788_v28 = vsel %vm4850_vm2, %v3964_v59, %v787_v6  ;;  %v789_v51 = vrot.slane %v787_v6, 4  ;;  %v1658_v13 = vshrl.u32 %v3994_v26, 16  ;;  %6986 = vst [vmem:[#allocation10_spill] sm:$0xff] %v6141_v4  ;;  %v6169_v53 = vld [vmem:[%s4823_s20 + $0xb0] sm:$0x1] }
  0xfb   : > { %v1440_v49 = vsel %vm4913_vm5, %v1435_v22, %v1439_v31  ;;  %4518 = vmatprep.subr.bf16.mxu1 %v4747_v42  ;;  %982 = vrot.lane.b32.xlu0 %v4028_v38, %s4782_s27  ;;  %v4061_v44 = vcombine.low %v3994_v26, %v5719_v55  ;;  %v1661_v31 = vshll.u32 %v3994_v26, 16  ;;  %v1637_v17 = vshll.u32 %v3992_v15, 16  ;;  %v6177_v47 = vld [vmem:[%s4823_s20 + $0xb4] sm:$0xf] }
  0xfc   : > { %v6115_v34 = vpop.permute.xlu0 %1056  ;;  %v4163_v60 = vcombine.low %v1430_v20, %v1440_v49  ;;  %v1634_v20 = vshrl.u32 %v3992_v15, 16  ;;  %v2695_v40 = vsel %vm1231_vm7, %v2650_v5, %v5908_v63  ;;  %v791_v24 = vsel %vm4850_vm2, %v789_v51, %v790_v0  ;;  %v6987_v63 = vld [vmem:[#allocation56_spill] sm:$0xff]  ;;  %6988 = vst [vmem:[#allocation50_spill] sm:$0xff] %v6177_v47  ;;  %v6185_v0 = vld [vmem:[%s4823_s20 + $0xb8] sm:$0xf] }
  0xfd   : > { %1064 = vrot.lane.b32.xlu1 %v4045_v2, %s4781_s22  ;;  %v6163_v35 = vsel %vm1231_vm7, %v6089_v1, %v5949_v50  ;;  %v1284_v55 = vsel %vm1264_vm8, %v6067_v25, %v5939_v33  ;;  %v4044_v22 = vcombine.low %v788_v28, %v791_v24  ;;  %v6171_v59 = vrot.slane %v1658_v13, 4  ;;  %v4748_v5 = vld [vmem:[%s6847_s1 + $0x38] sm:$0xff]  }
  0xfe   : > { %v6173_v6 = vrot.slane %v1661_v31, 5  ;;  %v4060_v62 = vcombine.low %v3992_v15, %v6987_v63  ;;  %4456 = vmatprep.mubr.bf16.mxu0 %v1284_v55  ;;  %4526 = vmatpush3.bf16.msra.mxu1 %v4747_v42  ;;  %v2653_v50 = vsel %vm1182_vm6, %v4163_v60, %v5923_v29  ;;  %v587_v1 = vshrl.u32 %v6141_v4, 16  ;;  %v6201_v60 = vld [vmem:[%s4823_s20 + $0xbc] sm:$0x1]  ;;  %v648_v31 = vld [vmem:[%s4823_s20 + $0xa8] sm:$0xe] }
  0xff   : > { %v590_v33 = vshll.u32 %v6141_v4, 16  ;;  %v596_v25 = vshll.u32 %v6152_v14, 16  ;;  %4519 = vmatprep.subr.bf16.mxu1 %v4748_v5  ;;  %1062 = vrot.lane.b32.xlu0 %v4044_v22, %s4781_s22  ;;  %v6194_v29 = vrot.slane %v1634_v20, 4  ;;  %v6196_v38 = vrot.slane %v1637_v17, 5 }
 0x100   : > { %v6143_v23 = vpop.permute.xlu0 %2540  ;;  %v600_v49 = vshrl.u32 %v6152_v14, 16  ;;  %v606_v2 = vshll.u32 %v6169_v53, 16  ;;  %v589_v51 = vrot.slane %v587_v1, 4  ;;  %v2729_v42 = vsel %vm1264_vm8, %v2695_v40, %v5962_v48 }
 0x101   : > { %v6154_v7 = vpop.permute.xlu1 %2618  ;;  %1176 = vrot.lane.b32.xlu1 %v4061_v44, %s4780_s21  ;;  %v592_v13 = vrot.slane %v590_v33, 5  ;;  %v598_v15 = vrot.slane %v596_v25, 5  ;;  %v2697_v20 = vsel %vm1231_vm7, %v2653_v50, %v5967_v37  ;;  %4400 = vmatprep.mubr.bf16.mxu1 %v2729_v42  ;;  %v611_v22 = vshrl.u32 %v6177_v47, 16 }
 0x102   : > { %v602_v17 = vrot.slane %v600_v49, 4  ;;  %v608_v24 = vrot.slane %v606_v2, 5  ;;  %4527 = vmatpush3.bf16.msra.mxu1 %v4748_v5  ;;  %v614_v63 = vshll.u32 %v6177_v47, 16  ;;  %v620_v1 = vshll.u32 %v6185_v0, 16 }
 0x103   : > { %v593_v55 = vor.u32 %v592_v13, %v589_v51  ;;  %1174 = vrot.lane.b32.xlu0 %v4060_v62, %s4780_s21  ;;  %v624_v40 = vshrl.u32 %v6185_v0, 16  ;;  %v630_v33 = vshll.u32 %v6201_v60, 16  ;;  %v3966_v37 = vrot.slane %v648_v31, 9  ;;  %v649_v62 = vld [vmem:[%s4823_s20 + $0xb4] sm:$0xe] }
 0x104   : > { %v6187_v26 = vpop.permute.xlu0 %1168  ;;  %v603_v48 = vor.u32 %v602_v17, %v598_v15  ;;  %v613_v49 = vrot.slane %v611_v22, 4  ;;  %v616_v2 = vrot.slane %v614_v63, 5  ;;  %v622_v51 = vrot.slane %v620_v1, 5 }
 0x105   : > { %v6203_v28 = vpop.permute.xlu1 %2620  ;;  %v594_v5 = vrot.slane %v593_v55, 4  ;;  %v626_v42 = vrot.slane %v624_v40, 4  ;;  %v632_v44 = vrot.slane %v630_v33, 5  ;;  %v801_v58 = vrot.slane %v6152_v14, 5 }
 0x106   : > { %v604_v13 = vrot.slane %v603_v48, 4  ;;  %v617_v47 = vor.u32 %v616_v2, %v613_v49  ;;  %v804_v31 = vrot.slane %v6169_v53, 5  ;;  %v2732_v4 = vsel %vm1264_vm8, %v2697_v20, %v5975_v56 }
 0x107   : > { %v599_v17 = vsel %vm4913_vm5, %v594_v5, %v598_v15  ;;  %v627_v22 = vor.u32 %v626_v42, %v622_v51  ;;  %v802_v63 = vsel %vm4850_vm2, %v3966_v37, %v801_v58  ;;  %v803_v1 = vrot.slane %v801_v58, 4  ;;  %4401 = vmatmul.mubr.bf16.gmra.mrb[4].mxu1 %v2732_v4  ;;  %v6989_v37 = vld [vmem:[#allocation4_spill] sm:$0xff]  ;;  %v4749_v42 = vld [vmem:[%s4823_s20 + $0x60] sm:$0xf] }
 0x108   : > { %v6220_v25 = vpop.permute.xlu0 %2430  ;;  %v609_v55 = vsel %vm4913_vm5, %v604_v13, %v608_v24  ;;  %v618_v33 = vrot.slane %v617_v47, 4  ;;  %v1287_v53 = vsel %vm1264_vm8, %v6163_v35, %v5995_v32  ;;  %v3967_v15 = vrot.slane %v649_v62, 9  ;;  %v4750_v62 = vld [vmem:[%s4823_s20 + $0x64] sm:$0xf] }
 0x109   : > { %v6218_v50 = vpop.permute.xlu1 %2432  ;;  %v4030_v40 = vcombine.low %v599_v17, %v609_v55  ;;  %v628_v56 = vrot.slane %v627_v22, 4  ;;  %v805_v20 = vsel %vm4850_vm2, %v803_v1, %v804_v31  ;;  %4457 = vmatmul.mubr.bf16.gmra.mrb[12].mxu0 %v1287_v53  ;;  %v808_v58 = vrot.slane %v6185_v0, 5  ;;  %v6991_v31 = vld [vmem:[#allocation12_spill] sm:$0xff]  ;;  %v6992_v55 = vld [vmem:[#allocation11_spill] sm:$0xff] }
 0x10a   : > { %v811_v4 = vrot.slane %v6201_v60, 5  ;;  %v1640_v47 = vor.u32 %v6196_v38, %v6194_v29  ;;  %v623_v32 = vsel %vm4913_vm5, %v618_v33, %v622_v51  ;;  %v4046_v35 = vcombine.low %v802_v63, %v805_v20  ;;  %v6258_v29 = vld [vmem:[%s4823_s20 + $0xb4] sm:$0xf]  ;;  %v6993_v63 = vld [vmem:[#allocation22_spill] sm:$0xff] }
 0x10b   : > { %986 = vrot.lane.b32.xlu0 %v4030_v40, %s4782_s27  ;;  %v6990_v5 = vshll.u32 %v6989_v37, 16  ;;  %v633_v2 = vsel %vm4913_vm5, %v628_v56, %v632_v44  ;;  %v809_v60 = vsel %vm4850_vm2, %v3967_v15, %v808_v58  ;;  %v810_v13 = vrot.slane %v808_v58, 4 }
 0x10c   : > { %v6242_v24 = vpop.permute.xlu0 %2542  ;;  %v4008_v17 = vcombine.low %v4749_v42, %v4750_v62  ;;  %v4031_v38 = vcombine.low %v623_v32, %v633_v2  ;;  %v6994_v1 = vshll.u32 %v6993_v63, 16  ;;  %v3348_v40 = vrot.slane %v5803_v3, 5 }
 0x10d   : > { %v6233_v48 = vpop.permute.xlu1 %2544  ;;  %v1453_v49 = vrot.slane %v6990_v5, 5  ;;  %v3341_v33 = vrot.slane %v5827_v39, 5  ;;  %v1725_v53 = vshll.u32 %v5842_v52, 16  ;;  %v812_v15 = vsel %vm4850_vm2, %v810_v13, %v811_v4 }
 0x10e   : > { %v1463_v44 = vrot.slane %v6994_v1, 5  ;;  %v6995_v20 = vor.u32 %v6036_v30, %v6034_v21  ;;  %988 = vrot.lane.b32.xlu1 %v4031_v38, %s4782_s27  ;;  %v4047_v32 = vcombine.low %v809_v60, %v812_v15  ;;  %v4062_v5 = vcombine.low %v6258_v29, %v5848_v9  ;;  %v6998_v38 = vld [vmem:[#allocation7_spill] sm:$0xff]  ;;  %v7003_v15 = vld [vmem:[#allocation18_spill] sm:$0xff] }
 0x10f   : > { %v1454_v51 = vsel %vm4913_vm5, %v6991_v31, %v1453_v49  ;;  %v1458_v22 = vor.u32 %v6992_v55, %v1453_v49  ;;  %1066 = vrot.lane.b32.xlu0 %v4046_v35, %s4781_s22  ;;  %v6283_v49 = vld [vmem:[%s4823_s20 + $0xc0] sm:$0xf]  ;;  %v6996_v4 = vor.u32 %v6063_v46, %v6056_v18  ;;  %v6997_v21 = vor.u32 %v6173_v6, %v6171_v59  ;;  %v4751_v18 = vld [vmem:[%s4823_s20 + $0x6c] sm:$0xf]  ;;  %v4752_v46 = vld [vmem:[%s4823_s20 + $0x70] sm:$0xf] }
 0x110   : > { %v6276_v58 = vrot.slane %v6995_v20, 4  ;;  %v6295_v13 = vrot.slane %v1640_v47, 4  ;;  %v1209_v35 = vsel %vm1182_vm6, %v4008_v17, %v6042_v54  ;;  %v1682_v42 = vshrl.u32 %v6258_v29, 16  ;;  %v7000_v54 = vld [vmem:[#allocation26_spill] sm:$0xff] }
 0x111   : > { %v6271_v56 = vpop.permute.xlu1 %2624  ;;  %v1459_v37 = vrot.slane %v1458_v22, 4  ;;  %v6288_v2 = vrot.slane %v6996_v4, 4  ;;  %v6293_v30 = vrot.slane %v6997_v21, 4  ;;  %v4009_v62 = vcombine.low %v4751_v18, %v4752_v46 }
 0x112   : > { %v6999_v31 = vshll.u32 %v6998_v38, 16  ;;  %v1685_v47 = vshll.u32 %v6258_v29, 16  ;;  %v4063_v55 = vcombine.low %v6283_v49, %v5835_v43  ;;  %v7001_v17 = vshll.u32 %v7000_v54, 16  ;;  %1068 = vrot.lane.b32.xlu1 %v4047_v32, %s4781_s22  ;;  %v7004_v43 = vld [vmem:[#allocation20_spill] sm:$0xff]  ;;  %v4240_v38 = vld [vmem:[%s4823_s20 + $0x18] sm:$0xe] }
 0x113   : > { %v6299_v60 = vpop.permute.xlu0 %2622  ;;  %v1464_v9 = vsel %vm4913_vm5, %v1459_v37, %v1463_v44  ;;  %1178 = vrot.lane.b32.xlu0 %v4062_v5, %s4780_s21  ;;  %v1212_v1 = vsel %vm1182_vm6, %v4009_v62, %v6075_v27  ;;  %v7002_v44 = vld [vmem:[#allocation21_spill] sm:$0xff]  ;;  %v7005_v37 = vshll.u32 %v7004_v43, 16  ;;  %v1249_v32 = vsel %vm1231_vm7, %v1209_v35, %v6030_v36  ;;  %v7045_v29 = vld [vmem:[#allocation19_spill] sm:$0xff] }
 0x114   : > { %v1477_v59 = vrot.slane %v6999_v31, 5  ;;  %v4164_v6 = vcombine.low %v1454_v51, %v1464_v9  ;;  %v1487_v22 = vrot.slane %v7001_v17, 5  ;;  %v1706_v9 = vshrl.u32 %v6283_v49, 16  ;;  %v7010_v17 = vld [vmem:[#allocation15_spill] sm:$0xff] }
 0x115   : > { %v6313_v63 = vpop.permute.xlu1 %2436  ;;  %v1525_v4 = vrot.slane %v7005_v37, 5  ;;  %v1251_v27 = vsel %vm1231_vm7, %v1212_v1, %v6115_v34  ;;  %v1290_v62 = vsel %vm1264_vm8, %v1249_v32, %v6110_v45  ;;  %v6341_v31 = vrot.slane %v1682_v42, 4  ;;  %v7006_v34 = vld [vmem:[#allocation34_spill] sm:$0xff] }
 0x116   : > { %v1478_v51 = vsel %vm4913_vm5, %v7002_v44, %v1477_v59  ;;  %v1482_v20 = vor.u32 %v7003_v15, %v1477_v59  ;;  %v2656_v21 = vsel %vm1182_vm6, %v4164_v6, %v5997_v57  ;;  %v1293_v57 = vsel %vm1264_vm8, %v1251_v27, %v6187_v26  ;;  %4460 = vmatprep.mubr.bf16.mxu0 %v1290_v62  ;;  %v7007_v59 = vld [vmem:[#allocation31_spill] sm:$0xff]  ;;  %v7012_v44 = vld [vmem:[#allocation36_spill] sm:$0xff] }
 0x117   : > { %v6332_v5 = vpop.permute.xlu0 %2434  ;;  %v2699_v18 = vsel %vm1231_vm7, %v2656_v21, %v6081_v41  ;;  %v1526_v35 = vsel %vm4913_vm5, %v7006_v34, %v1525_v4  ;;  %v1530_v41 = vor.u32 %v7007_v59, %v1525_v4  ;;  %1180 = vrot.lane.b32.xlu1 %v4063_v55, %s4780_s21  ;;  %v7008_v26 = vld [vmem:[#allocation35_spill] sm:$0xff]  ;;  %v7011_v1 = vshll.u32 %v7010_v17, 16  ;;  %4461 = vmatmul.mubr.bf16.gmra.mrb[16].mxu0 %v1293_v57  ;;  %v7019_v34 = vld [vmem:[#allocation28_spill] sm:$0xff]  ;;  %v7023_v17 = vld [vmem:[#allocation6_spill] sm:$0xff] }
 0x118   : > { %v1483_v46 = vrot.slane %v1482_v20, 4  ;;  %v2735_v36 = vsel %vm1264_vm8, %v2699_v18, %v6154_v7  ;;  %v7009_v42 = vshll.u32 %v7008_v26, 16  ;;  %v7013_v15 = vshll.u32 %v7012_v44, 16  ;;  %v7014_v21 = vld [vmem:[#allocation3_spill] sm:$0xff]  ;;  %v7020_v26 = vld [vmem:[#allocation33_spill] sm:$0xff] }
 0x119   : > { %v6349_v6 = vpop.permute.xlu1 %2548  ;;  %4404 = vmatprep.mubr.bf16.mxu1 %v2735_v36  ;;  %v1501_v7 = vrot.slane %v7011_v1, 5  ;;  %v1531_v37 = vrot.slane %v1530_v41, 4  ;;  %v4256_v4 = vrot.slane %v4240_v38, 9  ;;  %v7015_v55 = vrot.slane %v7014_v21, 5  ;;  %v7018_v36 = vld [vmem:[#allocation9_spill] sm:$0xff]  ;;  %v7026_v21 = vld [vmem:[#allocation48_spill] sm:$0xff] }
 0x11a   : > { %v1488_v45 = vsel %vm4913_vm5, %v1483_v46, %v1487_v22  ;;  %v1535_v54 = vrot.slane %v7009_v42, 5  ;;  %v1511_v20 = vrot.slane %v7013_v15, 5  ;;  %v7016_v22 = vld [vmem:[#allocation24_spill] sm:$0xff]  ;;  %v7017_v46 = vld [vmem:[#allocation23_spill] sm:$0xff]  ;;  %v4273_v59 = vcombine.low %v7019_v34, %v7018_v36 }
 0x11b   : > { %v4165_v43 = vcombine.low %v1478_v51, %v1488_v45  ;;  %v3256_v32 = vrot.slane %v7015_v55, 4  ;;  %v6362_v27 = vpop.permute.xlu0 %2546  ;;  %v1502_v18 = vsel %vm4913_vm5, %v7016_v22, %v1501_v7  ;;  %v1506_v62 = vor.u32 %v7017_v46, %v1501_v7  ;;  %v7027_v46 = vld [vmem:[#allocation43_spill] sm:$0xff] }
 0x11c   : > { %v7021_v51 = vshll.u32 %v7020_v26, 16  ;;  %v1536_v41 = vsel %vm4913_vm5, %v1531_v37, %v1535_v54  ;;  %v7022_v45 = vmov %v7015_v55  ;;  %v7024_v1 = vrot.slane %v7023_v17, 5  ;;  %v7025_v37 = vld [vmem:[#allocation52_spill] sm:$0xff] }
 0x11d   : > { %v2659_v38 = vsel %vm1182_vm6, %v4165_v43, %v6091_v12  ;;  %v3255_v42 = vsel %vm4850_vm2, %v4256_v4, %v7022_v45  ;;  %v4167_v15 = vcombine.low %v1526_v35, %v1536_v41  ;;  %v1507_v55 = vrot.slane %v1506_v62, 4  ;;  %v4242_v43 = vld [vmem:[%s4823_s20 + $0x30] sm:$0xe]  ;;  %v4243_v41 = vld [vmem:[%s4823_s20 + $0x3c] sm:$0xe] }
 0x11e   : > { %v1573_v57 = vrot.slane %v7021_v51, 5  ;;  %v3258_v7 = vsel %vm4850_vm2, %v3256_v32, %v7024_v1  ;;  %v2701_v44 = vsel %vm1231_vm7, %v2659_v38, %v6143_v23  ;;  %v7028_v36 = vshll.u32 %v7027_v46, 16  ;;  %v7031_v51 = vld [vmem:[#allocation44_spill] sm:$0xff] }
 0x11f   : > { %v4272_v12 = vcombine.low %v3255_v42, %v3258_v7  ;;  %v2738_v54 = vsel %vm1264_vm8, %v2701_v44, %v6203_v28  ;;  %v6395_v34 = vpop.permute.xlu1 %2628  ;;  %v2665_v23 = vsel %vm1182_vm6, %v4167_v15, %v6218_v50  ;;  %v1512_v35 = vsel %vm4913_vm5, %v1507_v55, %v1511_v20  ;;  %v7029_v28 = vld [vmem:[#allocation27_spill] sm:$0xff]  ;;  %v7033_v7 = vld [vmem:[#allocation37_spill] sm:$0xff]  ;;  %v7034_v15 = vld [vmem:[#allocation38_spill] sm:$0xff] }
 0x120   : > { %v1574_v4 = vsel %vm4913_vm5, %v7025_v37, %v1573_v57  ;;  %v1578_v22 = vor.u32 %v7026_v21, %v1573_v57  ;;  %v1583_v32 = vrot.slane %v7028_v36, 5  ;;  %4405 = vmatmul.mubr.bf16.gmra.mrb[8].mxu1 %v2738_v54  ;;  %v7030_v62 = vshll.u32 %v7029_v28, 16 }
 0x121   : > { %4480 = vmatprep.mubr.msk.bf16.mxu0 %vm1182_vm6, %v4272_v12  ;;  %v7032_v38 = vshll.u32 %v7031_v51, 16  ;;  %v4166_v45 = vcombine.low %v1502_v18, %v1512_v35  ;;  %v2705_v42 = vsel %vm1231_vm7, %v2665_v23, %v6233_v48  ;;  %v4258_v1 = vrot.slane %v4242_v43, 9  ;;  %v2627_v50 = vpop.permute.xlu0 %2626  ;;  %v7035_v12 = vld [vmem:[#allocation13_spill] sm:$0xff] }
 0x122   : > { %v1549_v26 = vrot.slane %v7030_v62, 5  ;;  %v1579_v17 = vrot.slane %v1578_v22, 4  ;;  %v2744_v20 = vsel %vm1264_vm8, %v2705_v42, %v6271_v56  ;;  %v7036_v54 = vrot.slane %v7035_v12, 5  ;;  %4481 = vmatmul.mubr.msk.bf16.vlgmr.msra.gmra.mrb[0].mxu0 %vm1182_vm6, %v4273_v59  ;;  %v4244_v22 = vld [vmem:[%s4823_s20 + $0x48] sm:$0xe]  ;;  %v7040_v51 = vld [vmem:[#allocation17_spill] sm:$0xff] }
 0x123   : > { %v1559_v57 = vrot.slane %v7032_v38, 5  ;;  %v2662_v18 = vsel %vm1182_vm6, %v4166_v45, %v6220_v25  ;;  %v4259_v21 = vrot.slane %v4243_v41, 9  ;;  %v6427_v46 = vpop.permute.xlu1 %2440  ;;  %v7038_v25 = vld [vmem:[#allocation16_spill] sm:$0xff]  ;;  %v7041_v38 = vrot.slane %v7040_v51, 5 }
 0x124   : > { %v1550_v44 = vsel %vm4913_vm5, %v7033_v7, %v1549_v26  ;;  %v1554_v55 = vor.u32 %v7034_v15, %v1549_v26  ;;  %v3270_v37 = vrot.slane %v7036_v54, 4  ;;  %v1584_v48 = vsel %vm4913_vm5, %v1579_v17, %v1583_v32  ;;  %v4245_v32 = vld [vmem:[%s4823_s20 + $0x54] sm:$0xe] }
 0x125   : > { %v7037_v43 = vmov %v7036_v54  ;;  %v2703_v36 = vsel %vm1231_vm7, %v2662_v18, %v6242_v24  ;;  %v4169_v23 = vcombine.low %v1574_v4, %v1584_v48  ;;  %v7039_v28 = vrot.slane %v7038_v25, 5  ;;  %v6452_v15 = vpop.permute.xlu0 %2438 }
 0x126   : > { %v3269_v56 = vsel %vm4850_vm2, %v4258_v1, %v7037_v43  ;;  %v1555_v35 = vrot.slane %v1554_v55, 4  ;;  %v2741_v62 = vsel %vm1264_vm8, %v2703_v36, %v6299_v60  ;;  %v3276_v41 = vsel %vm4850_vm2, %v4259_v21, %v7041_v38  ;;  %v7043_v1 = vld [vmem:[#allocation25_spill] sm:$0xff] }
 0x127   : > { %v3272_v59 = vsel %vm4850_vm2, %v3270_v37, %v7039_v28  ;;  %v7042_v45 = vmov %v7041_v38  ;;  %v6446_v4 = vrot.slane %v1685_v47, 5  ;;  %4408 = vmatprep.mubr.bf16.mxu1 %v2741_v62  ;;  %v4260_v17 = vrot.slane %v4244_v22, 9  ;;  %v6479_v28 = vpop.permute.xlu1 %2552 }
 0x128   : > { %v4274_v26 = vcombine.low %v3269_v56, %v3272_v59  ;;  %v3277_v24 = vrot.slane %v7042_v45, 4  ;;  %v1560_v42 = vsel %vm4913_vm5, %v1555_v35, %v1559_v57  ;;  %v7044_v60 = vrot.slane %v7043_v1, 5  ;;  %4409 = vmatmul.mubr.bf16.gmra.mrb[12].mxu1 %v2744_v20  ;;  %v7050_v56 = vld [vmem:[#allocation30_spill] sm:$0xff] }
 0x129   : > { %v2671_v55 = vsel %vm1182_vm6, %v4169_v23, %v6313_v63  ;;  %v4168_v12 = vcombine.low %v1550_v44, %v1560_v42  ;;  %v7046_v47 = vrot.slane %v7045_v29, 5  ;;  %v4261_v37 = vrot.slane %v4245_v32, 9  ;;  %v7048_v63 = vld [vmem:[#allocation29_spill] sm:$0xff]  ;;  %v7053_v32 = vld [vmem:[#allocation32_spill] sm:$0xff]  ;;  %v2551_v29 = vpop.permute.xlu0 %2550 }
 0x12a   : > { %v3284_v7 = vrot.slane %v7044_v60, 4  ;;  %4484 = vmatprep.mubr.msk.bf16.mxu0 %vm1182_vm6, %v4274_v26  ;;  %v7047_v18 = vmov %v7044_v60  ;;  %v7049_v44 = vrot.slane %v7048_v63, 5  ;;  %v7051_v21 = vrot.slane %v7050_v56, 5  ;;  %v4753_v26 = vld [vmem:[%s4823_s20 + $0x94] sm:$0xf] }
 0x12b   : > { %v3279_v54 = vsel %vm4850_vm2, %v3277_v24, %v7046_v47  ;;  %v3283_v48 = vsel %vm4850_vm2, %v4260_v17, %v7047_v18  ;;  %v2668_v36 = vsel %vm1182_vm6, %v4168_v12, %v6332_v5  ;;  %v2709_v20 = vsel %vm1231_vm7, %v2671_v55, %v6349_v6  ;;  %v4246_v6 = vld [vmem:[%s4823_s20 + $0x60] sm:$0xe]  ;;  %v4754_v17 = vld [vmem:[%s4823_s20 + $0x88] sm:$0xf] }
 0x12c   : > { %v4275_v57 = vcombine.low %v3276_v41, %v3279_v54  ;;  %v3286_v43 = vsel %vm4850_vm2, %v3284_v7, %v7049_v44  ;;  %v3291_v22 = vrot.slane %v7051_v21, 4  ;;  %v7052_v35 = vmov %v7051_v21  ;;  %v4247_v41 = vld [vmem:[%s4823_s20 + $0x6c] sm:$0xe] }
 0x12d   : > { %v4276_v23 = vcombine.low %v3283_v48, %v3286_v43  ;;  %v3290_v25 = vsel %vm4850_vm2, %v4261_v37, %v7052_v35  ;;  %v2707_v59 = vsel %vm1231_vm7, %v2668_v36, %v6362_v27  ;;  %v7054_v62 = vrot.slane %v7053_v32, 5  ;;  %v7056_v37 = vld [vmem:[#allocation40_spill] sm:$0xff]  ;;  %v7059_v43 = vld [vmem:[#allocation39_spill] sm:$0xff] }
 0x12e   : > { %v1619_v51 = vshll.u32 %v4753_v26, 16  ;;  %v1623_v38 = vshrl.u32 %v4753_v26, 16  ;;  %4485 = vmatmul.mubr.msk.bf16.gmra.mrb[4].mxu0 %vm1182_vm6, %v4275_v57  ;;  %v2747_v45 = vsel %vm1264_vm8, %v2707_v59, %v2627_v50  ;;  %v2750_v42 = vsel %vm1264_vm8, %v2709_v20, %v6395_v34  ;;  %v7062_v20 = vld [vmem:[#allocation42_spill] sm:$0xff]  ;;  %v2633_v59 = vpop.permute.xlu1 %2632 }
 0x12f   : > { %v3293_v5 = vsel %vm4850_vm2, %v3291_v22, %v7054_v62  ;;  %v1595_v27 = vshll.u32 %v4754_v17, 16  ;;  %4488 = vmatprep.mubr.msk.bf16.mxu0 %vm1182_vm6, %v4276_v23  ;;  %4412 = vmatprep.mubr.bf16.mxu1 %v2747_v45  ;;  %v7055_v7 = vshll.u32 %v5630_v11, 16  ;;  %v1599_v12 = vshrl.u32 %v4754_v17, 16 }
 0x130   : > { %v4277_v24 = vcombine.low %v3290_v25, %v3293_v5  ;;  %v1621_v1 = vrot.slane %v1619_v51, 5  ;;  %v1625_v60 = vrot.slane %v1623_v38, 4  ;;  %v4262_v54 = vrot.slane %v4246_v6, 9  ;;  %4413 = vmatmul.mubr.bf16.gmra.mrb[16].mxu1 %v2750_v42  ;;  %v7065_v5 = vld [vmem:[#allocation41_spill] sm:$0xff] }
 0x131   : > { %v1631_v55 = vrot.slane %v7055_v7, 5  ;;  %v1597_v47 = vrot.slane %v1595_v27, 5  ;;  %v7057_v50 = vrot.slane %v7056_v37, 5  ;;  %v4263_v18 = vrot.slane %v4247_v41, 9  ;;  %v4755_v41 = vld [vmem:[%s4823_s20 + $0xac] sm:$0xf] }
 0x132   : > { %v1626_v48 = vor.u32 %v1625_v60, %v1621_v1  ;;  %v1601_v34 = vrot.slane %v1599_v12, 4  ;;  %v7058_v63 = vshll.u32 %v5642_v19, 16  ;;  %v7060_v56 = vrot.slane %v7059_v43, 5  ;;  %v4248_v27 = vld [vmem:[%s4823_s20 + $0x78] sm:$0xe]  ;;  %v2631_v60 = vpop.permute.xlu0 %2630 }
 0x133   : > { %v3298_v57 = vrot.slane %v7057_v50, 4  ;;  %v1622_v11 = vsel %vm4913_vm5, %v6276_v58, %v1621_v1  ;;  %v7061_v22 = vmov %v7057_v50  ;;  %v7063_v23 = vrot.slane %v7062_v20, 5  ;;  %v4756_v7 = vld [vmem:[%s4823_s20 + $0xa0] sm:$0xf] }
 0x134   : > { %v1607_v44 = vrot.slane %v7058_v63, 5  ;;  %v3305_v21 = vrot.slane %v7060_v56, 4  ;;  %v3297_v36 = vsel %vm4850_vm2, %v4262_v54, %v7061_v22  ;;  %v7064_v19 = vmov %v7060_v56 }
 0x135   : > { %v3300_v35 = vsel %vm4850_vm2, %v3298_v57, %v7063_v23  ;;  %v3304_v25 = vsel %vm4850_vm2, %v4263_v18, %v7064_v19  ;;  %v1627_v32 = vrot.slane %v1626_v48, 4  ;;  %v1602_v58 = vor.u32 %v1601_v34, %v1597_v47  ;;  %v7069_v23 = vld [vmem:[#allocation46_spill] sm:$0xff] }
 0x136   : > { %v4278_v62 = vcombine.low %v3297_v36, %v3300_v35  ;;  %v7066_v26 = vrot.slane %v7065_v5, 5  ;;  %v1598_v38 = vsel %vm4913_vm5, %v6288_v2, %v1597_v47  ;;  %v1667_v45 = vshll.u32 %v4755_v41, 16  ;;  %4489 = vmatmul.mubr.msk.bf16.gmra.mrb[8].mxu0 %vm1182_vm6, %v4277_v24  ;;  %v6540_v24 = vpop.permute.xlu1 %2444  ;;  %v2443_v5 = vpop.permute.xlu0 %2442 }
 0x137   : > { %v1671_v17 = vshrl.u32 %v4755_v41, 16  ;;  %v1632_v42 = vsel %vm4913_vm5, %v1627_v32, %v1631_v55  ;;  %v1603_v1 = vrot.slane %v1602_v58, 4  ;;  %v1643_v12 = vshll.u32 %v4756_v7, 16 }
 0x138   : > { %v3307_v51 = vsel %vm4850_vm2, %v3305_v21, %v7066_v26  ;;  %v1647_v54 = vshrl.u32 %v4756_v7, 16  ;;  %v1709_v37 = vshll.u32 %v6283_v49, 16  ;;  %v4171_v50 = vcombine.low %v1622_v11, %v1632_v42  ;;  %4492 = vmatprep.mubr.msk.bf16.mxu0 %vm1182_vm6, %v4278_v62  ;;  %v4249_v11 = vld [vmem:[%s4823_s20 + $0x84] sm:$0xe]  ;;  %v7072_v26 = vld [vmem:[#allocation45_spill] sm:$0xff] }
 0x139   : > { %v4279_v6 = vcombine.low %v3304_v25, %v3307_v51  ;;  %v1669_v2 = vrot.slane %v1667_v45, 5  ;;  %v1673_v47 = vrot.slane %v1671_v17, 4  ;;  %v1608_v57 = vsel %vm4913_vm5, %v1603_v1, %v1607_v44  ;;  %v7074_v45 = vld [vmem:[#allocation49_spill] sm:$0xff] }
 0x13a   : > { %v1645_v18 = vrot.slane %v1643_v12, 5  ;;  %v1649_v55 = vrot.slane %v1647_v54, 4  ;;  %v4264_v48 = vrot.slane %v4248_v27, 9  ;;  %v2677_v34 = vsel %vm1182_vm6, %v4171_v50, %v6427_v46  ;;  %v2557_v12 = vpop.permute.xlu1 %2556  ;;  %v4757_v54 = vld [vmem:[%s4823_s20 + $0xc4] sm:$0xf] }
 0x13b   : > { %v4170_v63 = vcombine.low %v1598_v38, %v1608_v57  ;;  %v1674_v43 = vor.u32 %v1673_v47, %v1669_v2  ;;  %v7067_v56 = vshll.u32 %v5729_v8, 16  ;;  %v2713_v22 = vsel %vm1231_vm7, %v2677_v34, %v6479_v28  ;;  %v4758_v47 = vld [vmem:[%s4823_s20 + $0xbc] sm:$0x1] }
 0x13c   : > { %v1650_v44 = vor.u32 %v1649_v55, %v1645_v18  ;;  %v7068_v36 = vshll.u32 %v5748_v61, 16  ;;  %v7070_v35 = vrot.slane %v7069_v23, 5  ;;  %v2756_v8 = vsel %vm1264_vm8, %v2713_v22, %v2633_v59  ;;  %v6606_v23 = vld [vmem:[%s4823_s20 + $0xc8] sm:$0x1] }
 0x13d   : > { %v1679_v21 = vrot.slane %v7067_v56, 5  ;;  %v2674_v19 = vsel %vm1182_vm6, %v4170_v63, %v6452_v15  ;;  %v1675_v25 = vrot.slane %v1674_v43, 4  ;;  %v4265_v61 = vrot.slane %v4249_v11, 9  ;;  %v4250_v63 = vld [vmem:[%s4823_s20 + $0x90] sm:$0xe] }
 0x13e   : > { %v1655_v20 = vrot.slane %v7068_v36, 5  ;;  %v3311_v46 = vsel %vm4850_vm2, %v4264_v48, %v7070_v35  ;;  %v7071_v32 = vmov %v7070_v35  ;;  %v2711_v28 = vsel %vm1231_vm7, %v2674_v19, %v2551_v29  ;;  %4493 = vmatmul.mubr.msk.bf16.gmra.mrb[12].mxu0 %vm1182_vm6, %v4279_v6  ;;  %v6588_v6 = vld [vmem:[%s4823_s20 + $0xd0] sm:$0xf]  ;;  %v4760_v48 = vld [vmem:[%s4823_s20 + $0xb8] sm:$0xf]  ;;  %v2555_v19 = vpop.permute.xlu0 %2554 }
 0x13f   : > { %v3312_v58 = vrot.slane %v7071_v32, 4  ;;  %v1651_v62 = vrot.slane %v1650_v44, 4  ;;  %v7073_v51 = vrot.slane %v7072_v26, 5  ;;  %v1688_v41 = vor.u32 %v6446_v4, %v6341_v31  ;;  %v6595_v43 = vld [vmem:[%s4823_s20 + $0xc4] sm:$0xf] }
 0x140   : > { %v2753_v15 = vsel %vm1264_vm8, %v2711_v28, %v2631_v60  ;;  %v1670_v59 = vsel %vm4913_vm5, %v6293_v30, %v1669_v2  ;;  %v7075_v17 = vrot.slane %v7074_v45, 5  ;;  %v1680_v27 = vsel %vm4913_vm5, %v1675_v25, %v1679_v21  ;;  %v7077_v60 = vld [vmem:[#allocation47_spill] sm:$0xff]  ;;  %v4251_v44 = vld [vmem:[%s4823_s20 + $0x9c] sm:$0xe]  ;;  %v6602_v36 = vld [vmem:[%s4823_s20 + $0xd4] sm:$0x1] }
 0x141   : > { %v3319_v38 = vrot.slane %v7073_v51, 4  ;;  %4416 = vmatprep.mubr.bf16.mxu1 %v2753_v15  ;;  %v1646_v31 = vsel %vm4913_vm5, %v6295_v13, %v1645_v18  ;;  %v7076_v42 = vmov %v7073_v51  ;;  %v1656_v1 = vsel %vm4913_vm5, %v1651_v62, %v1655_v20  ;;  %v7079_v28 = vld [vmem:[#allocation53_spill] sm:$0xff]  ;;  %v2637_v15 = vpop.permute.xlu1 %2636  ;;  %v7082_v45 = vld [vmem:[#allocation51_spill] sm:$0xff] }
 0x142   : > { %v3314_v29 = vsel %vm4850_vm2, %v3312_v58, %v7075_v17  ;;  %v3318_v30 = vsel %vm4850_vm2, %v4265_v61, %v7076_v42  ;;  %4417 = vmatmul.mubr.bf16.gmra.mrb[20].mxu1 %v2756_v8  ;;  %v7078_v7 = vrot.slane %v7077_v60, 5  ;;  %v1715_v50 = vshll.u32 %v4757_v54, 16  ;;  %v7084_v42 = vld [vmem:[#allocation55_spill] sm:$0xff] }
 0x143   : > { %v4280_v4 = vcombine.low %v3311_v46, %v3314_v29  ;;  %v1719_v2 = vshrl.u32 %v4757_v54, 16  ;;  %v1701_v57 = vshll.u32 %v4758_v47, 16  ;;  %v3359_v18 = vrot.slane %v6588_v6, 5  ;;  %v2635_v47 = vpop.permute.xlu0 %2634 }
 0x144   : > { %v3321_v13 = vsel %vm4850_vm2, %v3319_v38, %v7078_v7  ;;  %v1691_v34 = vshll.u32 %v4760_v48, 16  ;;  %v3352_v56 = vrot.slane %v6595_v43, 5  ;;  %v1708_v21 = vrot.slane %v1706_v9, 4  ;;  %v4253_v7 = vld [vmem:[%s4823_s20 + $0xb4] sm:$0xe] }
 0x145   : > { %4496 = vmatprep.mubr.msk.bf16.mxu0 %vm1182_vm6, %v4280_v4  ;;  %v4281_v55 = vcombine.low %v3318_v30, %v3321_v13  ;;  %v1711_v11 = vrot.slane %v1709_v37, 5  ;;  %v4173_v22 = vcombine.low %v1670_v59, %v1680_v27  ;;  %v3362_v20 = vrot.slane %v6602_v36, 5  ;;  %v4252_v27 = vld [vmem:[%s4823_s20 + $0xa8] sm:$0xe] }
 0x146   : > { %v3355_v35 = vrot.slane %v6606_v23, 5  ;;  %v4172_v46 = vcombine.low %v1646_v31, %v1656_v1  ;;  %v1695_v8 = vshrl.u32 %v4760_v48, 16  ;;  %v6609_v25 = vrot.slane %v1688_v41, 4 }
 0x147   : > { %v6611_v32 = vrot.slane %v1715_v50, 5  ;;  %v1721_v49 = vrot.slane %v1719_v2, 4  ;;  %v4266_v9 = vrot.slane %v4250_v63, 9  ;;  %v6613_v37 = vrot.slane %v1691_v34, 5  ;;  %4497 = vmatmul.mubr.msk.bf16.gmra.mrb[16].mxu0 %vm1182_vm6, %v4281_v55 }
 0x148   : > { %v1697_v58 = vrot.slane %v1695_v8, 4  ;;  %v7080_v62 = vrot.slane %v7079_v28, 5  ;;  %v4267_v26 = vrot.slane %v4251_v44, 9  ;;  %v1712_v51 = vor.u32 %v1711_v11, %v1708_v21  ;;  %v7089_v11 = vld [vmem:[#allocation58_spill] sm:$0xff] }
 0x149   : > { %v2683_v38 = vsel %vm1182_vm6, %v4173_v22, %v6540_v24  ;;  %v7083_v17 = vrot.slane %v7082_v45, 5  ;;  %v2680_v31 = vsel %vm1182_vm6, %v4172_v46, %v2443_v5  ;;  %v7085_v30 = vrot.slane %v7084_v42, 5  ;;  %v2447_v45 = vpop.permute.xlu0 %2446 }
 0x14a   : > { %v3326_v61 = vrot.slane %v7080_v62, 4  ;;  %v7081_v41 = vmov %v7080_v62  ;;  %v2717_v4 = vsel %vm1231_vm7, %v2683_v38, %v2557_v12  ;;  %v2715_v13 = vsel %vm1231_vm7, %v2680_v31, %v2555_v19  ;;  %v7087_v12 = vld [vmem:[#allocation54_spill] sm:$0xff]  ;;  %v7091_v19 = vld [vmem:[#allocation57_spill] sm:$0xff]  ;;  %v4255_v38 = vld [vmem:[%s4823_s20 + $0xcc] sm:$0xe] }
 0x14b   : > { %v3325_v59 = vsel %vm4850_vm2, %v4266_v9, %v7081_v41  ;;  %v3333_v29 = vrot.slane %v7083_v17, 4  ;;  %v7086_v24 = vmov %v7083_v17  ;;  %v1722_v5 = vor.u32 %v1721_v49, %v6611_v32  ;;  %v4254_v9 = vld [vmem:[%s4823_s20 + $0xc0] sm:$0xe]  ;;  %v2449_v41 = vpop.permute.xlu1 %2448 }
 0x14c   : > { %v3328_v1 = vsel %vm4850_vm2, %v3326_v61, %v7085_v30  ;;  %v3332_v60 = vsel %vm4850_vm2, %v4267_v26, %v7086_v24  ;;  %v7088_v50 = vrot.slane %v7087_v12, 5  ;;  %v2762_v48 = vsel %vm1264_vm8, %v2717_v4, %v2637_v15  ;;  %v4764_v12 = vld [vmem:[%s4823_s20 + $0x84] sm:$0xf] }
 0x14d   : > { %v4282_v54 = vcombine.low %v3325_v59, %v3328_v1  ;;  %v1698_v34 = vor.u32 %v1697_v58, %v6613_v37  ;;  %v4268_v21 = vrot.slane %v4252_v27, 9  ;;  %v2759_v55 = vsel %vm1264_vm8, %v2715_v13, %v2635_v47  ;;  %v4766_v47 = vld [vmem:[%s4823_s20 + $0x78] sm:$0xf] }
 0x14e   : > { %v3335_v2 = vsel %vm4850_vm2, %v3333_v29, %v7088_v50  ;;  %v7090_v22 = vrot.slane %v7089_v11, 5  ;;  %v4269_v46 = vrot.slane %v4253_v7, 9  ;;  %v7092_v8 = vrot.slane %v7091_v19, 5  ;;  %4420 = vmatprep.mubr.bf16.mxu1 %v2759_v55  ;;  %v4765_v50 = vld [vmem:[%s4823_s20 + $0x88] sm:$0xf] }
 0x14f   : > { %v4283_v63 = vcombine.low %v3332_v60, %v3335_v2  ;;  %4500 = vmatprep.mubr.msk.bf16.mxu0 %vm1182_vm6, %v4282_v54  ;;  %v1713_v28 = vrot.slane %v1712_v51, 4  ;;  %v1727_v62 = vrot.slane %v1725_v53, 5  ;;  %v1703_v58 = vrot.slane %v1701_v57, 5  ;;  %4421 = vmatmul.mubr.bf16.gmra.mrb[24].mxu1 %v2762_v48  ;;  %v2561_v30 = vpop.permute.xlu1 %2560  ;;  %v4767_v48 = vld [vmem:[%s4823_s20 + $0x7c] sm:$0xf] }
 0x150   : > { %v3340_v44 = vrot.slane %v7090_v22, 4  ;;  %v3347_v49 = vrot.slane %v7092_v8, 4  ;;  %v7093_v61 = vmov %v7090_v22  ;;  %v1723_v15 = vrot.slane %v1722_v5, 4 }
 0x151   : > { %v3339_v26 = vsel %vm4850_vm2, %v4268_v21, %v7093_v61  ;;  %v7094_v51 = vmov %v7092_v8  ;;  %v1699_v57 = vrot.slane %v1698_v34, 4  ;;  %v4270_v27 = vrot.slane %v4254_v9, 9  ;;  %4501 = vmatmul.mubr.msk.bf16.gmra.mrb[20].mxu0 %vm1182_vm6, %v4283_v63  ;;  %v4768_v9 = vld [vmem:[%s4823_s20 + $0x9c] sm:$0xf] }
 0x152   : > { %v3342_v59 = vsel %vm4850_vm2, %v3340_v44, %v3341_v33  ;;  %v3346_v52 = vsel %vm4850_vm2, %v4269_v46, %v7094_v51  ;;  %v3349_v53 = vsel %vm4850_vm2, %v3347_v49, %v3348_v40  ;;  %v3354_v39 = vrot.slane %v3352_v56, 4 }
 0x153   : > { %v4284_v17 = vcombine.low %v3339_v26, %v3342_v59  ;;  %v4285_v29 = vcombine.low %v3346_v52, %v3349_v53  ;;  %v4271_v31 = vrot.slane %v4255_v38, 9  ;;  %v3361_v33 = vrot.slane %v3359_v18, 4  ;;  %v4770_v26 = vld [vmem:[%s4823_s20 + $0x90] sm:$0xf]  ;;  %v4771_v38 = vld [vmem:[%s4823_s20 + $0x94] sm:$0xf] }
 0x154   : > { %v1718_v4 = vsel %vm4913_vm5, %v1713_v28, %v6611_v32  ;;  %v3353_v3 = vsel %vm4850_vm2, %v4270_v27, %v3352_v56  ;;  %v1728_v40 = vsel %vm4913_vm5, %v1723_v15, %v1727_v62  ;;  %v3356_v42 = vsel %vm4850_vm2, %v3354_v39, %v3355_v35  ;;  %v4769_v28 = vld [vmem:[%s4823_s20 + $0xa0] sm:$0xf] }
 0x155   : > { %v3360_v32 = vsel %vm4850_vm2, %v4271_v31, %v3359_v18  ;;  %v3363_v43 = vsel %vm4850_vm2, %v3361_v33, %v3362_v20  ;;  %v1694_v56 = vsel %vm4913_vm5, %v6609_v25, %v6613_v37  ;;  %v1704_v23 = vsel %vm4913_vm5, %v1699_v57, %v1703_v58  ;;  %4504 = vmatprep.mubr.msk.bf16.mxu0 %vm1182_vm6, %v4284_v17  ;;  %v2559_v18 = vpop.permute.xlu0 %2558  ;;  %v2641_v25 = vpop.permute.xlu1 %2640  ;;  %v7095_v27 = vld [vmem:[#allocation10_spill] sm:$0xff] }
 0x156   : > { %v4286_v35 = vcombine.low %v3353_v3, %v3356_v42  ;;  %v4287_v6 = vcombine.low %v3360_v32, %v3363_v43  ;;  %v4175_v1 = vcombine.low %v1718_v4, %v1728_v40  ;;  %v4174_v24 = vcombine.low %v1694_v56, %v1704_v23  ;;  %v7096_v4 = vld [vmem:[#allocation50_spill] sm:$0xff] }
 0x157   : > { %v4011_v2 = vcombine.low %v4764_v12, %v4765_v50  ;;  %v4010_v34 = vcombine.low %v4766_v47, %v4767_v48  ;;  %v4013_v62 = vcombine.low %v4768_v9, %v4769_v28  ;;  %v4012_v15 = vcombine.low %v4770_v26, %v4771_v38 }
 0x158   : > { %v2689_v36 = vsel %vm1182_vm6, %v4175_v1, %v2449_v41  ;;  %v2686_v16 = vsel %vm1182_vm6, %v4174_v24, %v2447_v45  ;;  %v4014_v39 = vcombine.low %v7095_v27, %v6152_v14  ;;  %v4015_v3 = vcombine.low %v7096_v4, %v6185_v0  ;;  %v6771_v4 = vld [vmem:[%s6848_s2] ss:$0 sm:$0xff] }
 0x159   : > { %v2721_v20 = vsel %vm1231_vm7, %v2689_v36, %v2561_v30  ;;  %4505 = vmatmul.mubr.msk.bf16.gmra.mrb[24].mxu0 %vm1182_vm6, %v4285_v29  ;;  %v2719_v10 = vsel %vm1231_vm7, %v2686_v16, %v2559_v18  ;;  %v2639_v37 = vpop.permute.xlu0 %2638  ;;  %v981_v13 = vpop.permute.xlu1 %980 }
 0x15a   : > { %v2768_v60 = vsel %vm1264_vm8, %v2721_v20, %v2641_v25  ;;  %4508 = vmatprep.mubr.msk.bf16.mxu0 %vm1182_vm6, %v4286_v35  ;;  %v2765_v7 = vsel %vm1264_vm8, %v2719_v10, %v2639_v37  ;;  %v1218_v55 = vsel %vm1182_vm6, %v4011_v2, %v981_v13 }
 0x15b   : > { %4424 = vmatprep.mubr.bf16.mxu1 %v2765_v7 }
 0x15c   : > { %4425 = vmatmul.mubr.bf16.gmra.mrb[28].mxu1 %v2768_v60 }
 0x15d   : > { %v1061_v5 = vpop.permute.xlu1 %1060  ;;  %v979_v54 = vpop.permute.xlu0 %978 }
 0x15e   : > { %v1215_v11 = vsel %vm1182_vm6, %v4010_v34, %v979_v54  ;;  %v1255_v22 = vsel %vm1231_vm7, %v1218_v55, %v1061_v5 }
 0x161   : > { %4509 = vmatmul.mubr.msk.bf16.gmra.mrb[28].mxu0 %vm1182_vm6, %v4287_v6  ;;  %v1059_v63 = vpop.permute.xlu0 %1058  ;;  %v1173_v21 = vpop.permute.xlu1 %1172 }
 0x162   : > { %v1253_v44 = vsel %vm1231_vm7, %v1215_v11, %v1059_v63  ;;  %v1299_v46 = vsel %vm1264_vm8, %v1255_v22, %v1173_v21 }
 0x165   : > { %v1171_v19 = vpop.permute.xlu0 %1170 }
 0x166   : > { %v1296_v8 = vsel %vm1264_vm8, %v1253_v44, %v1171_v19 }
 0x167   : > { %4464 = vmatprep.mubr.bf16.mxu1 %v1296_v8 }
 0x168   : > { %4465 = vmatmul.mubr.bf16.vlgmr.msra.gmra.mrb[20].mxu1 %v1299_v46 }
 0x16b   : > { %v985_v49 = vpop.permute.xlu1 %984 }
 0x16c   : > { %v1224_v41 = vsel %vm1182_vm6, %v4013_v62, %v985_v49 }
 0x16d   : > { %v983_v58 = vpop.permute.xlu0 %982 }
 0x16e   : > { %v1221_v51 = vsel %vm1182_vm6, %v4012_v15, %v983_v58 }
 0x16f   : > { %v1065_v61 = vpop.permute.xlu1 %1064 }
 0x170   : > { %v1259_v52 = vsel %vm1231_vm7, %v1224_v41, %v1065_v61 }
 0x171   : > { %v1063_v59 = vpop.permute.xlu0 %1062 }
 0x172   : > { %v1257_v57 = vsel %vm1231_vm7, %v1221_v51, %v1063_v59 }
 0x173   : > { %v1177_v53 = vpop.permute.xlu1 %1176 }
 0x174   : > { %v1305_v17 = vsel %vm1264_vm8, %v1259_v52, %v1177_v53 }
 0x175   : > { %v1175_v45 = vpop.permute.xlu0 %1174 }
 0x176   : > { %v1302_v29 = vsel %vm1264_vm8, %v1257_v57, %v1175_v45 }
 0x177   : > { %4468 = vmatprep.mubr.bf16.mxu1 %v1302_v29 }
 0x178   : > { %4469 = vmatmul.mubr.bf16.gmra.mrb[24].mxu1 %v1305_v17 }
 0x17d   : > { %v987_v31 = vpop.permute.xlu0 %986 }
 0x17e   : > { %v1227_v33 = vsel %vm1182_vm6, %v4014_v39, %v987_v31 }
 0x180   : > { %v989_v40 = vpop.permute.xlu1 %988 }
 0x181   : > { %v1067_v42 = vpop.permute.xlu0 %1066  ;;  %v1230_v43 = vsel %vm1182_vm6, %v4015_v3, %v989_v40 }
 0x182   : > { %v1261_v32 = vsel %vm1231_vm7, %v1227_v33, %v1067_v42 }
 0x184   : > { %v1069_v56 = vpop.permute.xlu1 %1068 }
 0x185   : > { %v1179_v23 = vpop.permute.xlu0 %1178  ;;  %v1263_v6 = vsel %vm1231_vm7, %v1230_v43, %v1069_v56 }
 0x186   : > { %v1308_v35 = vsel %vm1264_vm8, %v1261_v32, %v1179_v23 }
 0x187   : > { %4472 = vmatprep.mubr.bf16.mxu1 %v1308_v35 }
 0x189   : > { %v1181_v14 = vpop.permute.xlu1 %1180 }
 0x18a   : > { %v1311_v30 = vsel %vm1264_vm8, %v1263_v6, %v1181_v14 }
 0x18b   : > { %4473 = vmatmul.mubr.bf16.gmra.mrb[28].mxu1 %v1311_v30 }
 0x1b8   : > { %v4398_v1 = vpop.f32.mrb[0].mxu1 }
 0x1b9   : > { %v2868_v18 = vpop.f32.mrb[1].mxu1 }
 0x1ba   : > { %v4399_v0 = vpop.f32.mrb[2].mxu1 }
 0x1bb   : > { %v2871_v24 = vpop.f32.mrb[3].mxu1 }
 0x1da   : > { %v4402_v36 = vpop.f32.mrb[4].mxu1 }
 0x1db   : > { %v2884_v16 = vpop.f32.mrb[5].mxu1 }
 0x1dc   : > { %v4403_v20 = vpop.f32.mrb[6].mxu1 }
 0x1dd   : > { %v2887_v25 = vpop.f32.mrb[7].mxu1 }
 0x1f3   : > { %v4406_v10 = vpop.f32.mrb[8].mxu1 }
 0x1f4   : > { %v2900_v37 = vpop.f32.mrb[9].mxu1 }
 0x1f5   : > { %v4407_v60 = vpop.f32.mrb[10].mxu1  ;;  %v4482_v13 = vpop.f32.mrb[0].mxu0 }
 0x1f6   : > { %v2903_v7 = vpop.f32.mrb[11].mxu1  ;;  %v4528_v5 = vadd.f32 %v4482_v13, %v4398_v1  ;;  %v3510_v54 = vpop.f32.mrb[1].mxu0 }
 0x1f7   : > { %v4529_v12 = vadd.f32 %v3510_v54, %v2868_v18  ;;  %v4483_v50 = vpop.f32.mrb[2].mxu0 }
 0x1f8   : > { %v4530_v2 = vadd.f32 %v4483_v50, %v4399_v0  ;;  %v3513_v47 = vpop.f32.mrb[3].mxu0  ;;  %v3678_v40 = vadd.f32 %v4528_v5, %v6771_v4 }
 0x1f9   : > { %v4531_v48 = vadd.f32 %v3513_v47, %v2871_v24  ;;  %v3676_v43 = vadd.f32 %v4529_v12, %v6771_v4 }
 0x1fa   : > { %v3679_v35 = vadd.f32 %v4530_v2, %v6771_v4  ;;  %v3710_v24 = vmax.f32 %v3678_v40, 0.0 }
 0x1fb   : > { %v4410_v34 = vpop.f32.mrb[12].mxu1  ;;  %v3677_v1 = vadd.f32 %v4531_v48, %v6771_v4 }
 0x1fc   : > { %v2916_v63 = vpop.f32.mrb[13].mxu1 }
 0x1fd   : > { %v4411_v21 = vpop.f32.mrb[14].mxu1  ;;  %v3709_v13 = vmax.f32 %v3677_v1, 0.0 }
 0x1fe   : > { %v2919_v55 = vpop.f32.mrb[15].mxu1 }
 0x201   : > { %v4486_v11 = vpop.f32.mrb[4].mxu0 }
 0x202   : > { %v6744_v22 = vadd.f32 %v4486_v11, %v4402_v36  ;;  %v3526_v44 = vpop.f32.mrb[5].mxu0 }
 0x203   : > { %v6746_v46 = vadd.f32 %v3526_v44, %v2884_v16  ;;  %v4487_v19 = vpop.f32.mrb[6].mxu0  ;;  %v4414_v28 = vpop.f32.mrb[16].mxu1 }
 0x204   : > { %v6748_v8 = vadd.f32 %v4487_v19, %v4403_v20  ;;  %v3529_v49 = vpop.f32.mrb[7].mxu0  ;;  %v2932_v62 = vpop.f32.mrb[17].mxu1  ;;  %v3708_v20 = vmax.f32 %v3676_v43, 0.0 }
 0x205   : > { %v6750_v9 = vadd.f32 %v3529_v49, %v2887_v25  ;;  %v4415_v58 = vpop.f32.mrb[18].mxu1 }
 0x206   : > { %v2935_v26 = vpop.f32.mrb[19].mxu1 }
 0x209   : > { %v4490_v61 = vpop.f32.mrb[8].mxu0 }
 0x20a   : > { %v6752_v38 = vadd.f32 %v4490_v61, %v4406_v10  ;;  %v3542_v15 = vpop.f32.mrb[9].mxu0 }
 0x20b   : > { %v6754_v41 = vadd.f32 %v3542_v15, %v2900_v37  ;;  %v4491_v59 = vpop.f32.mrb[10].mxu0  ;;  %v3711_v37 = vmax.f32 %v3679_v35, 0.0  ;;  %v3680_v15 = vadd.f32 %v6746_v46, %v6771_v4 }
 0x20c   : > { %v6756_v51 = vadd.f32 %v4491_v59, %v4407_v60  ;;  %v3545_v52 = vpop.f32.mrb[11].mxu0 }
 0x20d   : > { %v6758_v53 = vadd.f32 %v3545_v52, %v2903_v7  ;;  %v3712_v46 = vmax.f32 %v3680_v15, 0.0 }
 0x211   : > { %v4494_v57 = vpop.f32.mrb[12].mxu0 }
 0x212   : > { %v6760_v45 = vadd.f32 %v4494_v57, %v4410_v34  ;;  %v3558_v17 = vpop.f32.mrb[13].mxu0  ;;  %v3683_v57 = vadd.f32 %v6748_v8, %v6771_v4 }
 0x213   : > { %v6762_v29 = vadd.f32 %v3558_v17, %v2916_v63  ;;  %v4495_v27 = vpop.f32.mrb[14].mxu0 }
 0x214   : > { %v6764_v39 = vadd.f32 %v4495_v27, %v4411_v21  ;;  %v3561_v31 = vpop.f32.mrb[15].mxu0  ;;  %v3715_v35 = vmax.f32 %v3683_v57, 0.0 }
 0x215   : > { %v6766_v33 = vadd.f32 %v3561_v31, %v2919_v55 }
 0x21a   : > { %v4498_v3 = vpop.f32.mrb[16].mxu0 }
 0x21b   : > { %v4544_v42 = vadd.f32 %v4498_v3, %v4414_v28  ;;  %v3574_v32 = vpop.f32.mrb[17].mxu0  ;;  %v3681_v3 = vadd.f32 %v6750_v9, %v6771_v4 }
 0x21c   : > { %v4545_v56 = vadd.f32 %v3574_v32, %v2932_v62  ;;  %v4499_v23 = vpop.f32.mrb[18].mxu0 }
 0x21d   : > { %v3694_v6 = vadd.f32 %v4544_v42, %v6771_v4  ;;  %v4546_v14 = vadd.f32 %v4499_v23, %v4415_v58  ;;  %v3577_v30 = vpop.f32.mrb[19].mxu0  ;;  %v3682_v58 = vadd.f32 %v6744_v22, %v6771_v4 }
 0x21e   : > { %v3692_v18 = vadd.f32 %v4545_v56, %v6771_v4  ;;  %v4547_v0 = vadd.f32 %v3577_v30, %v2935_v26 }
 0x21f   : > { %v3726_v36 = vmax.f32 %v3694_v6, 0.0  ;;  %v3695_v16 = vadd.f32 %v4546_v14, %v6771_v4  ;;  %v3714_v42 = vmax.f32 %v3682_v58, 0.0  ;;  %v3713_v14 = vmax.f32 %v3681_v3, 0.0 }
 0x220   : > { %v3724_v25 = vmax.f32 %v3692_v18, 0.0  ;;  %v3693_v10 = vadd.f32 %v4547_v0, %v6771_v4  ;;  %v4783_v0 = vmov 0  }
 0x221   : > { %v3727_v60 = vmax.f32 %v3695_v16, 0.0  ;;  %v4609_v7 = vpack.i.bf16 %v3710_v24, %v3726_v36  ;;  %3860 = vmatprep.mubr.bf16.mxu1 %v4783_v0  ;;  %v3686_v36 = vadd.f32 %v6752_v38, %v6771_v4 }
 0x222   : > { %v3725_v5 = vmax.f32 %v3693_v10, 0.0  ;;  %v4605_v54 = vpack.i.bf16 %v3708_v20, %v3724_v25  ;;  %v3684_v25 = vadd.f32 %v6754_v41, %v6771_v4 }
 0x223   : > { %v4611_v50 = vpack.i.bf16 %v3711_v37, %v3727_v60  ;;  %v3687_v60 = vadd.f32 %v6756_v51, %v6771_v4 }
 0x224   : > { %v4502_v12 = vpop.f32.mrb[20].mxu0  ;;  %4606 = vxpose.xlu0.b32.start [1/16] (narrow) %v4605_v54, 32  ;;  %v4607_v47 = vpack.i.bf16 %v3709_v13, %v3725_v5  ;;  %v3685_v54 = vadd.f32 %v6758_v53, %v6771_v4 }
 0x225   : > { %v3590_v2 = vpop.f32.mrb[21].mxu0  ;;  %v3719_v51 = vmax.f32 %v3687_v60, 0.0 }
 0x226   : > { %v4503_v48 = vpop.f32.mrb[22].mxu0 }
 0x227   : > { %v3593_v34 = vpop.f32.mrb[23].mxu0 }
 0x228   : > { %4608 = vxpose.xlu0.b32.cont [2/16] (narrow) %v4607_v47, 32  ;;  %v3716_v47 = vmax.f32 %v3684_v25, 0.0 }
 0x22c   : > { %v4506_v63 = vpop.f32.mrb[24].mxu0  ;;  %4610 = vxpose.xlu0.b32.cont [3/16] (narrow) %v4609_v7, 32 }
 0x22d   : > { %v3606_v21 = vpop.f32.mrb[25].mxu0 }
 0x22e   : > { %v4507_v55 = vpop.f32.mrb[26].mxu0 }
 0x22f   : > { %v3609_v11 = vpop.f32.mrb[27].mxu0 }
 0x230   : > { %4612 = vxpose.xlu0.b32.cont [4/16] (narrow) %v4611_v50, 32  ;;  %v3718_v50 = vmax.f32 %v3686_v36, 0.0 }
 0x234   : > { %v6781_v44 = vpop.f32.mrb[28].mxu0 }
 0x235   : > { %v6783_v19 = vpop.f32.mrb[29].mxu0 }
 0x236   : > { %v6785_v49 = vpop.f32.mrb[30].mxu0 }
 0x237   : > { %v6787_v28 = vpop.f32.mrb[31].mxu0 }
 0x23b   : > { %v4466_v62 = vpop.f32.mrb[20].mxu1 }
 0x23c   : > { %v4548_v61 = vadd.f32 %v4502_v12, %v4466_v62  ;;  %v3157_v26 = vpop.f32.mrb[21].mxu1 }
 0x23d   : > { %v4549_v59 = vadd.f32 %v3590_v2, %v3157_v26  ;;  %v4467_v52 = vpop.f32.mrb[22].mxu1 }
 0x23e   : > { %v3698_v17 = vadd.f32 %v4548_v61, %v6771_v4  ;;  %v4550_v27 = vadd.f32 %v4503_v48, %v4467_v52  ;;  %v3160_v31 = vpop.f32.mrb[23].mxu1  ;;  %v3688_v52 = vadd.f32 %v6762_v29, %v6771_v4 }
 0x23f   : > { %v3696_v40 = vadd.f32 %v4549_v59, %v6771_v4  ;;  %v4551_v22 = vadd.f32 %v3593_v34, %v3160_v31 }
 0x240   : > { %v3730_v32 = vmax.f32 %v3698_v17, 0.0  ;;  %v3699_v43 = vadd.f32 %v4550_v27, %v6771_v4  ;;  %v3691_v27 = vadd.f32 %v6764_v39, %v6771_v4 }
 0x241   : > { %v3728_v56 = vmax.f32 %v3696_v40, 0.0  ;;  %v3697_v23 = vadd.f32 %v4551_v22, %v6771_v4 }
 0x242   : > { %v3731_v8 = vmax.f32 %v3699_v43, 0.0  ;;  %v4617_v6 = vpack.i.bf16 %v3714_v42, %v3730_v32  ;;  %v3720_v32 = vmax.f32 %v3688_v52, 0.0 }
 0x243   : > { %v3729_v30 = vmax.f32 %v3697_v23, 0.0  ;;  %v4613_v1 = vpack.i.bf16 %v3712_v46, %v3728_v56  ;;  %v3723_v46 = vmax.f32 %v3691_v27, 0.0 }
 0x244   : > { %v4619_v18 = vpack.i.bf16 %v3715_v35, %v3731_v8 }
 0x245   : > { %4614 = vxpose.xlu0.b32.cont [5/16] (narrow) %v4613_v1, 32  ;;  %v4615_v9 = vpack.i.bf16 %v3713_v14, %v3729_v30 }
 0x249   : > { %4616 = vxpose.xlu0.b32.cont [6/16] (narrow) %v4615_v9, 32 }
 0x24b   : > { %v4470_v24 = vpop.f32.mrb[24].mxu1 }
 0x24c   : > { %v4552_v16 = vadd.f32 %v4506_v63, %v4470_v24  ;;  %v3173_v20 = vpop.f32.mrb[25].mxu1 }
 0x24d   : > { %4618 = vxpose.xlu0.b32.cont [7/16] (narrow) %v4617_v6, 32  ;;  %v4553_v10 = vadd.f32 %v3606_v21, %v3173_v20  ;;  %v4471_v37 = vpop.f32.mrb[26].mxu1 }
 0x24e   : > { %v3702_v7 = vadd.f32 %v4552_v16, %v6771_v4  ;;  %v4554_v13 = vadd.f32 %v4507_v55, %v4471_v37  ;;  %v3176_v5 = vpop.f32.mrb[27].mxu1  ;;  %v3717_v55 = vmax.f32 %v3685_v54, 0.0 }
 0x24f   : > { %v3700_v38 = vadd.f32 %v4553_v10, %v6771_v4  ;;  %v4555_v12 = vadd.f32 %v3609_v11, %v3176_v5  ;;  %v3690_v11 = vadd.f32 %v6760_v45, %v6771_v4  ;;  %v3689_v45 = vadd.f32 %v6766_v33, %v6771_v4  ;;  %v4724_v5 = vld [vmem:[%s6849_s3 + $0x8] sm:$0xff]  }
 0x250   : > { %v3734_v2 = vmax.f32 %v3702_v7, 0.0  ;;  %v3703_v41 = vadd.f32 %v4554_v13, %v6771_v4  ;;  %v4723_v13 = vld [vmem:[%s6849_s3] sm:$0xff]  }
 0x251   : > { %4620 = vxpose.xlu0.b32.cont [8/16] (narrow) %v4619_v18, 32  ;;  %v3732_v48 = vmax.f32 %v3700_v38, 0.0  ;;  %v3701_v34 = vadd.f32 %v4555_v12, %v6771_v4  ;;  %v3722_v29 = vmax.f32 %v3690_v11, 0.0  ;;  %v3721_v23 = vmax.f32 %v3689_v45, 0.0 }
 0x252   : > { %v3735_v63 = vmax.f32 %v3703_v41, 0.0  ;;  %v4625_v21 = vpack.i.bf16 %v3718_v50, %v3734_v2 }
 0x253   : > { %v3733_v62 = vmax.f32 %v3701_v34, 0.0  ;;  %v4621_v58 = vpack.i.bf16 %v3716_v47, %v3732_v48 }
 0x254   : > { %v4627_v61 = vpack.i.bf16 %v3719_v51, %v3735_v63 }
 0x255   : > { %4622 = vxpose.xlu0.b32.cont [9/16] (narrow) %v4621_v58, 32  ;;  %v4623_v53 = vpack.i.bf16 %v3717_v55, %v3733_v62 }
 0x259   : > { %4624 = vxpose.xlu0.b32.cont [10/16] (narrow) %v4623_v53, 32 }
 0x25d   : > { %4626 = vxpose.xlu0.b32.cont [11/16] (narrow) %v4625_v21, 32 }
 0x25e   : > { %v4474_v26 = vpop.f32.mrb[28].mxu1 }
 0x25f   : > { %v4556_v15 = vadd.f32 %v6781_v44, %v4474_v26  ;;  %v3189_v59 = vpop.f32.mrb[29].mxu1 }
 0x260   : > { %v4557_v57 = vadd.f32 %v6783_v19, %v3189_v59  ;;  %v4475_v17 = vpop.f32.mrb[30].mxu1 }
 0x261   : > { %v3706_v31 = vadd.f32 %v4556_v15, %v6771_v4  ;;  %v4558_v3 = vadd.f32 %v6785_v49, %v4475_v17  ;;  %v3192_v40 = vpop.f32.mrb[31].mxu1  ;;  %4628 = vxpose.xlu0.b32.cont [12/16] (narrow) %v4627_v61, 32 }
 0x262   : > { %v3704_v44 = vadd.f32 %v4557_v57, %v6771_v4  ;;  %v4559_v22 = vadd.f32 %v6787_v28, %v3192_v40 }
 0x263   : > { %v3738_v42 = vmax.f32 %v3706_v31, 0.0  ;;  %v3707_v19 = vadd.f32 %v4558_v3, %v6771_v4 }
 0x264   : > { %v3736_v43 = vmax.f32 %v3704_v44, 0.0  ;;  %v3705_v39 = vadd.f32 %v4559_v22, %v6771_v4 }
 0x265   : > { %v3739_v56 = vmax.f32 %v3707_v19, 0.0  ;;  %v4633_v49 = vpack.i.bf16 %v3722_v29, %v3738_v42 }
 0x266   : > { %v3737_v35 = vmax.f32 %v3705_v39, 0.0  ;;  %v4629_v8 = vpack.i.bf16 %v3720_v32, %v3736_v43 }
 0x267   : > { %v4635_v33 = vpack.i.bf16 %v3723_v46, %v3739_v56 }
 0x268   : > { %4630 = vxpose.xlu0.b32.cont [13/16] (narrow) %v4629_v8, 32  ;;  %v4631_v6 = vpack.i.bf16 %v3721_v23, %v3737_v35 }
 0x26c   : > { %4632 = vxpose.xlu0.b32.cont [14/16] (narrow) %v4631_v6, 32 }
 0x270   : > { %4634 = vxpose.xlu0.b32.cont [15/16] (narrow) %v4633_v49, 32 }
 0x274   : > { %4636 = vxpose.xlu0.b32.end [16/16] (narrow) %v4635_v33, 32 }
 0x2b8   : > { %v4637_v28 = vpop.trf.xlu0 }
 0x2b9   : > { %v4641_v14 = vunpack.i.h.bf16 %v4637_v28  ;;  %v4638_v30 = vunpack.i.l.bf16 %v4637_v28 }
 0x2bc   : > { %v4642_v1 = vpop.trf.xlu0 }
 0x2bd   : > { %v4646_v18 = vunpack.i.h.bf16 %v4642_v1  ;;  %v4643_v9 = vunpack.i.l.bf16 %v4642_v1 }
 0x2bf   : > { %v3805_v24 = vpack.c.bf16 %v4643_v9, %v4638_v30  ;;  %v3804_v4 = vpack.c.bf16 %v4646_v18, %v4641_v14 }
 0x2c0   : > { %v4647_v36 = vpop.trf.xlu0 }
 0x2c1   : > { %3828 = vmatprep.subr.bf16.mxu1 %v3805_v24  ;;  %v4651_v16 = vunpack.i.h.bf16 %v4647_v36  ;;  %v4648_v20 = vunpack.i.l.bf16 %v4647_v36 }
 0x2c2   : > { %3829 = vmatpush1.bf16.msra.mxu1 %v3804_v4 }
 0x2c4   : > { %v4652_v25 = vpop.trf.xlu0 }
 0x2c5   : > { %v4656_v10 = vunpack.i.h.bf16 %v4652_v25  ;;  %v4653_v37 = vunpack.i.l.bf16 %v4652_v25 }
 0x2c7   : > { %v3806_v60 = vpack.c.bf16 %v4656_v10, %v4651_v16  ;;  %v3807_v7 = vpack.c.bf16 %v4653_v37, %v4648_v20 }
 0x2c9   : > { %3830 = vmatprep.subr.bf16.mxu1 %v3807_v7 }
 0x2ca   : > { %3831 = vmatpush1.bf16.msra.mxu1 %v3806_v60 }
 0x2cd   : > { %4309 = vmatmul.mubr.msk.bf16.vlgmr.msra.gmra.mrb[32].mxu1 %vm1182_vm6, %v4723_v13 }
 0x2ce   : > { %3870 = vmatprep.mubr.bf16.mxu1 %v4783_v0 }
 0x2d5   : > { %4310 = vmatmul.mubr.msk.bf16.gmra.mrb[36].mxu1 %vm1182_vm6, %v4724_v5 }
 0x3a0   : > { %v3862_v54 = vpop.f32.mrb[32].mxu1 }
 0x3a1   : > { %3881 = vst [vmem:[%s197_s17] sm:$0xff] %v3862_v54  ;;  %v3864_v38 = vpop.f32.mrb[33].mxu1 }
 0x3a2   : > { %3882 = vst [vmem:[%s197_s17 + $0x8] sm:$0xff] %v3864_v38  ;;  %v3866_v12 = vpop.f32.mrb[34].mxu1 }
 0x3a3   : > { %3883 = vst [vmem:[%s197_s17 + $0x10] sm:$0xff] %v3866_v12  ;;  %v3868_v50 = vpop.f32.mrb[35].mxu1 }
 0x3a4   : > { %3884 = vst [vmem:[%s197_s17 + $0x18] sm:$0xff] %v3868_v50 }
 0x3a8   : > { %v3872_v0 = vpop.f32.mrb[36].mxu1 }
 0x3a9   : > { %3885 = vst [vmem:[%s197_s17 + $0x20] sm:$0xff] %v3872_v0  ;;  %v3874_v2 = vpop.f32.mrb[37].mxu1 }
 0x3aa   : > { %3886 = vst [vmem:[%s197_s17 + $0x28] sm:$0xff] %v3874_v2  ;;  %v3876_v41 = vpop.f32.mrb[38].mxu1 }
 0x3ab   : > { %3887 = vst [vmem:[%s197_s17 + $0x30] sm:$0xff] %v3876_v41  ;;  %v3878_v47 = vpop.f32.mrb[39].mxu1 }
 0x3ac   : > { %3888 = vst [vmem:[%s197_s17 + $0x38] sm:$0xff] %v3878_v47 }
 0x3ad PF: > { %s14_s15 = sadd.s32 1, %s4778_s15  }
 0x3ae   : > { %p11_p4 = scmp.ge.s32.totalorder %s14_s15, 4  }
 0x3b0   :  { %13 = sbr.rel (!%p11_p4) target bundleno = 1 (0x1), region = 68 }

</bundles_post_ra>
